<compile_context>
chip_gen: v5e
topology: v5e:2x2
jax: 0.10.0
libtpu: 0.0.40
codegen_flags: <defaults>
</compile_context>

<pallas_src>
import numpy as np
import jax
import jax.numpy as jnp
from jax import lax
from jax.experimental import pallas as pl
from jax.experimental.pallas import tpu as pltpu

BN_EPS = 1e-5
_MAXPAD = 4      # largest conv padding in the network
_WOFF = 8        # sublane-aligned write offset into the shared pad scratch (>= _MAXPAD)
_CMAX = 128      # widest conv Cin

# (name, K, Cin, Cout, pad, dil) for the 7 conv layers, in execution order.
_CONV_CFG = (
    ("c1", 5, 1,   64,  2, 1),   # conv1
    ("a1", 7, 64,  32,  3, 1),   # spatial_attention conv #1
    ("a2", 7, 32,  64,  3, 1),   # spatial_attention conv #2 (sigmoid)
    ("d1", 3, 64,  128, 2, 2),   # dilation_block conv #1 (dil=2)
    ("d2", 3, 128, 128, 4, 4),   # dilation_block conv #2 (dil=4)
    ("r1", 3, 128, 128, 1, 1),   # res_block1 conv #1
    ("r2", 3, 128, 128, 1, 1),   # res_block1 conv #2 (+identity, then SiLU)
)

# Bias packing: 11 vectors -> one lane-dense operand, 128-aligned segments.
_BIAS_SEGS = (("c1", 64), ("a1", 32), ("a2", 64), ("d1", 128), ("d2", 128),
              ("r1", 128), ("r2", 128), ("g", 256), ("f1", 128), ("f2", 64), ("f3", 1))


def _mk_bias_offsets():
    offs, off = {}, 0
    for name, n in _BIAS_SEGS:
        offs[name] = off
        off += -(-n // 128) * 128            # 128-lane aligned segments
    return offs, off


_BOFF, _BTOT = _mk_bias_offsets()            # total = 1536 lanes


def _full_spec(shape):
    """BlockSpec covering the whole array as one block (grid=(1,))."""
    n = len(shape)
    return pl.BlockSpec(shape, lambda *_: (0,) * n)


# ----------------------------------------------------------------------------
# Single fused kernel: all 7 convs + attention + residual + pooled head.
# ----------------------------------------------------------------------------
def _fused_forward_kernel(x_ref,
                          wc1, wa1, wa2, wd1, wd2, wr1, wr2,
                          wg, wf1, wf2, wf3,
                          b_ref, o_ref, pad_ref):
    B, L, _ = x_ref.shape
    f32, bf16 = jnp.float32, jnp.bfloat16
    silu = lambda v: v * jax.nn.sigmoid(v)
    bias = lambda name, n: b_ref[:, _BOFF[name]:_BOFF[name] + n]   # (1, n) f32, aligned slice

    # Shared zero-padded activation scratch.  The halo is zeroed once here and
    # never written again; the interior is fully overwritten by each conv
    # before that conv reads it.
    pad_ref[...] = jnp.zeros_like(pad_ref)

    def conv(x, w_ref, name, pad, dil):
        """Conv1d (+ folded BN bias) as K per-tap MXU matmuls.  x: (B, L, Cin) f32."""
        K, Cr, Cout = w_ref.shape            # Cr = read width (>= x's Cin only for conv1)
        Cs = x.shape[-1]                     # store width
        pad_ref[:, _WOFF:_WOFF + L, :Cs] = x          # sublane-aligned interior write
        acc = None
        for k in range(K):
            s = _WOFF - pad + k * dil
            tap = pad_ref[:, s:s + L, :Cr].astype(bf16).reshape(B * L, Cr)
            t = jnp.dot(tap, w_ref[k], preferred_element_type=f32)
            acc = t if acc is None else acc + t
        return (acc + bias(name, Cout)).reshape(B, L, Cout)

    x = x_ref[...]                                               # (B, L, 1) f32

    out1 = silu(conv(x, wc1, "c1", pad=2, dil=1))                # conv1 (+BN+SiLU)
    a1   = silu(conv(out1, wa1, "a1", pad=3, dil=1))             # spatial attention
    attn = jax.nn.sigmoid(conv(a1, wa2, "a2", pad=3, dil=1))
    out2 = out1 * attn
    d1   = silu(conv(out2, wd1, "d1", pad=2, dil=2))             # dilation block
    d2   = silu(conv(d1, wd2, "d2", pad=4, dil=4))
    # TODO(synk): Dropout(0.1/0.2) layers are identity in eval-mode forward.
    r1   = silu(conv(d2, wr1, "r1", pad=1, dil=1))               # residual block
    out3 = silu(conv(r1, wr2, "r2", pad=1, dil=1) + d2)

    # Head: AdaptiveAvgPool1d(1) + Flatten + Linear/SiLU + 2x(Linear+BN+SiLU) + Linear.
    pooled = jnp.mean(out3, axis=1)                              # (B, 128) f32
    g  = silu(jnp.dot(pooled.astype(bf16), wg[...], preferred_element_type=f32)
              + bias("g", 256))
    h1 = silu(jnp.dot(g.astype(bf16), wf1[...], preferred_element_type=f32)
              + bias("f1", 128))
    h2 = silu(jnp.dot(h1.astype(bf16), wf2[...], preferred_element_type=f32)
              + bias("f2", 64))
    # fc3 weight zero-padded to 128 output lanes -> lane-dense store; cols 1..127 are 0.
    o_ref[...] = (jnp.dot(h2.astype(bf16), wf3[...], preferred_element_type=f32)
                  + bias("f3", 128))


# ----------------------------------------------------------------------------
# Wrapper
# ----------------------------------------------------------------------------
def ert_forward(kargs, x_ncl):
    ka = kargs
    B, _, L = x_ncl.shape
    x = x_ncl.reshape(B, L, 1)                    # free, layout-preserving reshape
    SL = -(-(_WOFF + L + _MAXPAD) // 8) * 8       # scratch length (sublane-rounded)

    args = [x,
            ka['w_c1'], ka['w_a1'], ka['w_a2'], ka['w_d1'], ka['w_d2'],
            ka['w_r1'], ka['w_r2'],
            ka['w_g'], ka['w_f1'], ka['w_f2'], ka['w_f3'],
            ka['b_all']]

    flops = 2 * B * (128 * 256 + 256 * 128 + 128 * 64 + 64 * 128)
    for _n, K, Cin, Cout, _p, _d in _CONV_CFG:
        flops += 2 * B * L * K * Cin * Cout
    transcendentals = (B * L * (64 + 32 + 64 + 128 + 128 + 128 + 128)
                       + B * (256 + 128 + 64))
    bytes_accessed = sum(a.size * a.dtype.itemsize for a in args) + B * 128 * 4

    out = pl.pallas_call(
        _fused_forward_kernel,
        out_shape=jax.ShapeDtypeStruct((B, 128), jnp.float32),
        grid=(1,),
        in_specs=[_full_spec(a.shape) for a in args],
        out_specs=_full_spec((B, 128)),
        scratch_shapes=[pltpu.VMEM((B, SL, _CMAX), jnp.float32)],
        compiler_params=pltpu.CompilerParams(
            dimension_semantics=("arbitrary",),
            vmem_limit_bytes=32 * 1024 * 1024),
        cost_estimate=pl.CostEstimate(flops=flops,
                                      transcendentals=transcendentals,
                                      bytes_accessed=bytes_accessed),
    )(*args)
    return out[:, :1]


# ----------------------------------------------------------------------------
# Parameters (deterministic PyTorch-style uniform init; full eval-mode BN fold)
# ----------------------------------------------------------------------------
def fold_bn(w, b, gamma=None, beta=None, mean=None, var=None, eps=BN_EPS):
    """Full eval-mode BatchNorm fold: y = gamma*(z - mean)/sqrt(var+eps) + beta.
    Defaults (gamma=1, beta=0, mean=0, var=1) are PyTorch's fresh running stats."""
    C = w.shape[-1]
    gamma = jnp.ones((C,), jnp.float32) if gamma is None else gamma
    beta = jnp.zeros((C,), jnp.float32) if beta is None else beta
    mean = jnp.zeros((C,), jnp.float32) if mean is None else mean
    var = jnp.ones((C,), jnp.float32) if var is None else var
    scale = gamma / jnp.sqrt(var + eps)
    return w * scale, (b - mean) * scale + beta


def init_params(key):
    ks = jax.random.split(key, 22)

    def u(k, shape, bound):
        return jax.random.uniform(k, shape, jnp.float32, -bound, bound)

    def conv_p(k1, k2, K, Cin, Cout):
        bound = 1.0 / np.sqrt(Cin * K)
        return fold_bn(u(k1, (K, Cin, Cout), bound), u(k2, (Cout,), bound))

    def lin_p(k1, k2, fin, fout, bn=False):
        bound = 1.0 / np.sqrt(fin)
        w, b = u(k1, (fin, fout), bound), u(k2, (fout,), bound)
        return fold_bn(w, b) if bn else (w, b)

    p, idx = {}, 0
    for name, K, Cin, Cout, _p, _d in _CONV_CFG:
        p['w_' + name], p['b_' + name] = conv_p(ks[idx], ks[idx + 1], K, Cin, Cout)
        idx += 2
    p['w_g'], p['b_g'] = lin_p(ks[14], ks[15], 128, 256)            # no BN
    p['w_f1'], p['b_f1'] = lin_p(ks[16], ks[17], 256, 128, bn=True)  # fc1 + bn1
    p['w_f2'], p['b_f2'] = lin_p(ks[18], ks[19], 128, 64, bn=True)   # fc2 + bn2
    p['w_f3'], p['b_f3'] = lin_p(ks[20], ks[21], 64, 1)              # fc3
    return p


def pack_kernel_args(params):
    """One-time packing: bf16 weights + one lane-dense packed bias operand."""
    p = params
    bf16 = jnp.bfloat16
    ka = {}
    # conv1 Cin zero-padded 1 -> 8 so the in-kernel tap matmul has a
    # non-degenerate contraction; the matching scratch lanes are zero.
    ka['w_c1'] = jnp.pad(p['w_c1'], ((0, 0), (0, 7), (0, 0))).astype(bf16)
    for name in ('a1', 'a2', 'd1', 'd2', 'r1', 'r2'):
        ka['w_' + name] = p['w_' + name].astype(bf16)
    ka['w_g'] = p['w_g'].astype(bf16)
    ka['w_f1'] = p['w_f1'].astype(bf16)
    ka['w_f2'] = p['w_f2'].astype(bf16)
    ka['w_f3'] = jnp.pad(p['w_f3'], ((0, 0), (0, 127))).astype(bf16)  # lane-dense slab
    # Pack the 11 bias vectors into one (1, _BTOT) f32 operand.
    b_all = jnp.zeros((1, _BTOT), jnp.float32)
    for name, n in _BIAS_SEGS:
        b_all = b_all.at[0, _BOFF[name]:_BOFF[name] + n].set(p['b_' + name])
    ka['b_all'] = b_all
    return ka


# ----------------------------------------------------------------------------
# Independent lax.conv / XLA reference with the same bf16 operand quantization
# (f32 everywhere else), so the kernel is checked against a non-Pallas path.
# ----------------------------------------------------------------------------
def _ref_conv(x, w, b, pad, dil):
    y = lax.conv_general_dilated(
        x.astype(jnp.bfloat16), w.astype(jnp.bfloat16), (1,), [(pad, pad)],
        rhs_dilation=(dil,), dimension_numbers=('NWC', 'WIO', 'NWC'),
        preferred_element_type=jnp.float32)
    return y + b


def _ref_linear(x, w, b):
    return jnp.dot(x.astype(jnp.bfloat16), w.astype(jnp.bfloat16),
                   preferred_element_type=jnp.float32) + b


def ref_forward(params, x_ncl):
    p = params
    B, _, L = x_ncl.shape
    x = x_ncl.reshape(B, L, 1)
    out1 = jax.nn.silu(_ref_conv(x, p['w_c1'], p['b_c1'], 2, 1))
    a1 = jax.nn.silu(_ref_conv(out1, p['w_a1'], p['b_a1'], 3, 1))
    out2 = out1 * jax.nn.sigmoid(_ref_conv(a1, p['w_a2'], p['b_a2'], 3, 1))
    d1 = jax.nn.silu(_ref_conv(out2, p['w_d1'], p['b_d1'], 2, 2))
    d2 = jax.nn.silu(_ref_conv(d1, p['w_d2'], p['b_d2'], 4, 4))
    r1 = jax.nn.silu(_ref_conv(d2, p['w_r1'], p['b_r1'], 1, 1))
    out3 = jax.nn.silu(_ref_conv(r1, p['w_r2'], p['b_r2'], 1, 1) + d2)
    pooled = jnp.mean(out3, axis=1)
    g = jax.nn.silu(_ref_linear(pooled, p['w_g'], p['b_g']))
    h1 = jax.nn.silu(_ref_linear(g, p['w_f1'], p['b_f1']))
    h2 = jax.nn.silu(_ref_linear(h1, p['w_f2'], p['b_f2']))
    return _ref_linear(h2, p['w_f3'], p['b_f3'])


if __name__ == "__main__":
    B, input_dim = 4, 16
    key = jax.random.PRNGKey(0)
    kx, kp = jax.random.split(key)
    x = jax.random.normal(kx, (B, 1, input_dim), jnp.float32)   # PyTorch NCL input

    params = init_params(kp)            # f32 master params (BN folded, eval mode)
    kargs = pack_kernel_args(params)    # bf16 weights + packed bias, built once

    out = jax.jit(ert_forward)(kargs, x)
    out = jax.block_until_ready(out)

    ref = ref_forward(params, x)
    assert out.shape == (B, 1)
    # Tolerance covers f32 summation-order differences plus occasional bf16
    # rounding-boundary flips on re-quantized activations.
    np.testing.assert_allclose(np.asarray(out), np.asarray(ref), rtol=5e-3, atol=5e-3)
    print("KERNEL_OK")
</pallas_src>

<mosaic_0001>
module attributes {stable_mosaic.version = 11 : i64} {
  func.func @_fused_forward_kernel(%arg0: i32, %arg1: memref<4x16x1xf32, #tpu.memory_space<vmem>>, %arg2: memref<5x8x64xbf16, #tpu.memory_space<vmem>>, %arg3: memref<7x64x32xbf16, #tpu.memory_space<vmem>>, %arg4: memref<7x32x64xbf16, #tpu.memory_space<vmem>>, %arg5: memref<3x64x128xbf16, #tpu.memory_space<vmem>>, %arg6: memref<3x128x128xbf16, #tpu.memory_space<vmem>>, %arg7: memref<3x128x128xbf16, #tpu.memory_space<vmem>>, %arg8: memref<3x128x128xbf16, #tpu.memory_space<vmem>>, %arg9: memref<128x256xbf16, #tpu.memory_space<vmem>>, %arg10: memref<256x128xbf16, #tpu.memory_space<vmem>>, %arg11: memref<128x64xbf16, #tpu.memory_space<vmem>>, %arg12: memref<64x128xbf16, #tpu.memory_space<vmem>>, %arg13: memref<1x1536xf32, #tpu.memory_space<vmem>>, %arg14: memref<4x128xf32, #tpu.memory_space<vmem>>, %arg15: memref<4x32x128xf32, #tpu.memory_space<vmem>>) attributes {dimension_semantics = [#tpu.dimension_semantics<arbitrary>], iteration_bounds = array<i64: 1>, scalar_prefetch = 0 : i64, scratch_operands = 1 : i64, tpu.core_type = #tpu.core_type<tc>, window_params = [{pipeline_mode = #tpu.pipeline_mode<synchronous>, transform_indices = @transform_0, window_bounds = array<i64: 4, 16, 1>}, {pipeline_mode = #tpu.pipeline_mode<synchronous>, transform_indices = @transform_1, window_bounds = array<i64: 5, 8, 64>}, {pipeline_mode = #tpu.pipeline_mode<synchronous>, transform_indices = @transform_2, window_bounds = array<i64: 7, 64, 32>}, {pipeline_mode = #tpu.pipeline_mode<synchronous>, transform_indices = @transform_3, window_bounds = array<i64: 7, 32, 64>}, {pipeline_mode = #tpu.pipeline_mode<synchronous>, transform_indices = @transform_4, window_bounds = array<i64: 3, 64, 128>}, {pipeline_mode = #tpu.pipeline_mode<synchronous>, transform_indices = @transform_5, window_bounds = array<i64: 3, 128, 128>}, {pipeline_mode = #tpu.pipeline_mode<synchronous>, transform_indices = @transform_6, window_bounds = array<i64: 3, 128, 128>}, {pipeline_mode = #tpu.pipeline_mode<synchronous>, transform_indices = @transform_7, window_bounds = array<i64: 3, 128, 128>}, {pipeline_mode = #tpu.pipeline_mode<synchronous>, transform_indices = @transform_8, window_bounds = array<i64: 128, 256>}, {pipeline_mode = #tpu.pipeline_mode<synchronous>, transform_indices = @transform_9, window_bounds = array<i64: 256, 128>}, {pipeline_mode = #tpu.pipeline_mode<synchronous>, transform_indices = @transform_10, window_bounds = array<i64: 128, 64>}, {pipeline_mode = #tpu.pipeline_mode<synchronous>, transform_indices = @transform_11, window_bounds = array<i64: 64, 128>}, {pipeline_mode = #tpu.pipeline_mode<synchronous>, transform_indices = @transform_12, window_bounds = array<i64: 1, 1536>}, {pipeline_mode = #tpu.pipeline_mode<synchronous>, transform_indices = @transform_13, window_bounds = array<i64: 4, 128>}]} {
    %cst = arith.constant 0.000000e+00 : f32
    %0 = vector.broadcast %cst : f32 to vector<4x32x128xf32>
    %c0 = arith.constant 0 : index
    %c0_0 = arith.constant 0 : index
    %c0_1 = arith.constant 0 : index
    %1 = vector.load %arg15[%c0, %c0_0, %c0_1] : memref<4x32x128xf32, #tpu.memory_space<vmem>>, vector<4x32x128xf32>
    tpu.vector_store %arg15[%c0, %c0_0, %c0_1], %0 {strides = array<i32>} : memref<4x32x128xf32, #tpu.memory_space<vmem>>, vector<4x32x128xf32>,
    %c0_2 = arith.constant 0 : index
    %c0_3 = arith.constant 0 : index
    %c0_4 = arith.constant 0 : index
    %2 = vector.load %arg1[%c0_2, %c0_3, %c0_4] : memref<4x16x1xf32, #tpu.memory_space<vmem>>, vector<4x16x1xf32>
    %c0_5 = arith.constant 0 : index
    %c8 = arith.constant 8 : index
    %c0_6 = arith.constant 0 : index
    %3 = vector.load %arg15[%c0_5, %c8, %c0_6] : memref<4x32x128xf32, #tpu.memory_space<vmem>>, vector<4x16x1xf32>
    tpu.vector_store %arg15[%c0_5, %c8, %c0_6], %2 {strides = array<i32>} : memref<4x32x128xf32, #tpu.memory_space<vmem>>, vector<4x16x1xf32>,
    %c0_7 = arith.constant 0 : index
    %c6 = arith.constant 6 : index
    %c0_8 = arith.constant 0 : index
    %4 = vector.load %arg15[%c0_7, %c6, %c0_8] : memref<4x32x128xf32, #tpu.memory_space<vmem>>, vector<4x16x8xf32>
    %5 = arith.truncf %4 : vector<4x16x8xf32> to vector<4x16x8xbf16>
    %6 = vector.shape_cast %5 : vector<4x16x8xbf16> to vector<64x8xbf16>
    %c0_9 = arith.constant 0 : index
    %c0_10 = arith.constant 0 : index
    %c0_11 = arith.constant 0 : index
    %7 = vector.load %arg2[%c0_9, %c0_10, %c0_11] : memref<5x8x64xbf16, #tpu.memory_space<vmem>>, vector<1x8x64xbf16>
    %8 = vector.shape_cast %7 : vector<1x8x64xbf16> to vector<8x64xbf16>
    %cst_12 = arith.constant dense<0.000000e+00> : vector<64x64xf32>
    %9 = tpu.matmul %6, %8, %cst_12 {dimension_numbers = #tpu.dot_dimension_numbers<[1], [0], [0], [1], [0, 0, 1, 1], [], []>} : vector<64x8xbf16>, vector<8x64xbf16>, vector<64x64xf32> -> vector<64x64xf32>
    %c0_13 = arith.constant 0 : index
    %c7 = arith.constant 7 : index
    %c0_14 = arith.constant 0 : index
    %10 = vector.load %arg15[%c0_13, %c7, %c0_14] : memref<4x32x128xf32, #tpu.memory_space<vmem>>, vector<4x16x8xf32>
    %11 = arith.truncf %10 : vector<4x16x8xf32> to vector<4x16x8xbf16>
    %12 = vector.shape_cast %11 : vector<4x16x8xbf16> to vector<64x8xbf16>
    %c1 = arith.constant 1 : index
    %c0_15 = arith.constant 0 : index
    %c0_16 = arith.constant 0 : index
    %13 = vector.load %arg2[%c1, %c0_15, %c0_16] : memref<5x8x64xbf16, #tpu.memory_space<vmem>>, vector<1x8x64xbf16>
    %14 = vector.shape_cast %13 : vector<1x8x64xbf16> to vector<8x64xbf16>
    %cst_17 = arith.constant dense<0.000000e+00> : vector<64x64xf32>
    %15 = tpu.matmul %12, %14, %cst_17 {dimension_numbers = #tpu.dot_dimension_numbers<[1], [0], [0], [1], [0, 0, 1, 1], [], []>} : vector<64x8xbf16>, vector<8x64xbf16>, vector<64x64xf32> -> vector<64x64xf32>
    %16 = arith.addf %9, %15 : vector<64x64xf32>
    %c0_18 = arith.constant 0 : index
    %c8_19 = arith.constant 8 : index
    %c0_20 = arith.constant 0 : index
    %17 = vector.load %arg15[%c0_18, %c8_19, %c0_20] : memref<4x32x128xf32, #tpu.memory_space<vmem>>, vector<4x16x8xf32>
    %18 = arith.truncf %17 : vector<4x16x8xf32> to vector<4x16x8xbf16>
    %19 = vector.shape_cast %18 : vector<4x16x8xbf16> to vector<64x8xbf16>
    %c2 = arith.constant 2 : index
    %c0_21 = arith.constant 0 : index
    %c0_22 = arith.constant 0 : index
    %20 = vector.load %arg2[%c2, %c0_21, %c0_22] : memref<5x8x64xbf16, #tpu.memory_space<vmem>>, vector<1x8x64xbf16>
    %21 = vector.shape_cast %20 : vector<1x8x64xbf16> to vector<8x64xbf16>
    %cst_23 = arith.constant dense<0.000000e+00> : vector<64x64xf32>
    %22 = tpu.matmul %19, %21, %cst_23 {dimension_numbers = #tpu.dot_dimension_numbers<[1], [0], [0], [1], [0, 0, 1, 1], [], []>} : vector<64x8xbf16>, vector<8x64xbf16>, vector<64x64xf32> -> vector<64x64xf32>
    %23 = arith.addf %16, %22 : vector<64x64xf32>
    %c0_24 = arith.constant 0 : index
    %c9 = arith.constant 9 : index
    %c0_25 = arith.constant 0 : index
    %24 = vector.load %arg15[%c0_24, %c9, %c0_25] : memref<4x32x128xf32, #tpu.memory_space<vmem>>, vector<4x16x8xf32>
    %25 = arith.truncf %24 : vector<4x16x8xf32> to vector<4x16x8xbf16>
    %26 = vector.shape_cast %25 : vector<4x16x8xbf16> to vector<64x8xbf16>
    %c3 = arith.constant 3 : index
    %c0_26 = arith.constant 0 : index
    %c0_27 = arith.constant 0 : index
    %27 = vector.load %arg2[%c3, %c0_26, %c0_27] : memref<5x8x64xbf16, #tpu.memory_space<vmem>>, vector<1x8x64xbf16>
    %28 = vector.shape_cast %27 : vector<1x8x64xbf16> to vector<8x64xbf16>
    %cst_28 = arith.constant dense<0.000000e+00> : vector<64x64xf32>
    %29 = tpu.matmul %26, %28, %cst_28 {dimension_numbers = #tpu.dot_dimension_numbers<[1], [0], [0], [1], [0, 0, 1, 1], [], []>} : vector<64x8xbf16>, vector<8x64xbf16>, vector<64x64xf32> -> vector<64x64xf32>
    %30 = arith.addf %23, %29 : vector<64x64xf32>
    %c0_29 = arith.constant 0 : index
    %c10 = arith.constant 10 : index
    %c0_30 = arith.constant 0 : index
    %31 = vector.load %arg15[%c0_29, %c10, %c0_30] : memref<4x32x128xf32, #tpu.memory_space<vmem>>, vector<4x16x8xf32>
    %32 = arith.truncf %31 : vector<4x16x8xf32> to vector<4x16x8xbf16>
    %33 = vector.shape_cast %32 : vector<4x16x8xbf16> to vector<64x8xbf16>
    %c4 = arith.constant 4 : index
    %c0_31 = arith.constant 0 : index
    %c0_32 = arith.constant 0 : index
    %34 = vector.load %arg2[%c4, %c0_31, %c0_32] : memref<5x8x64xbf16, #tpu.memory_space<vmem>>, vector<1x8x64xbf16>
    %35 = vector.shape_cast %34 : vector<1x8x64xbf16> to vector<8x64xbf16>
    %cst_33 = arith.constant dense<0.000000e+00> : vector<64x64xf32>
    %36 = tpu.matmul %33, %35, %cst_33 {dimension_numbers = #tpu.dot_dimension_numbers<[1], [0], [0], [1], [0, 0, 1, 1], [], []>} : vector<64x8xbf16>, vector<8x64xbf16>, vector<64x64xf32> -> vector<64x64xf32>
    %37 = arith.addf %30, %36 : vector<64x64xf32>
    %c0_34 = arith.constant 0 : index
    %c0_35 = arith.constant 0 : index
    %38 = vector.load %arg13[%c0_34, %c0_35] : memref<1x1536xf32, #tpu.memory_space<vmem>>, vector<1x64xf32>
    %39 = vector.broadcast %38 : vector<1x64xf32> to vector<64x64xf32>
    %40 = arith.addf %37, %39 : vector<64x64xf32>
    %41 = vector.shape_cast %40 : vector<64x64xf32> to vector<4x16x64xf32>
    %42 = arith.negf %41 : vector<4x16x64xf32>
    %43 = math.exp %42 : vector<4x16x64xf32>
    %cst_36 = arith.constant 1.000000e+00 : f32
    %44 = vector.broadcast %cst_36 : f32 to vector<4x16x64xf32>
    %45 = arith.addf %44, %43 : vector<4x16x64xf32>
    %46 = arith.divf %44, %45 : vector<4x16x64xf32>
    %47 = arith.mulf %41, %46 : vector<4x16x64xf32>
    %c0_37 = arith.constant 0 : index
    %c8_38 = arith.constant 8 : index
    %c0_39 = arith.constant 0 : index
    %48 = vector.load %arg15[%c0_37, %c8_38, %c0_39] : memref<4x32x128xf32, #tpu.memory_space<vmem>>, vector<4x16x64xf32>
    tpu.vector_store %arg15[%c0_37, %c8_38, %c0_39], %47 {strides = array<i32>} : memref<4x32x128xf32, #tpu.memory_space<vmem>>, vector<4x16x64xf32>,
    %c0_40 = arith.constant 0 : index
    %c5 = arith.constant 5 : index
    %c0_41 = arith.constant 0 : index
    %49 = vector.load %arg15[%c0_40, %c5, %c0_41] : memref<4x32x128xf32, #tpu.memory_space<vmem>>, vector<4x16x64xf32>
    %50 = arith.truncf %49 : vector<4x16x64xf32> to vector<4x16x64xbf16>
    %51 = vector.shape_cast %50 : vector<4x16x64xbf16> to vector<64x64xbf16>
    %c0_42 = arith.constant 0 : index
    %c0_43 = arith.constant 0 : index
    %c0_44 = arith.constant 0 : index
    %52 = vector.load %arg3[%c0_42, %c0_43, %c0_44] : memref<7x64x32xbf16, #tpu.memory_space<vmem>>, vector<1x64x32xbf16>
    %53 = vector.shape_cast %52 : vector<1x64x32xbf16> to vector<64x32xbf16>
    %cst_45 = arith.constant dense<0.000000e+00> : vector<64x32xf32>
    %54 = tpu.matmul %51, %53, %cst_45 {dimension_numbers = #tpu.dot_dimension_numbers<[1], [0], [0], [1], [0, 0, 1, 1], [], []>} : vector<64x64xbf16>, vector<64x32xbf16>, vector<64x32xf32> -> vector<64x32xf32>
    %c0_46 = arith.constant 0 : index
    %c6_47 = arith.constant 6 : index
    %c0_48 = arith.constant 0 : index
    %55 = vector.load %arg15[%c0_46, %c6_47, %c0_48] : memref<4x32x128xf32, #tpu.memory_space<vmem>>, vector<4x16x64xf32>
    %56 = arith.truncf %55 : vector<4x16x64xf32> to vector<4x16x64xbf16>
    %57 = vector.shape_cast %56 : vector<4x16x64xbf16> to vector<64x64xbf16>
    %c1_49 = arith.constant 1 : index
    %c0_50 = arith.constant 0 : index
    %c0_51 = arith.constant 0 : index
    %58 = vector.load %arg3[%c1_49, %c0_50, %c0_51] : memref<7x64x32xbf16, #tpu.memory_space<vmem>>, vector<1x64x32xbf16>
    %59 = vector.shape_cast %58 : vector<1x64x32xbf16> to vector<64x32xbf16>
    %cst_52 = arith.constant dense<0.000000e+00> : vector<64x32xf32>
    %60 = tpu.matmul %57, %59, %cst_52 {dimension_numbers = #tpu.dot_dimension_numbers<[1], [0], [0], [1], [0, 0, 1, 1], [], []>} : vector<64x64xbf16>, vector<64x32xbf16>, vector<64x32xf32> -> vector<64x32xf32>
    %61 = arith.addf %54, %60 : vector<64x32xf32>
    %c0_53 = arith.constant 0 : index
    %c7_54 = arith.constant 7 : index
    %c0_55 = arith.constant 0 : index
    %62 = vector.load %arg15[%c0_53, %c7_54, %c0_55] : memref<4x32x128xf32, #tpu.memory_space<vmem>>, vector<4x16x64xf32>
    %63 = arith.truncf %62 : vector<4x16x64xf32> to vector<4x16x64xbf16>
    %64 = vector.shape_cast %63 : vector<4x16x64xbf16> to vector<64x64xbf16>
    %c2_56 = arith.constant 2 : index
    %c0_57 = arith.constant 0 : index
    %c0_58 = arith.constant 0 : index
    %65 = vector.load %arg3[%c2_56, %c0_57, %c0_58] : memref<7x64x32xbf16, #tpu.memory_space<vmem>>, vector<1x64x32xbf16>
    %66 = vector.shape_cast %65 : vector<1x64x32xbf16> to vector<64x32xbf16>
    %cst_59 = arith.constant dense<0.000000e+00> : vector<64x32xf32>
    %67 = tpu.matmul %64, %66, %cst_59 {dimension_numbers = #tpu.dot_dimension_numbers<[1], [0], [0], [1], [0, 0, 1, 1], [], []>} : vector<64x64xbf16>, vector<64x32xbf16>, vector<64x32xf32> -> vector<64x32xf32>
    %68 = arith.addf %61, %67 : vector<64x32xf32>
    %c0_60 = arith.constant 0 : index
    %c8_61 = arith.constant 8 : index
    %c0_62 = arith.constant 0 : index
    %69 = vector.load %arg15[%c0_60, %c8_61, %c0_62] : memref<4x32x128xf32, #tpu.memory_space<vmem>>, vector<4x16x64xf32>
    %70 = arith.truncf %69 : vector<4x16x64xf32> to vector<4x16x64xbf16>
    %71 = vector.shape_cast %70 : vector<4x16x64xbf16> to vector<64x64xbf16>
    %c3_63 = arith.constant 3 : index
    %c0_64 = arith.constant 0 : index
    %c0_65 = arith.constant 0 : index
    %72 = vector.load %arg3[%c3_63, %c0_64, %c0_65] : memref<7x64x32xbf16, #tpu.memory_space<vmem>>, vector<1x64x32xbf16>
    %73 = vector.shape_cast %72 : vector<1x64x32xbf16> to vector<64x32xbf16>
    %cst_66 = arith.constant dense<0.000000e+00> : vector<64x32xf32>
    %74 = tpu.matmul %71, %73, %cst_66 {dimension_numbers = #tpu.dot_dimension_numbers<[1], [0], [0], [1], [0, 0, 1, 1], [], []>} : vector<64x64xbf16>, vector<64x32xbf16>, vector<64x32xf32> -> vector<64x32xf32>
    %75 = arith.addf %68, %74 : vector<64x32xf32>
    %c0_67 = arith.constant 0 : index
    %c9_68 = arith.constant 9 : index
    %c0_69 = arith.constant 0 : index
    %76 = vector.load %arg15[%c0_67, %c9_68, %c0_69] : memref<4x32x128xf32, #tpu.memory_space<vmem>>, vector<4x16x64xf32>
    %77 = arith.truncf %76 : vector<4x16x64xf32> to vector<4x16x64xbf16>
    %78 = vector.shape_cast %77 : vector<4x16x64xbf16> to vector<64x64xbf16>
    %c4_70 = arith.constant 4 : index
    %c0_71 = arith.constant 0 : index
    %c0_72 = arith.constant 0 : index
    %79 = vector.load %arg3[%c4_70, %c0_71, %c0_72] : memref<7x64x32xbf16, #tpu.memory_space<vmem>>, vector<1x64x32xbf16>
    %80 = vector.shape_cast %79 : vector<1x64x32xbf16> to vector<64x32xbf16>
    %cst_73 = arith.constant dense<0.000000e+00> : vector<64x32xf32>
    %81 = tpu.matmul %78, %80, %cst_73 {dimension_numbers = #tpu.dot_dimension_numbers<[1], [0], [0], [1], [0, 0, 1, 1], [], []>} : vector<64x64xbf16>, vector<64x32xbf16>, vector<64x32xf32> -> vector<64x32xf32>
    %82 = arith.addf %75, %81 : vector<64x32xf32>
    %c0_74 = arith.constant 0 : index
    %c10_75 = arith.constant 10 : index
    %c0_76 = arith.constant 0 : index
    %83 = vector.load %arg15[%c0_74, %c10_75, %c0_76] : memref<4x32x128xf32, #tpu.memory_space<vmem>>, vector<4x16x64xf32>
    %84 = arith.truncf %83 : vector<4x16x64xf32> to vector<4x16x64xbf16>
    %85 = vector.shape_cast %84 : vector<4x16x64xbf16> to vector<64x64xbf16>
    %c5_77 = arith.constant 5 : index
    %c0_78 = arith.constant 0 : index
    %c0_79 = arith.constant 0 : index
    %86 = vector.load %arg3[%c5_77, %c0_78, %c0_79] : memref<7x64x32xbf16, #tpu.memory_space<vmem>>, vector<1x64x32xbf16>
    %87 = vector.shape_cast %86 : vector<1x64x32xbf16> to vector<64x32xbf16>
    %cst_80 = arith.constant dense<0.000000e+00> : vector<64x32xf32>
    %88 = tpu.matmul %85, %87, %cst_80 {dimension_numbers = #tpu.dot_dimension_numbers<[1], [0], [0], [1], [0, 0, 1, 1], [], []>} : vector<64x64xbf16>, vector<64x32xbf16>, vector<64x32xf32> -> vector<64x32xf32>
    %89 = arith.addf %82, %88 : vector<64x32xf32>
    %c0_81 = arith.constant 0 : index
    %c11 = arith.constant 11 : index
    %c0_82 = arith.constant 0 : index
    %90 = vector.load %arg15[%c0_81, %c11, %c0_82] : memref<4x32x128xf32, #tpu.memory_space<vmem>>, vector<4x16x64xf32>
    %91 = arith.truncf %90 : vector<4x16x64xf32> to vector<4x16x64xbf16>
    %92 = vector.shape_cast %91 : vector<4x16x64xbf16> to vector<64x64xbf16>
    %c6_83 = arith.constant 6 : index
    %c0_84 = arith.constant 0 : index
    %c0_85 = arith.constant 0 : index
    %93 = vector.load %arg3[%c6_83, %c0_84, %c0_85] : memref<7x64x32xbf16, #tpu.memory_space<vmem>>, vector<1x64x32xbf16>
    %94 = vector.shape_cast %93 : vector<1x64x32xbf16> to vector<64x32xbf16>
    %cst_86 = arith.constant dense<0.000000e+00> : vector<64x32xf32>
    %95 = tpu.matmul %92, %94, %cst_86 {dimension_numbers = #tpu.dot_dimension_numbers<[1], [0], [0], [1], [0, 0, 1, 1], [], []>} : vector<64x64xbf16>, vector<64x32xbf16>, vector<64x32xf32> -> vector<64x32xf32>
    %96 = arith.addf %89, %95 : vector<64x32xf32>
    %c0_87 = arith.constant 0 : index
    %c128 = arith.constant 128 : index
    %97 = vector.load %arg13[%c0_87, %c128] : memref<1x1536xf32, #tpu.memory_space<vmem>>, vector<1x32xf32>
    %98 = vector.broadcast %97 : vector<1x32xf32> to vector<64x32xf32>
    %99 = arith.addf %96, %98 : vector<64x32xf32>
    %100 = vector.shape_cast %99 : vector<64x32xf32> to vector<4x16x32xf32>
    %101 = arith.negf %100 : vector<4x16x32xf32>
    %102 = math.exp %101 : vector<4x16x32xf32>
    %cst_88 = arith.constant 1.000000e+00 : f32
    %103 = vector.broadcast %cst_88 : f32 to vector<4x16x32xf32>
    %104 = arith.addf %103, %102 : vector<4x16x32xf32>
    %105 = arith.divf %103, %104 : vector<4x16x32xf32>
    %106 = arith.mulf %100, %105 : vector<4x16x32xf32>
    %c0_89 = arith.constant 0 : index
    %c8_90 = arith.constant 8 : index
    %c0_91 = arith.constant 0 : index
    %107 = vector.load %arg15[%c0_89, %c8_90, %c0_91] : memref<4x32x128xf32, #tpu.memory_space<vmem>>, vector<4x16x32xf32>
    tpu.vector_store %arg15[%c0_89, %c8_90, %c0_91], %106 {strides = array<i32>} : memref<4x32x128xf32, #tpu.memory_space<vmem>>, vector<4x16x32xf32>,
    %c0_92 = arith.constant 0 : index
    %c5_93 = arith.constant 5 : index
    %c0_94 = arith.constant 0 : index
    %108 = vector.load %arg15[%c0_92, %c5_93, %c0_94] : memref<4x32x128xf32, #tpu.memory_space<vmem>>, vector<4x16x32xf32>
    %109 = arith.truncf %108 : vector<4x16x32xf32> to vector<4x16x32xbf16>
    %110 = vector.shape_cast %109 : vector<4x16x32xbf16> to vector<64x32xbf16>
    %c0_95 = arith.constant 0 : index
    %c0_96 = arith.constant 0 : index
    %c0_97 = arith.constant 0 : index
    %111 = vector.load %arg4[%c0_95, %c0_96, %c0_97] : memref<7x32x64xbf16, #tpu.memory_space<vmem>>, vector<1x32x64xbf16>
    %112 = vector.shape_cast %111 : vector<1x32x64xbf16> to vector<32x64xbf16>
    %cst_98 = arith.constant dense<0.000000e+00> : vector<64x64xf32>
    %113 = tpu.matmul %110, %112, %cst_98 {dimension_numbers = #tpu.dot_dimension_numbers<[1], [0], [0], [1], [0, 0, 1, 1], [], []>} : vector<64x32xbf16>, vector<32x64xbf16>, vector<64x64xf32> -> vector<64x64xf32>
    %c0_99 = arith.constant 0 : index
    %c6_100 = arith.constant 6 : index
    %c0_101 = arith.constant 0 : index
    %114 = vector.load %arg15[%c0_99, %c6_100, %c0_101] : memref<4x32x128xf32, #tpu.memory_space<vmem>>, vector<4x16x32xf32>
    %115 = arith.truncf %114 : vector<4x16x32xf32> to vector<4x16x32xbf16>
    %116 = vector.shape_cast %115 : vector<4x16x32xbf16> to vector<64x32xbf16>
    %c1_102 = arith.constant 1 : index
    %c0_103 = arith.constant 0 : index
    %c0_104 = arith.constant 0 : index
    %117 = vector.load %arg4[%c1_102, %c0_103, %c0_104] : memref<7x32x64xbf16, #tpu.memory_space<vmem>>, vector<1x32x64xbf16>
    %118 = vector.shape_cast %117 : vector<1x32x64xbf16> to vector<32x64xbf16>
    %cst_105 = arith.constant dense<0.000000e+00> : vector<64x64xf32>
    %119 = tpu.matmul %116, %118, %cst_105 {dimension_numbers = #tpu.dot_dimension_numbers<[1], [0], [0], [1], [0, 0, 1, 1], [], []>} : vector<64x32xbf16>, vector<32x64xbf16>, vector<64x64xf32> -> vector<64x64xf32>
    %120 = arith.addf %113, %119 : vector<64x64xf32>
    %c0_106 = arith.constant 0 : index
    %c7_107 = arith.constant 7 : index
    %c0_108 = arith.constant 0 : index
    %121 = vector.load %arg15[%c0_106, %c7_107, %c0_108] : memref<4x32x128xf32, #tpu.memory_space<vmem>>, vector<4x16x32xf32>
    %122 = arith.truncf %121 : vector<4x16x32xf32> to vector<4x16x32xbf16>
    %123 = vector.shape_cast %122 : vector<4x16x32xbf16> to vector<64x32xbf16>
    %c2_109 = arith.constant 2 : index
    %c0_110 = arith.constant 0 : index
    %c0_111 = arith.constant 0 : index
    %124 = vector.load %arg4[%c2_109, %c0_110, %c0_111] : memref<7x32x64xbf16, #tpu.memory_space<vmem>>, vector<1x32x64xbf16>
    %125 = vector.shape_cast %124 : vector<1x32x64xbf16> to vector<32x64xbf16>
    %cst_112 = arith.constant dense<0.000000e+00> : vector<64x64xf32>
    %126 = tpu.matmul %123, %125, %cst_112 {dimension_numbers = #tpu.dot_dimension_numbers<[1], [0], [0], [1], [0, 0, 1, 1], [], []>} : vector<64x32xbf16>, vector<32x64xbf16>, vector<64x64xf32> -> vector<64x64xf32>
    %127 = arith.addf %120, %126 : vector<64x64xf32>
    %c0_113 = arith.constant 0 : index
    %c8_114 = arith.constant 8 : index
    %c0_115 = arith.constant 0 : index
    %128 = vector.load %arg15[%c0_113, %c8_114, %c0_115] : memref<4x32x128xf32, #tpu.memory_space<vmem>>, vector<4x16x32xf32>
    %129 = arith.truncf %128 : vector<4x16x32xf32> to vector<4x16x32xbf16>
    %130 = vector.shape_cast %129 : vector<4x16x32xbf16> to vector<64x32xbf16>
    %c3_116 = arith.constant 3 : index
    %c0_117 = arith.constant 0 : index
    %c0_118 = arith.constant 0 : index
    %131 = vector.load %arg4[%c3_116, %c0_117, %c0_118] : memref<7x32x64xbf16, #tpu.memory_space<vmem>>, vector<1x32x64xbf16>
    %132 = vector.shape_cast %131 : vector<1x32x64xbf16> to vector<32x64xbf16>
    %cst_119 = arith.constant dense<0.000000e+00> : vector<64x64xf32>
    %133 = tpu.matmul %130, %132, %cst_119 {dimension_numbers = #tpu.dot_dimension_numbers<[1], [0], [0], [1], [0, 0, 1, 1], [], []>} : vector<64x32xbf16>, vector<32x64xbf16>, vector<64x64xf32> -> vector<64x64xf32>
    %134 = arith.addf %127, %133 : vector<64x64xf32>
    %c0_120 = arith.constant 0 : index
    %c9_121 = arith.constant 9 : index
    %c0_122 = arith.constant 0 : index
    %135 = vector.load %arg15[%c0_120, %c9_121, %c0_122] : memref<4x32x128xf32, #tpu.memory_space<vmem>>, vector<4x16x32xf32>
    %136 = arith.truncf %135 : vector<4x16x32xf32> to vector<4x16x32xbf16>
    %137 = vector.shape_cast %136 : vector<4x16x32xbf16> to vector<64x32xbf16>
    %c4_123 = arith.constant 4 : index
    %c0_124 = arith.constant 0 : index
    %c0_125 = arith.constant 0 : index
    %138 = vector.load %arg4[%c4_123, %c0_124, %c0_125] : memref<7x32x64xbf16, #tpu.memory_space<vmem>>, vector<1x32x64xbf16>
    %139 = vector.shape_cast %138 : vector<1x32x64xbf16> to vector<32x64xbf16>
    %cst_126 = arith.constant dense<0.000000e+00> : vector<64x64xf32>
    %140 = tpu.matmul %137, %139, %cst_126 {dimension_numbers = #tpu.dot_dimension_numbers<[1], [0], [0], [1], [0, 0, 1, 1], [], []>} : vector<64x32xbf16>, vector<32x64xbf16>, vector<64x64xf32> -> vector<64x64xf32>
    %141 = arith.addf %134, %140 : vector<64x64xf32>
    %c0_127 = arith.constant 0 : index
    %c10_128 = arith.constant 10 : index
    %c0_129 = arith.constant 0 : index
    %142 = vector.load %arg15[%c0_127, %c10_128, %c0_129] : memref<4x32x128xf32, #tpu.memory_space<vmem>>, vector<4x16x32xf32>
    %143 = arith.truncf %142 : vector<4x16x32xf32> to vector<4x16x32xbf16>
    %144 = vector.shape_cast %143 : vector<4x16x32xbf16> to vector<64x32xbf16>
    %c5_130 = arith.constant 5 : index
    %c0_131 = arith.constant 0 : index
    %c0_132 = arith.constant 0 : index
    %145 = vector.load %arg4[%c5_130, %c0_131, %c0_132] : memref<7x32x64xbf16, #tpu.memory_space<vmem>>, vector<1x32x64xbf16>
    %146 = vector.shape_cast %145 : vector<1x32x64xbf16> to vector<32x64xbf16>
    %cst_133 = arith.constant dense<0.000000e+00> : vector<64x64xf32>
    %147 = tpu.matmul %144, %146, %cst_133 {dimension_numbers = #tpu.dot_dimension_numbers<[1], [0], [0], [1], [0, 0, 1, 1], [], []>} : vector<64x32xbf16>, vector<32x64xbf16>, vector<64x64xf32> -> vector<64x64xf32>
    %148 = arith.addf %141, %147 : vector<64x64xf32>
    %c0_134 = arith.constant 0 : index
    %c11_135 = arith.constant 11 : index
    %c0_136 = arith.constant 0 : index
    %149 = vector.load %arg15[%c0_134, %c11_135, %c0_136] : memref<4x32x128xf32, #tpu.memory_space<vmem>>, vector<4x16x32xf32>
    %150 = arith.truncf %149 : vector<4x16x32xf32> to vector<4x16x32xbf16>
    %151 = vector.shape_cast %150 : vector<4x16x32xbf16> to vector<64x32xbf16>
    %c6_137 = arith.constant 6 : index
    %c0_138 = arith.constant 0 : index
    %c0_139 = arith.constant 0 : index
    %152 = vector.load %arg4[%c6_137, %c0_138, %c0_139] : memref<7x32x64xbf16, #tpu.memory_space<vmem>>, vector<1x32x64xbf16>
    %153 = vector.shape_cast %152 : vector<1x32x64xbf16> to vector<32x64xbf16>
    %cst_140 = arith.constant dense<0.000000e+00> : vector<64x64xf32>
    %154 = tpu.matmul %151, %153, %cst_140 {dimension_numbers = #tpu.dot_dimension_numbers<[1], [0], [0], [1], [0, 0, 1, 1], [], []>} : vector<64x32xbf16>, vector<32x64xbf16>, vector<64x64xf32> -> vector<64x64xf32>
    %155 = arith.addf %148, %154 : vector<64x64xf32>
    %c0_141 = arith.constant 0 : index
    %c256 = arith.constant 256 : index
    %156 = vector.load %arg13[%c0_141, %c256] : memref<1x1536xf32, #tpu.memory_space<vmem>>, vector<1x64xf32>
    %157 = vector.broadcast %156 : vector<1x64xf32> to vector<64x64xf32>
    %158 = arith.addf %155, %157 : vector<64x64xf32>
    %159 = vector.shape_cast %158 : vector<64x64xf32> to vector<4x16x64xf32>
    %160 = arith.negf %159 : vector<4x16x64xf32>
    %161 = math.exp %160 : vector<4x16x64xf32>
    %cst_142 = arith.constant 1.000000e+00 : f32
    %162 = vector.broadcast %cst_142 : f32 to vector<4x16x64xf32>
    %163 = arith.addf %162, %161 : vector<4x16x64xf32>
    %164 = arith.divf %162, %163 : vector<4x16x64xf32>
    %165 = arith.mulf %47, %164 : vector<4x16x64xf32>
    %c0_143 = arith.constant 0 : index
    %c8_144 = arith.constant 8 : index
    %c0_145 = arith.constant 0 : index
    %166 = vector.load %arg15[%c0_143, %c8_144, %c0_145] : memref<4x32x128xf32, #tpu.memory_space<vmem>>, vector<4x16x64xf32>
    tpu.vector_store %arg15[%c0_143, %c8_144, %c0_145], %165 {strides = array<i32>} : memref<4x32x128xf32, #tpu.memory_space<vmem>>, vector<4x16x64xf32>,
    %c0_146 = arith.constant 0 : index
    %c6_147 = arith.constant 6 : index
    %c0_148 = arith.constant 0 : index
    %167 = vector.load %arg15[%c0_146, %c6_147, %c0_148] : memref<4x32x128xf32, #tpu.memory_space<vmem>>, vector<4x16x64xf32>
    %168 = arith.truncf %167 : vector<4x16x64xf32> to vector<4x16x64xbf16>
    %169 = vector.shape_cast %168 : vector<4x16x64xbf16> to vector<64x64xbf16>
    %c0_149 = arith.constant 0 : index
    %c0_150 = arith.constant 0 : index
    %c0_151 = arith.constant 0 : index
    %170 = vector.load %arg5[%c0_149, %c0_150, %c0_151] : memref<3x64x128xbf16, #tpu.memory_space<vmem>>, vector<1x64x128xbf16>
    %171 = vector.shape_cast %170 : vector<1x64x128xbf16> to vector<64x128xbf16>
    %cst_152 = arith.constant dense<0.000000e+00> : vector<64x128xf32>
    %172 = tpu.matmul %169, %171, %cst_152 {dimension_numbers = #tpu.dot_dimension_numbers<[1], [0], [0], [1], [0, 0, 1, 1], [], []>} : vector<64x64xbf16>, vector<64x128xbf16>, vector<64x128xf32> -> vector<64x128xf32>
    %c0_153 = arith.constant 0 : index
    %c8_154 = arith.constant 8 : index
    %c0_155 = arith.constant 0 : index
    %173 = vector.load %arg15[%c0_153, %c8_154, %c0_155] : memref<4x32x128xf32, #tpu.memory_space<vmem>>, vector<4x16x64xf32>
    %174 = arith.truncf %173 : vector<4x16x64xf32> to vector<4x16x64xbf16>
    %175 = vector.shape_cast %174 : vector<4x16x64xbf16> to vector<64x64xbf16>
    %c1_156 = arith.constant 1 : index
    %c0_157 = arith.constant 0 : index
    %c0_158 = arith.constant 0 : index
    %176 = vector.load %arg5[%c1_156, %c0_157, %c0_158] : memref<3x64x128xbf16, #tpu.memory_space<vmem>>, vector<1x64x128xbf16>
    %177 = vector.shape_cast %176 : vector<1x64x128xbf16> to vector<64x128xbf16>
    %cst_159 = arith.constant dense<0.000000e+00> : vector<64x128xf32>
    %178 = tpu.matmul %175, %177, %cst_159 {dimension_numbers = #tpu.dot_dimension_numbers<[1], [0], [0], [1], [0, 0, 1, 1], [], []>} : vector<64x64xbf16>, vector<64x128xbf16>, vector<64x128xf32> -> vector<64x128xf32>
    %179 = arith.addf %172, %178 : vector<64x128xf32>
    %c0_160 = arith.constant 0 : index
    %c10_161 = arith.constant 10 : index
    %c0_162 = arith.constant 0 : index
    %180 = vector.load %arg15[%c0_160, %c10_161, %c0_162] : memref<4x32x128xf32, #tpu.memory_space<vmem>>, vector<4x16x64xf32>
    %181 = arith.truncf %180 : vector<4x16x64xf32> to vector<4x16x64xbf16>
    %182 = vector.shape_cast %181 : vector<4x16x64xbf16> to vector<64x64xbf16>
    %c2_163 = arith.constant 2 : index
    %c0_164 = arith.constant 0 : index
    %c0_165 = arith.constant 0 : index
    %183 = vector.load %arg5[%c2_163, %c0_164, %c0_165] : memref<3x64x128xbf16, #tpu.memory_space<vmem>>, vector<1x64x128xbf16>
    %184 = vector.shape_cast %183 : vector<1x64x128xbf16> to vector<64x128xbf16>
    %cst_166 = arith.constant dense<0.000000e+00> : vector<64x128xf32>
    %185 = tpu.matmul %182, %184, %cst_166 {dimension_numbers = #tpu.dot_dimension_numbers<[1], [0], [0], [1], [0, 0, 1, 1], [], []>} : vector<64x64xbf16>, vector<64x128xbf16>, vector<64x128xf32> -> vector<64x128xf32>
    %186 = arith.addf %179, %185 : vector<64x128xf32>
    %c0_167 = arith.constant 0 : index
    %c384 = arith.constant 384 : index
    %187 = vector.load %arg13[%c0_167, %c384] : memref<1x1536xf32, #tpu.memory_space<vmem>>, vector<1x128xf32>
    %188 = vector.broadcast %187 : vector<1x128xf32> to vector<64x128xf32>
    %189 = arith.addf %186, %188 : vector<64x128xf32>
    %190 = vector.shape_cast %189 : vector<64x128xf32> to vector<4x16x128xf32>
    %191 = arith.negf %190 : vector<4x16x128xf32>
    %192 = math.exp %191 : vector<4x16x128xf32>
    %cst_168 = arith.constant 1.000000e+00 : f32
    %193 = vector.broadcast %cst_168 : f32 to vector<4x16x128xf32>
    %194 = arith.addf %193, %192 : vector<4x16x128xf32>
    %195 = arith.divf %193, %194 : vector<4x16x128xf32>
    %196 = arith.mulf %190, %195 : vector<4x16x128xf32>
    %c0_169 = arith.constant 0 : index
    %c8_170 = arith.constant 8 : index
    %c0_171 = arith.constant 0 : index
    %197 = vector.load %arg15[%c0_169, %c8_170, %c0_171] : memref<4x32x128xf32, #tpu.memory_space<vmem>>, vector<4x16x128xf32>
    tpu.vector_store %arg15[%c0_169, %c8_170, %c0_171], %196 {strides = array<i32>} : memref<4x32x128xf32, #tpu.memory_space<vmem>>, vector<4x16x128xf32>,
    %c0_172 = arith.constant 0 : index
    %c4_173 = arith.constant 4 : index
    %c0_174 = arith.constant 0 : index
    %198 = vector.load %arg15[%c0_172, %c4_173, %c0_174] : memref<4x32x128xf32, #tpu.memory_space<vmem>>, vector<4x16x128xf32>
    %199 = arith.truncf %198 : vector<4x16x128xf32> to vector<4x16x128xbf16>
    %200 = vector.shape_cast %199 : vector<4x16x128xbf16> to vector<64x128xbf16>
    %c0_175 = arith.constant 0 : index
    %c0_176 = arith.constant 0 : index
    %c0_177 = arith.constant 0 : index
    %201 = vector.load %arg6[%c0_175, %c0_176, %c0_177] : memref<3x128x128xbf16, #tpu.memory_space<vmem>>, vector<1x128x128xbf16>
    %202 = vector.shape_cast %201 : vector<1x128x128xbf16> to vector<128x128xbf16>
    %cst_178 = arith.constant dense<0.000000e+00> : vector<64x128xf32>
    %203 = tpu.matmul %200, %202, %cst_178 {dimension_numbers = #tpu.dot_dimension_numbers<[1], [0], [0], [1], [0, 0, 1, 1], [], []>} : vector<64x128xbf16>, vector<128x128xbf16>, vector<64x128xf32> -> vector<64x128xf32>
    %c0_179 = arith.constant 0 : index
    %c8_180 = arith.constant 8 : index
    %c0_181 = arith.constant 0 : index
    %204 = vector.load %arg15[%c0_179, %c8_180, %c0_181] : memref<4x32x128xf32, #tpu.memory_space<vmem>>, vector<4x16x128xf32>
    %205 = arith.truncf %204 : vector<4x16x128xf32> to vector<4x16x128xbf16>
    %206 = vector.shape_cast %205 : vector<4x16x128xbf16> to vector<64x128xbf16>
    %c1_182 = arith.constant 1 : index
    %c0_183 = arith.constant 0 : index
    %c0_184 = arith.constant 0 : index
    %207 = vector.load %arg6[%c1_182, %c0_183, %c0_184] : memref<3x128x128xbf16, #tpu.memory_space<vmem>>, vector<1x128x128xbf16>
    %208 = vector.shape_cast %207 : vector<1x128x128xbf16> to vector<128x128xbf16>
    %cst_185 = arith.constant dense<0.000000e+00> : vector<64x128xf32>
    %209 = tpu.matmul %206, %208, %cst_185 {dimension_numbers = #tpu.dot_dimension_numbers<[1], [0], [0], [1], [0, 0, 1, 1], [], []>} : vector<64x128xbf16>, vector<128x128xbf16>, vector<64x128xf32> -> vector<64x128xf32>
    %210 = arith.addf %203, %209 : vector<64x128xf32>
    %c0_186 = arith.constant 0 : index
    %c12 = arith.constant 12 : index
    %c0_187 = arith.constant 0 : index
    %211 = vector.load %arg15[%c0_186, %c12, %c0_187] : memref<4x32x128xf32, #tpu.memory_space<vmem>>, vector<4x16x128xf32>
    %212 = arith.truncf %211 : vector<4x16x128xf32> to vector<4x16x128xbf16>
    %213 = vector.shape_cast %212 : vector<4x16x128xbf16> to vector<64x128xbf16>
    %c2_188 = arith.constant 2 : index
    %c0_189 = arith.constant 0 : index
    %c0_190 = arith.constant 0 : index
    %214 = vector.load %arg6[%c2_188, %c0_189, %c0_190] : memref<3x128x128xbf16, #tpu.memory_space<vmem>>, vector<1x128x128xbf16>
    %215 = vector.shape_cast %214 : vector<1x128x128xbf16> to vector<128x128xbf16>
    %cst_191 = arith.constant dense<0.000000e+00> : vector<64x128xf32>
    %216 = tpu.matmul %213, %215, %cst_191 {dimension_numbers = #tpu.dot_dimension_numbers<[1], [0], [0], [1], [0, 0, 1, 1], [], []>} : vector<64x128xbf16>, vector<128x128xbf16>, vector<64x128xf32> -> vector<64x128xf32>
    %217 = arith.addf %210, %216 : vector<64x128xf32>
    %c0_192 = arith.constant 0 : index
    %c512 = arith.constant 512 : index
    %218 = vector.load %arg13[%c0_192, %c512] : memref<1x1536xf32, #tpu.memory_space<vmem>>, vector<1x128xf32>
    %219 = vector.broadcast %218 : vector<1x128xf32> to vector<64x128xf32>
    %220 = arith.addf %217, %219 : vector<64x128xf32>
    %221 = vector.shape_cast %220 : vector<64x128xf32> to vector<4x16x128xf32>
    %222 = arith.negf %221 : vector<4x16x128xf32>
    %223 = math.exp %222 : vector<4x16x128xf32>
    %cst_193 = arith.constant 1.000000e+00 : f32
    %224 = vector.broadcast %cst_193 : f32 to vector<4x16x128xf32>
    %225 = arith.addf %224, %223 : vector<4x16x128xf32>
    %226 = arith.divf %224, %225 : vector<4x16x128xf32>
    %227 = arith.mulf %221, %226 : vector<4x16x128xf32>
    %c0_194 = arith.constant 0 : index
    %c8_195 = arith.constant 8 : index
    %c0_196 = arith.constant 0 : index
    %228 = vector.load %arg15[%c0_194, %c8_195, %c0_196] : memref<4x32x128xf32, #tpu.memory_space<vmem>>, vector<4x16x128xf32>
    tpu.vector_store %arg15[%c0_194, %c8_195, %c0_196], %227 {strides = array<i32>} : memref<4x32x128xf32, #tpu.memory_space<vmem>>, vector<4x16x128xf32>,
    %c0_197 = arith.constant 0 : index
    %c7_198 = arith.constant 7 : index
    %c0_199 = arith.constant 0 : index
    %229 = vector.load %arg15[%c0_197, %c7_198, %c0_199] : memref<4x32x128xf32, #tpu.memory_space<vmem>>, vector<4x16x128xf32>
    %230 = arith.truncf %229 : vector<4x16x128xf32> to vector<4x16x128xbf16>
    %231 = vector.shape_cast %230 : vector<4x16x128xbf16> to vector<64x128xbf16>
    %c0_200 = arith.constant 0 : index
    %c0_201 = arith.constant 0 : index
    %c0_202 = arith.constant 0 : index
    %232 = vector.load %arg7[%c0_200, %c0_201, %c0_202] : memref<3x128x128xbf16, #tpu.memory_space<vmem>>, vector<1x128x128xbf16>
    %233 = vector.shape_cast %232 : vector<1x128x128xbf16> to vector<128x128xbf16>
    %cst_203 = arith.constant dense<0.000000e+00> : vector<64x128xf32>
    %234 = tpu.matmul %231, %233, %cst_203 {dimension_numbers = #tpu.dot_dimension_numbers<[1], [0], [0], [1], [0, 0, 1, 1], [], []>} : vector<64x128xbf16>, vector<128x128xbf16>, vector<64x128xf32> -> vector<64x128xf32>
    %c0_204 = arith.constant 0 : index
    %c8_205 = arith.constant 8 : index
    %c0_206 = arith.constant 0 : index
    %235 = vector.load %arg15[%c0_204, %c8_205, %c0_206] : memref<4x32x128xf32, #tpu.memory_space<vmem>>, vector<4x16x128xf32>
    %236 = arith.truncf %235 : vector<4x16x128xf32> to vector<4x16x128xbf16>
    %237 = vector.shape_cast %236 : vector<4x16x128xbf16> to vector<64x128xbf16>
    %c1_207 = arith.constant 1 : index
    %c0_208 = arith.constant 0 : index
    %c0_209 = arith.constant 0 : index
    %238 = vector.load %arg7[%c1_207, %c0_208, %c0_209] : memref<3x128x128xbf16, #tpu.memory_space<vmem>>, vector<1x128x128xbf16>
    %239 = vector.shape_cast %238 : vector<1x128x128xbf16> to vector<128x128xbf16>
    %cst_210 = arith.constant dense<0.000000e+00> : vector<64x128xf32>
    %240 = tpu.matmul %237, %239, %cst_210 {dimension_numbers = #tpu.dot_dimension_numbers<[1], [0], [0], [1], [0, 0, 1, 1], [], []>} : vector<64x128xbf16>, vector<128x128xbf16>, vector<64x128xf32> -> vector<64x128xf32>
    %241 = arith.addf %234, %240 : vector<64x128xf32>
    %c0_211 = arith.constant 0 : index
    %c9_212 = arith.constant 9 : index
    %c0_213 = arith.constant 0 : index
    %242 = vector.load %arg15[%c0_211, %c9_212, %c0_213] : memref<4x32x128xf32, #tpu.memory_space<vmem>>, vector<4x16x128xf32>
    %243 = arith.truncf %242 : vector<4x16x128xf32> to vector<4x16x128xbf16>
    %244 = vector.shape_cast %243 : vector<4x16x128xbf16> to vector<64x128xbf16>
    %c2_214 = arith.constant 2 : index
    %c0_215 = arith.constant 0 : index
    %c0_216 = arith.constant 0 : index
    %245 = vector.load %arg7[%c2_214, %c0_215, %c0_216] : memref<3x128x128xbf16, #tpu.memory_space<vmem>>, vector<1x128x128xbf16>
    %246 = vector.shape_cast %245 : vector<1x128x128xbf16> to vector<128x128xbf16>
    %cst_217 = arith.constant dense<0.000000e+00> : vector<64x128xf32>
    %247 = tpu.matmul %244, %246, %cst_217 {dimension_numbers = #tpu.dot_dimension_numbers<[1], [0], [0], [1], [0, 0, 1, 1], [], []>} : vector<64x128xbf16>, vector<128x128xbf16>, vector<64x128xf32> -> vector<64x128xf32>
    %248 = arith.addf %241, %247 : vector<64x128xf32>
    %c0_218 = arith.constant 0 : index
    %c640 = arith.constant 640 : index
    %249 = vector.load %arg13[%c0_218, %c640] : memref<1x1536xf32, #tpu.memory_space<vmem>>, vector<1x128xf32>
    %250 = vector.broadcast %249 : vector<1x128xf32> to vector<64x128xf32>
    %251 = arith.addf %248, %250 : vector<64x128xf32>
    %252 = vector.shape_cast %251 : vector<64x128xf32> to vector<4x16x128xf32>
    %253 = arith.negf %252 : vector<4x16x128xf32>
    %254 = math.exp %253 : vector<4x16x128xf32>
    %cst_219 = arith.constant 1.000000e+00 : f32
    %255 = vector.broadcast %cst_219 : f32 to vector<4x16x128xf32>
    %256 = arith.addf %255, %254 : vector<4x16x128xf32>
    %257 = arith.divf %255, %256 : vector<4x16x128xf32>
    %258 = arith.mulf %252, %257 : vector<4x16x128xf32>
    %c0_220 = arith.constant 0 : index
    %c8_221 = arith.constant 8 : index
    %c0_222 = arith.constant 0 : index
    %259 = vector.load %arg15[%c0_220, %c8_221, %c0_222] : memref<4x32x128xf32, #tpu.memory_space<vmem>>, vector<4x16x128xf32>
    tpu.vector_store %arg15[%c0_220, %c8_221, %c0_222], %258 {strides = array<i32>} : memref<4x32x128xf32, #tpu.memory_space<vmem>>, vector<4x16x128xf32>,
    %c0_223 = arith.constant 0 : index
    %c7_224 = arith.constant 7 : index
    %c0_225 = arith.constant 0 : index
    %260 = vector.load %arg15[%c0_223, %c7_224, %c0_225] : memref<4x32x128xf32, #tpu.memory_space<vmem>>, vector<4x16x128xf32>
    %261 = arith.truncf %260 : vector<4x16x128xf32> to vector<4x16x128xbf16>
    %262 = vector.shape_cast %261 : vector<4x16x128xbf16> to vector<64x128xbf16>
    %c0_226 = arith.constant 0 : index
    %c0_227 = arith.constant 0 : index
    %c0_228 = arith.constant 0 : index
    %263 = vector.load %arg8[%c0_226, %c0_227, %c0_228] : memref<3x128x128xbf16, #tpu.memory_space<vmem>>, vector<1x128x128xbf16>
    %264 = vector.shape_cast %263 : vector<1x128x128xbf16> to vector<128x128xbf16>
    %cst_229 = arith.constant dense<0.000000e+00> : vector<64x128xf32>
    %265 = tpu.matmul %262, %264, %cst_229 {dimension_numbers = #tpu.dot_dimension_numbers<[1], [0], [0], [1], [0, 0, 1, 1], [], []>} : vector<64x128xbf16>, vector<128x128xbf16>, vector<64x128xf32> -> vector<64x128xf32>
    %c0_230 = arith.constant 0 : index
    %c8_231 = arith.constant 8 : index
    %c0_232 = arith.constant 0 : index
    %266 = vector.load %arg15[%c0_230, %c8_231, %c0_232] : memref<4x32x128xf32, #tpu.memory_space<vmem>>, vector<4x16x128xf32>
    %267 = arith.truncf %266 : vector<4x16x128xf32> to vector<4x16x128xbf16>
    %268 = vector.shape_cast %267 : vector<4x16x128xbf16> to vector<64x128xbf16>
    %c1_233 = arith.constant 1 : index
    %c0_234 = arith.constant 0 : index
    %c0_235 = arith.constant 0 : index
    %269 = vector.load %arg8[%c1_233, %c0_234, %c0_235] : memref<3x128x128xbf16, #tpu.memory_space<vmem>>, vector<1x128x128xbf16>
    %270 = vector.shape_cast %269 : vector<1x128x128xbf16> to vector<128x128xbf16>
    %cst_236 = arith.constant dense<0.000000e+00> : vector<64x128xf32>
    %271 = tpu.matmul %268, %270, %cst_236 {dimension_numbers = #tpu.dot_dimension_numbers<[1], [0], [0], [1], [0, 0, 1, 1], [], []>} : vector<64x128xbf16>, vector<128x128xbf16>, vector<64x128xf32> -> vector<64x128xf32>
    %272 = arith.addf %265, %271 : vector<64x128xf32>
    %c0_237 = arith.constant 0 : index
    %c9_238 = arith.constant 9 : index
    %c0_239 = arith.constant 0 : index
    %273 = vector.load %arg15[%c0_237, %c9_238, %c0_239] : memref<4x32x128xf32, #tpu.memory_space<vmem>>, vector<4x16x128xf32>
    %274 = arith.truncf %273 : vector<4x16x128xf32> to vector<4x16x128xbf16>
    %275 = vector.shape_cast %274 : vector<4x16x128xbf16> to vector<64x128xbf16>
    %c2_240 = arith.constant 2 : index
    %c0_241 = arith.constant 0 : index
    %c0_242 = arith.constant 0 : index
    %276 = vector.load %arg8[%c2_240, %c0_241, %c0_242] : memref<3x128x128xbf16, #tpu.memory_space<vmem>>, vector<1x128x128xbf16>
    %277 = vector.shape_cast %276 : vector<1x128x128xbf16> to vector<128x128xbf16>
    %cst_243 = arith.constant dense<0.000000e+00> : vector<64x128xf32>
    %278 = tpu.matmul %275, %277, %cst_243 {dimension_numbers = #tpu.dot_dimension_numbers<[1], [0], [0], [1], [0, 0, 1, 1], [], []>} : vector<64x128xbf16>, vector<128x128xbf16>, vector<64x128xf32> -> vector<64x128xf32>
    %279 = arith.addf %272, %278 : vector<64x128xf32>
    %c0_244 = arith.constant 0 : index
    %c768 = arith.constant 768 : index
    %280 = vector.load %arg13[%c0_244, %c768] : memref<1x1536xf32, #tpu.memory_space<vmem>>, vector<1x128xf32>
    %281 = vector.broadcast %280 : vector<1x128xf32> to vector<64x128xf32>
    %282 = arith.addf %279, %281 : vector<64x128xf32>
    %283 = vector.shape_cast %282 : vector<64x128xf32> to vector<4x16x128xf32>
    %284 = arith.addf %283, %227 : vector<4x16x128xf32>
    %285 = arith.negf %284 : vector<4x16x128xf32>
    %286 = math.exp %285 : vector<4x16x128xf32>
    %cst_245 = arith.constant 1.000000e+00 : f32
    %287 = vector.broadcast %cst_245 : f32 to vector<4x16x128xf32>
    %288 = arith.addf %287, %286 : vector<4x16x128xf32>
    %289 = arith.divf %287, %288 : vector<4x16x128xf32>
    %290 = arith.mulf %284, %289 : vector<4x16x128xf32>
    %cst_246 = arith.constant dense<0.000000e+00> : vector<4x128xf32>
    %291 = vector.multi_reduction <add>, %290, %cst_246 [1] : vector<4x16x128xf32> to vector<4x128xf32>
    %cst_247 = arith.constant 1.600000e+01 : f32
    %292 = vector.broadcast %cst_247 : f32 to vector<4x128xf32>
    %293 = arith.divf %291, %292 : vector<4x128xf32>
    %294 = arith.truncf %293 : vector<4x128xf32> to vector<4x128xbf16>
    %c0_248 = arith.constant 0 : index
    %c0_249 = arith.constant 0 : index
    %295 = vector.load %arg9[%c0_248, %c0_249] : memref<128x256xbf16, #tpu.memory_space<vmem>>, vector<128x256xbf16>
    %cst_250 = arith.constant dense<0.000000e+00> : vector<4x256xf32>
    %296 = tpu.matmul %294, %295, %cst_250 {dimension_numbers = #tpu.dot_dimension_numbers<[1], [0], [0], [1], [0, 0, 1, 1], [], []>} : vector<4x128xbf16>, vector<128x256xbf16>, vector<4x256xf32> -> vector<4x256xf32>
    %c0_251 = arith.constant 0 : index
    %c896 = arith.constant 896 : index
    %297 = vector.load %arg13[%c0_251, %c896] : memref<1x1536xf32, #tpu.memory_space<vmem>>, vector<1x256xf32>
    %298 = vector.broadcast %297 : vector<1x256xf32> to vector<4x256xf32>
    %299 = arith.addf %296, %298 : vector<4x256xf32>
    %300 = arith.negf %299 : vector<4x256xf32>
    %301 = math.exp %300 : vector<4x256xf32>
    %cst_252 = arith.constant 1.000000e+00 : f32
    %302 = vector.broadcast %cst_252 : f32 to vector<4x256xf32>
    %303 = arith.addf %302, %301 : vector<4x256xf32>
    %304 = arith.divf %302, %303 : vector<4x256xf32>
    %305 = arith.mulf %299, %304 : vector<4x256xf32>
    %306 = arith.truncf %305 : vector<4x256xf32> to vector<4x256xbf16>
    %c0_253 = arith.constant 0 : index
    %c0_254 = arith.constant 0 : index
    %307 = vector.load %arg10[%c0_253, %c0_254] : memref<256x128xbf16, #tpu.memory_space<vmem>>, vector<256x128xbf16>
    %cst_255 = arith.constant dense<0.000000e+00> : vector<4x128xf32>
    %308 = tpu.matmul %306, %307, %cst_255 {dimension_numbers = #tpu.dot_dimension_numbers<[1], [0], [0], [1], [0, 0, 1, 1], [], []>} : vector<4x256xbf16>, vector<256x128xbf16>, vector<4x128xf32> -> vector<4x128xf32>
    %c0_256 = arith.constant 0 : index
    %c1152 = arith.constant 1152 : index
    %309 = vector.load %arg13[%c0_256, %c1152] : memref<1x1536xf32, #tpu.memory_space<vmem>>, vector<1x128xf32>
    %310 = vector.broadcast %309 : vector<1x128xf32> to vector<4x128xf32>
    %311 = arith.addf %308, %310 : vector<4x128xf32>
    %312 = arith.negf %311 : vector<4x128xf32>
    %313 = math.exp %312 : vector<4x128xf32>
    %cst_257 = arith.constant 1.000000e+00 : f32
    %314 = vector.broadcast %cst_257 : f32 to vector<4x128xf32>
    %315 = arith.addf %314, %313 : vector<4x128xf32>
    %316 = arith.divf %314, %315 : vector<4x128xf32>
    %317 = arith.mulf %311, %316 : vector<4x128xf32>
    %318 = arith.truncf %317 : vector<4x128xf32> to vector<4x128xbf16>
    %c0_258 = arith.constant 0 : index
    %c0_259 = arith.constant 0 : index
    %319 = vector.load %arg11[%c0_258, %c0_259] : memref<128x64xbf16, #tpu.memory_space<vmem>>, vector<128x64xbf16>
    %cst_260 = arith.constant dense<0.000000e+00> : vector<4x64xf32>
    %320 = tpu.matmul %318, %319, %cst_260 {dimension_numbers = #tpu.dot_dimension_numbers<[1], [0], [0], [1], [0, 0, 1, 1], [], []>} : vector<4x128xbf16>, vector<128x64xbf16>, vector<4x64xf32> -> vector<4x64xf32>
    %c0_261 = arith.constant 0 : index
    %c1280 = arith.constant 1280 : index
    %321 = vector.load %arg13[%c0_261, %c1280] : memref<1x1536xf32, #tpu.memory_space<vmem>>, vector<1x64xf32>
    %322 = vector.broadcast %321 : vector<1x64xf32> to vector<4x64xf32>
    %323 = arith.addf %320, %322 : vector<4x64xf32>
    %324 = arith.negf %323 : vector<4x64xf32>
    %325 = math.exp %324 : vector<4x64xf32>
    %cst_262 = arith.constant 1.000000e+00 : f32
    %326 = vector.broadcast %cst_262 : f32 to vector<4x64xf32>
    %327 = arith.addf %326, %325 : vector<4x64xf32>
    %328 = arith.divf %326, %327 : vector<4x64xf32>
    %329 = arith.mulf %323, %328 : vector<4x64xf32>
    %330 = arith.truncf %329 : vector<4x64xf32> to vector<4x64xbf16>
    %c0_263 = arith.constant 0 : index
    %c0_264 = arith.constant 0 : index
    %331 = vector.load %arg12[%c0_263, %c0_264] : memref<64x128xbf16, #tpu.memory_space<vmem>>, vector<64x128xbf16>
    %cst_265 = arith.constant dense<0.000000e+00> : vector<4x128xf32>
    %332 = tpu.matmul %330, %331, %cst_265 {dimension_numbers = #tpu.dot_dimension_numbers<[1], [0], [0], [1], [0, 0, 1, 1], [], []>} : vector<4x64xbf16>, vector<64x128xbf16>, vector<4x128xf32> -> vector<4x128xf32>
    %c0_266 = arith.constant 0 : index
    %c1408 = arith.constant 1408 : index
    %333 = vector.load %arg13[%c0_266, %c1408] : memref<1x1536xf32, #tpu.memory_space<vmem>>, vector<1x128xf32>
    %334 = vector.broadcast %333 : vector<1x128xf32> to vector<4x128xf32>
    %335 = arith.addf %332, %334 : vector<4x128xf32>
    %c0_267 = arith.constant 0 : index
    %c0_268 = arith.constant 0 : index
    %336 = vector.load %arg14[%c0_267, %c0_268] : memref<4x128xf32, #tpu.memory_space<vmem>>, vector<4x128xf32>
    tpu.vector_store %arg14[%c0_267, %c0_268], %335 {strides = array<i32>} : memref<4x128xf32, #tpu.memory_space<vmem>>, vector<4x128xf32>,
    return
  }
  func.func @transform_0(%arg0: i32) -> (i32, i32, i32) {
    %c0_i32 = arith.constant 0 : i32
    %c0_i32_0 = arith.constant 0 : i32
    %c0_i32_1 = arith.constant 0 : i32
    %c0_i32_2 = arith.constant 0 : i32
    return %c0_i32, %c0_i32_0, %c0_i32_1 : i32, i32, i32
  }
  func.func @transform_1(%arg0: i32) -> (i32, i32, i32) {
    %c0_i32 = arith.constant 0 : i32
    %c0_i32_0 = arith.constant 0 : i32
    %c0_i32_1 = arith.constant 0 : i32
    %c0_i32_2 = arith.constant 0 : i32
    return %c0_i32, %c0_i32_0, %c0_i32_1 : i32, i32, i32
  }
  func.func @transform_2(%arg0: i32) -> (i32, i32, i32) {
    %c0_i32 = arith.constant 0 : i32
    %c0_i32_0 = arith.constant 0 : i32
    %c0_i32_1 = arith.constant 0 : i32
    %c0_i32_2 = arith.constant 0 : i32
    return %c0_i32, %c0_i32_0, %c0_i32_1 : i32, i32, i32
  }
  func.func @transform_3(%arg0: i32) -> (i32, i32, i32) {
    %c0_i32 = arith.constant 0 : i32
    %c0_i32_0 = arith.constant 0 : i32
    %c0_i32_1 = arith.constant 0 : i32
    %c0_i32_2 = arith.constant 0 : i32
    return %c0_i32, %c0_i32_0, %c0_i32_1 : i32, i32, i32
  }
  func.func @transform_4(%arg0: i32) -> (i32, i32, i32) {
    %c0_i32 = arith.constant 0 : i32
    %c0_i32_0 = arith.constant 0 : i32
    %c0_i32_1 = arith.constant 0 : i32
    %c0_i32_2 = arith.constant 0 : i32
    return %c0_i32, %c0_i32_0, %c0_i32_1 : i32, i32, i32
  }
  func.func @transform_5(%arg0: i32) -> (i32, i32, i32) {
    %c0_i32 = arith.constant 0 : i32
    %c0_i32_0 = arith.constant 0 : i32
    %c0_i32_1 = arith.constant 0 : i32
    %c0_i32_2 = arith.constant 0 : i32
    return %c0_i32, %c0_i32_0, %c0_i32_1 : i32, i32, i32
  }
  func.func @transform_6(%arg0: i32) -> (i32, i32, i32) {
    %c0_i32 = arith.constant 0 : i32
    %c0_i32_0 = arith.constant 0 : i32
    %c0_i32_1 = arith.constant 0 : i32
    %c0_i32_2 = arith.constant 0 : i32
    return %c0_i32, %c0_i32_0, %c0_i32_1 : i32, i32, i32
  }
  func.func @transform_7(%arg0: i32) -> (i32, i32, i32) {
    %c0_i32 = arith.constant 0 : i32
    %c0_i32_0 = arith.constant 0 : i32
    %c0_i32_1 = arith.constant 0 : i32
    %c0_i32_2 = arith.constant 0 : i32
    return %c0_i32, %c0_i32_0, %c0_i32_1 : i32, i32, i32
  }
  func.func @transform_8(%arg0: i32) -> (i32, i32) {
    %c0_i32 = arith.constant 0 : i32
    %c0_i32_0 = arith.constant 0 : i32
    %c0_i32_1 = arith.constant 0 : i32
    return %c0_i32, %c0_i32_0 : i32, i32
  }
  func.func @transform_9(%arg0: i32) -> (i32, i32) {
    %c0_i32 = arith.constant 0 : i32
    %c0_i32_0 = arith.constant 0 : i32
    %c0_i32_1 = arith.constant 0 : i32
    return %c0_i32, %c0_i32_0 : i32, i32
  }
  func.func @transform_10(%arg0: i32) -> (i32, i32) {
    %c0_i32 = arith.constant 0 : i32
    %c0_i32_0 = arith.constant 0 : i32
    %c0_i32_1 = arith.constant 0 : i32
    return %c0_i32, %c0_i32_0 : i32, i32
  }
  func.func @transform_11(%arg0: i32) -> (i32, i32) {
    %c0_i32 = arith.constant 0 : i32
    %c0_i32_0 = arith.constant 0 : i32
    %c0_i32_1 = arith.constant 0 : i32
    return %c0_i32, %c0_i32_0 : i32, i32
  }
  func.func @transform_12(%arg0: i32) -> (i32, i32) {
    %c0_i32 = arith.constant 0 : i32
    %c0_i32_0 = arith.constant 0 : i32
    %c0_i32_1 = arith.constant 0 : i32
    return %c0_i32, %c0_i32_0 : i32, i32
  }
  func.func @transform_13(%arg0: i32) -> (i32, i32) {
    %c0_i32 = arith.constant 0 : i32
    %c0_i32_0 = arith.constant 0 : i32
    %c0_i32_1 = arith.constant 0 : i32
    return %c0_i32, %c0_i32_0 : i32, i32
  }
}

</mosaic_0001>

<bundles_post_ra>
// kernel: ert_forward.1
= control target key start
LH: loop header
LB: loop body
LE: loop exit
PB: predicated region body
PF: predicated region fallthrough
CT: control target
= control target key end

     0   :  { %18 = vsyncpa [#allocation4], 0  ;;  %s8555_s0 = inlined_call_operand.vmem [shape: f32[4,16,1], index: 0, kind: input, shape index: {}]   ;;  %s8556_s1 = inlined_call_operand.hbm [shape: bf16[5,8,64], index: 1, kind: input, shape index: {}]   ;;  %s8557_s2 = inlined_call_operand.vmem [shape: bf16[7,64,32], index: 2, kind: input, shape index: {}]   ;;  %s8558_s3 = inlined_call_operand.hbm [shape: bf16[7,32,64], index: 3, kind: input, shape index: {}]   ;;  %s8559_s4 = inlined_call_operand.hbm [shape: bf16[3,64,128], index: 4, kind: input, shape index: {}]   ;;  %s8560_s5 = inlined_call_operand.vmem [shape: bf16[3,128,128], index: 5, kind: input, shape index: {}]   ;;  %s8561_s6 = inlined_call_operand.vmem [shape: bf16[3,128,128], index: 6, kind: input, shape index: {}]   ;;  %s8562_s7 = inlined_call_operand.hbm [shape: bf16[3,128,128], index: 7, kind: input, shape index: {}]   ;;  %s8563_s8 = inlined_call_operand.hbm [shape: bf16[128,256], index: 8, kind: input, shape index: {}]   ;;  %s8564_s9 = inlined_call_operand.hbm [shape: bf16[256,128], index: 9, kind: input, shape index: {}]   ;;  %s8565_s10 = inlined_call_operand.vmem [shape: bf16[128,64], index: 10, kind: input, shape index: {}]   ;;  %s8566_s11 = inlined_call_operand.hbm [shape: bf16[64,128], index: 11, kind: input, shape index: {}]   ;;  %s8567_s12 = inlined_call_operand.hbm [shape: f32[1,1536], index: 12, kind: input, shape index: {}]   ;;  %s8568_s13 = inlined_call_operand.vmem [shape: f32[4,128], index: 13, kind: output, shape index: {}]  }
   0x1   :  { %19 = vsyncpa [#allocation6], 0 }
   0x2   :  { %20 = vsyncpa [#allocation9], 0 }
   0x3   :  { %21 = vsyncpa [#allocation12], 0 }
   0x4   :  { %22 = vsyncpa [#allocation15], 0  ;;  %s44_s27 = sshll.u32 %s8558_s3, 4  ;;  %s7119_s28 = smov [#allocation5]   ;;  %s45_s27 = int_to_ptr.hbm [resolvable:$true] %s44_s27 }
   0x5   :  { %s46_s29 = sshll.u32 %s7119_s28, 4  ;;  %s74_s15 = sshll.u32 %s8562_s7, 4  ;;  %s47_s29 = int_to_ptr.vmem [resolvable:$true] %s46_s29  ;;  %s75_s15 = int_to_ptr.hbm [resolvable:$true] %s74_s15 }
   0x6   :  { %s7120_s16 = smov 64   ;;  %s7121_s17 = smov 4  }
   0x7   :  { %52 = dma.hbm_to_vmem [thread:$0]  %s45_s27, 1792, %s47_s29, [#allocation6], %s7120_s16, %s7120_s16, %s7121_s17  }
   0x8   :  { %s7122_s18 = smov [#allocation8]   ;;  %s100_s3 = sshll.u32 %s8564_s9, 4  ;;  %s101_s3 = int_to_ptr.hbm [resolvable:$true] %s100_s3 }
   0x9   :  { %s76_s19 = sshll.u32 %s7122_s18, 4  ;;  %s29_s23 = sshll.u32 %s8556_s1, 4  ;;  %s77_s19 = int_to_ptr.vmem [resolvable:$true] %s76_s19  ;;  %s30_s23 = int_to_ptr.hbm [resolvable:$true] %s29_s23 }
   0xa   :  { %82 = dma.hbm_to_vmem [thread:$0]  %s75_s15, 3072, %s77_s19, [#allocation9], %s7120_s16, %s7120_s16, %s7121_s17  }
   0xb   :  { %s7123_s24 = smov [#allocation11]   ;;  %s7124_s26 = smov [#allocation3]  }
   0xc   :  { %s102_s25 = sshll.u32 %s7123_s24, 4  ;;  %s31_s9 = sshll.u32 %s7124_s26, 4  ;;  %s103_s25 = int_to_ptr.vmem [resolvable:$true] %s102_s25  ;;  %s32_s9 = int_to_ptr.vmem [resolvable:$true] %s31_s9 }
   0xd   :  { %108 = dma.hbm_to_vmem [thread:$0]  %s101_s3, 2048, %s103_s25, [#allocation12], %s7120_s16, %s7120_s16, %s7121_s17  }
   0xe   :  { %s57_s29 = sshll.u32 %s8559_s4, 4  ;;  %s87_s14 = sshll.u32 %s8563_s8, 4  ;;  %s58_s29 = int_to_ptr.hbm [resolvable:$true] %s57_s29  ;;  %s88_s14 = int_to_ptr.hbm [resolvable:$true] %s87_s14 }
   0xf   :  { %37 = dma.hbm_to_vmem [thread:$0]  %s30_s23, 320, %s32_s9, [#allocation4], %s7120_s16, %s7120_s16, %s7121_s17  }
  0x10   :  { %s7125_s15 = smov [#allocation7]   ;;  %s7126_s19 = smov [#allocation10]  }
  0x11   :  { %s59_s18 = sshll.u32 %s7125_s15, 4  ;;  %s89_s4 = sshll.u32 %s7126_s19, 4  ;;  %s60_s18 = int_to_ptr.vmem [resolvable:$true] %s59_s18  ;;  %s90_s4 = int_to_ptr.vmem [resolvable:$true] %s89_s4 }
  0x12   :  { %65 = dma.hbm_to_vmem [thread:$0]  %s58_s29, 1536, %s60_s18, [#allocation6], %s7120_s16, %s7120_s16, %s7121_s17  }
  0x13   :  { %s7127_s20 = smov 128   ;;  %s7128_s21 = smov 8  }
  0x14   :  { %95 = dma.hbm_to_vmem [thread:$0]  %s88_s14, 2048, %s90_s4, [#allocation9], %s7127_s20, %s7127_s20, %s7128_s21  }
  0x15   :  { %s115_s22 = sshll.u32 %s8566_s11, 4  ;;  %s7129_s8 = smov [#allocation13]   ;;  %s116_s22 = int_to_ptr.hbm [resolvable:$true] %s115_s22 }
  0x16   :  { %s117_s23 = sshll.u32 %s7129_s8, 4  ;;  %s129_s26 = sshll.u32 %s8567_s12, 4  ;;  %s118_s23 = int_to_ptr.vmem [resolvable:$true] %s117_s23  ;;  %s130_s26 = int_to_ptr.hbm [resolvable:$true] %s129_s26 }
  0x17   :  { %123 = dma.hbm_to_vmem [thread:$0]  %s116_s22, 512, %s118_s23, [#allocation12], %s7120_s16, %s7120_s16, %s7121_s17  }
  0x18   :  { %s7130_s9 = smov [#allocation14]  }
  0x19   :  { %s131_s27 = sshll.u32 %s7130_s9, 4  ;;  %s132_s27 = int_to_ptr.vmem [resolvable:$true] %s131_s27 }
  0x1a   :  { %134 = dma.hbm_to_vmem [thread:$0]  %s130_s26, 192, %s132_s27, [#allocation15]  }
  0x1b   :  { %7109 = dma.done.wait [#allocation4], 320  }
  0x1c   :  { %7110 = vsyncadd [#allocation4], 4294966976 }
  0x1d   :  { %7111 = dma.done.wait [#allocation6], 3328  }
  0x1e   :  { %7112 = vsyncadd [#allocation6], 4294963968 }
  0x1f   :  { %7113 = dma.done.wait [#allocation9], 5120  }
  0x20   :  { %7114 = vsyncadd [#allocation9], 4294962176 }
  0x21   :  { %7115 = dma.done.wait [#allocation12], 2560  }
  0x22   :  { %7116 = vsyncadd [#allocation12], 4294964736 }
  0x23   :  { %7117 = dma.done.wait [#allocation15], 192  }
  0x24   :  { %7118 = vsyncadd [#allocation15], 4294967104  ;;  %v7131_v0 = vmov 0.0   ;;  %vm269_vm0 = vcmask 1043456   ;;  %vm192_vm1 = vcmask 7168   ;;  %v184_v8 = vld [vmem:[%s8555_s0] sm:$0xff] }
  0x25   :  { %168 = vst [vmem:[#allocation2] sm:$0xff] %v7131_v0  ;;  %v235_v1 = vld [vmem:[#allocation3 + $0x4] sm:$0xf]  ;;  %v217_v2 = vld [vmem:[#allocation3] sm:$0xf]  ;;  %v185_v10 = vld [vmem:[%s8555_s0 + $0x8] sm:$0xff] }
  0x26   :  { %169 = vst [vmem:[#allocation2 + $0x8] sm:$0xff] %v7131_v0  ;;  %v383_v3 = vld [vmem:[#allocation3 + $0x8] sm:$0xf]  ;;  %v271_v4 = vsel %vm269_vm0, %v235_v1, 0  ;;  %v335_v5 = vsel %vm269_vm0, %v217_v2, 0  ;;  %v186_v27 = vld [vmem:[%s8555_s0 + $0x10] sm:$0xff] }
  0x27   :  { %170 = vst [vmem:[#allocation2 + $0x10] sm:$0xff] %v7131_v0  ;;  %v417_v6 = vsel %vm269_vm0, %v383_v3, 0  ;;  %v473_v7 = vld [vmem:[#allocation3 + $0xc] sm:$0xf]  ;;  %280 = vmatpush.bf16.msra.mxu0 %v271_v4  ;;  %344 = vmatpush.bf16.msra.mxu1 %v335_v5  ;;  %v563_v11 = vld [vmem:[#allocation3 + $0x10] sm:$0xf] }
  0x28   :  { %171 = vst [vmem:[#allocation2 + $0x18] sm:$0xff] %v7131_v0  ;;  %v507_v9 = vsel %vm269_vm0, %v473_v7, 0  ;;  %426 = vmatpush.bf16.msra.mxu2 %v417_v6  ;;  %v597_v12 = vsel %vm269_vm0, %v563_v11, 0  ;;  %v187_v32 = vld [vmem:[%s8555_s0 + $0x18] sm:$0xff]  ;;  %v188_v37 = vld [vmem:[%s8555_s0 + $0x20] sm:$0xff]  ;;  %vm256_vm2 = vcmask 64512  }
  0x29   :  { %172 = vst [vmem:[#allocation2 + $0x20] sm:$0xff] %v7131_v0  ;;  %516 = vmatpush.bf16.msra.mxu3 %v507_v9  ;;  %v189_v39 = vld [vmem:[%s8555_s0 + $0x28] sm:$0xff]  ;;  %v190_v45 = vld [vmem:[%s8555_s0 + $0x30] sm:$0xff]  ;;  %v191_v46 = vld [vmem:[%s8555_s0 + $0x38] sm:$0xff]  ;;  %vm808_vm7 = vcmask 523264  }
  0x2a   :  { %173 = vst [vmem:[#allocation2 + $0x28] sm:$0xff] %v7131_v0 }
  0x2b   :  { %193 = vst.msk [vmem:[#allocation2 + $0x8] sm:$0xff] %vm192_vm1, %v184_v8  ;;  %606 = vmatpush.bf16.msrb.mxu0 %v597_v12 }
  0x2c   :  { %194 = vst.msk [vmem:[#allocation2 + $0x10] sm:$0xff] %vm192_vm1, %v185_v10 }
  0x2d   :  { %174 = vst [vmem:[#allocation2 + $0x30] sm:$0xff] %v7131_v0 }
  0x2e   :  { %175 = vst [vmem:[#allocation2 + $0x38] sm:$0xff] %v7131_v0 }
  0x2f   :  { %176 = vst [vmem:[#allocation2 + $0x40] sm:$0xff] %v7131_v0 }
  0x30   :  { %177 = vst [vmem:[#allocation2 + $0x48] sm:$0xff] %v7131_v0 }
  0x31   :  { %178 = vst [vmem:[#allocation2 + $0x50] sm:$0xff] %v7131_v0 }
  0x32   :  { %v218_v13 = vld [vmem:[#allocation2 + $0x7] sm:$0xff]  ;;  %179 = vst [vmem:[#allocation2 + $0x58] sm:$0xff] %v7131_v0 }
  0x33   :  { %v201_v14 = vld [vmem:[#allocation2 + $0x6] sm:$0xff]  ;;  %v219_v16 = vld [vmem:[#allocation2 + $0xf] sm:$0xff]  ;;  %v226_v17 = vpack.c.bf16 %v218_v13, %v218_v13  ;;  %180 = vst [vmem:[#allocation2 + $0x60] sm:$0xff] %v7131_v0 }
  0x34   :  { %v366_v15 = vld [vmem:[#allocation2 + $0x8] sm:$0xff]  ;;  %v209_v19 = vpack.c.bf16 %v201_v14, %v201_v14  ;;  %v367_v20 = vld [vmem:[#allocation2 + $0x10] sm:$0xff]  ;;  %v227_v22 = vpack.c.bf16 %v219_v16, %v219_v16  ;;  %181 = vst [vmem:[#allocation2 + $0x68] sm:$0xff] %v7131_v0 }
  0x35   :  { %v202_v18 = vld [vmem:[#allocation2 + $0xe] sm:$0xff]  ;;  %v374_v21 = vpack.c.bf16 %v366_v15, %v366_v15  ;;  %v375_v24 = vpack.c.bf16 %v367_v20, %v367_v20  ;;  %v244_v28 = vunpack.c.l.b16 %v226_v17  ;;  %182 = vst [vmem:[#allocation2 + $0x70] sm:$0xff] %v7131_v0 }
  0x36   :  { %v210_v23 = vpack.c.bf16 %v202_v18, %v202_v18  ;;  %v456_v25 = vld [vmem:[#allocation2 + $0x9] sm:$0xff]  ;;  %v457_v26 = vld [vmem:[#allocation2 + $0x11] sm:$0xff]  ;;  %v310_v29 = vunpack.c.l.b16 %v209_v19  ;;  %v245_v33 = vunpack.c.l.b16 %v227_v22  ;;  %183 = vst [vmem:[#allocation2 + $0x78] sm:$0xff] %v7131_v0 }
  0x37   :  { %v392_v30 = vunpack.c.l.b16 %v374_v21  ;;  %v464_v31 = vpack.c.bf16 %v456_v25, %v456_v25  ;;  %v393_v35 = vunpack.c.l.b16 %v375_v24  ;;  %v465_v36 = vpack.c.bf16 %v457_v26, %v457_v26  ;;  %195 = vst.msk [vmem:[#allocation2 + $0x28] sm:$0xff] %vm192_vm1, %v186_v27 }
  0x38   :  { %v311_v34 = vunpack.c.l.b16 %v210_v23  ;;  %v252_v40 = vpack.c.b16 %v245_v33, %v244_v28  ;;  %196 = vst.msk [vmem:[#allocation2 + $0x30] sm:$0xff] %vm192_vm1, %v187_v32 }
  0x39   :  { %v482_v38 = vunpack.c.l.b16 %v464_v31  ;;  %v400_v42 = vpack.c.b16 %v393_v35, %v392_v30  ;;  %v483_v43 = vunpack.c.l.b16 %v465_v36  ;;  %197 = vst.msk [vmem:[#allocation2 + $0x48] sm:$0xff] %vm192_vm1, %v188_v37 }
  0x3a   :  { %v318_v41 = vpack.c.b16 %v311_v34, %v310_v29  ;;  %5540 = vmatmul.msk.bf16.vlgmr.msra.gmra.mxu0 %vm256_vm2, %v252_v40  ;;  %198 = vst.msk [vmem:[#allocation2 + $0x50] sm:$0xff] %vm192_vm1, %v189_v39 }
  0x3b   :  { %v490_v44 = vpack.c.b16 %v483_v43, %v482_v38  ;;  %5548 = vmatmul.msk.bf16.vlgmr.msra.gmra.mxu2 %vm256_vm2, %v400_v42  ;;  %199 = vst.msk [vmem:[#allocation2 + $0x68] sm:$0xff] %vm192_vm1, %v190_v45 }
  0x3c   :  { %5544 = vmatmul.msk.bf16.vlgmr.msra.gmra.mxu1 %vm256_vm2, %v318_v41  ;;  %200 = vst.msk [vmem:[#allocation2 + $0x70] sm:$0xff] %vm192_vm1, %v191_v46 }
  0x3d   :  { %5552 = vmatmul.msk.bf16.vlgmr.msra.gmra.mxu3 %vm256_vm2, %v490_v44 }
  0x3e   :  { %v220_v47 = vld [vmem:[#allocation2 + $0x27] sm:$0xff] }
  0x3f   :  { %v203_v48 = vld [vmem:[#allocation2 + $0x26] sm:$0xff]  ;;  %v221_v50 = vld [vmem:[#allocation2 + $0x2f] sm:$0xff]  ;;  %v228_v51 = vpack.c.bf16 %v220_v47, %v220_v47 }
  0x40   :  { %v368_v49 = vld [vmem:[#allocation2 + $0x28] sm:$0xff]  ;;  %v211_v53 = vpack.c.bf16 %v203_v48, %v203_v48  ;;  %v369_v54 = vld [vmem:[#allocation2 + $0x30] sm:$0xff]  ;;  %v229_v56 = vpack.c.bf16 %v221_v50, %v221_v50 }
  0x41   :  { %v204_v52 = vld [vmem:[#allocation2 + $0x2e] sm:$0xff]  ;;  %v376_v55 = vpack.c.bf16 %v368_v49, %v368_v49  ;;  %v377_v58 = vpack.c.bf16 %v369_v54, %v369_v54  ;;  %v246_v61 = vunpack.c.l.b16 %v228_v51  ;;  %v205_v13 = vld [vmem:[#allocation2 + $0x46] sm:$0xff] }
  0x42   :  { %v212_v57 = vpack.c.bf16 %v204_v52, %v204_v52  ;;  %v458_v59 = vld [vmem:[#allocation2 + $0x29] sm:$0xff]  ;;  %v459_v60 = vld [vmem:[#allocation2 + $0x31] sm:$0xff]  ;;  %v247_v63 = vunpack.c.l.b16 %v229_v56  ;;  %v312_v0 = vunpack.c.l.b16 %v211_v53  ;;  %v213_v21 = vpack.c.bf16 %v205_v13, %v205_v13 }
  0x43   :  { %v466_v62 = vpack.c.bf16 %v458_v59, %v458_v59  ;;  %v467_v2 = vpack.c.bf16 %v459_v60, %v459_v60  ;;  %v394_v3 = vunpack.c.l.b16 %v376_v55  ;;  %v395_v4 = vunpack.c.l.b16 %v377_v58  ;;  %v222_v11 = vld [vmem:[#allocation2 + $0x47] sm:$0xff]  ;;  %v223_v12 = vld [vmem:[#allocation2 + $0x4f] sm:$0xff] }
  0x44   :  { %v313_v1 = vunpack.c.l.b16 %v212_v57  ;;  %v253_v7 = vpack.c.b16 %v247_v63, %v246_v61  ;;  %v206_v14 = vld [vmem:[#allocation2 + $0x4e] sm:$0xff]  ;;  %v230_v19 = vpack.c.bf16 %v222_v11, %v222_v11  ;;  %v231_v20 = vpack.c.bf16 %v223_v12, %v223_v12  ;;  %v207_v41 = vld [vmem:[#allocation2 + $0x66] sm:$0xff] }
  0x45   :  { %v484_v5 = vunpack.c.l.b16 %v466_v62  ;;  %v485_v6 = vunpack.c.l.b16 %v467_v2  ;;  %v401_v9 = vpack.c.b16 %v395_v4, %v394_v3  ;;  %v370_v15 = vld [vmem:[#allocation2 + $0x48] sm:$0xff]  ;;  %v371_v16 = vld [vmem:[#allocation2 + $0x50] sm:$0xff]  ;;  %v214_v22 = vpack.c.bf16 %v206_v14, %v206_v14 }
  0x46   :  { %v319_v8 = vpack.c.b16 %v313_v1, %v312_v0  ;;  %v460_v17 = vld [vmem:[#allocation2 + $0x49] sm:$0xff]  ;;  %v461_v18 = vld [vmem:[#allocation2 + $0x51] sm:$0xff]  ;;  %v378_v23 = vpack.c.bf16 %v370_v15, %v370_v15  ;;  %v379_v24 = vpack.c.bf16 %v371_v16, %v371_v16  ;;  %v248_v27 = vunpack.c.l.b16 %v230_v19 }
  0x47   :  { %v491_v10 = vpack.c.b16 %v485_v6, %v484_v5  ;;  %v468_v25 = vpack.c.bf16 %v460_v17, %v460_v17  ;;  %v469_v26 = vpack.c.bf16 %v461_v18, %v461_v18  ;;  %v249_v28 = vunpack.c.l.b16 %v231_v20  ;;  %v224_v39 = vld [vmem:[#allocation2 + $0x67] sm:$0xff]  ;;  %v225_v40 = vld [vmem:[#allocation2 + $0x6f] sm:$0xff] }
  0x48   :  { %v314_v29 = vunpack.c.l.b16 %v213_v21  ;;  %v315_v30 = vunpack.c.l.b16 %v214_v22  ;;  %v396_v31 = vunpack.c.l.b16 %v378_v23  ;;  %v397_v32 = vunpack.c.l.b16 %v379_v24  ;;  %v208_v42 = vld [vmem:[#allocation2 + $0x6e] sm:$0xff] }
  0x49   :  { %v486_v33 = vunpack.c.l.b16 %v468_v25  ;;  %v487_v34 = vunpack.c.l.b16 %v469_v26  ;;  %v254_v35 = vpack.c.b16 %v249_v28, %v248_v27  ;;  %v372_v43 = vld [vmem:[#allocation2 + $0x68] sm:$0xff]  ;;  %v373_v44 = vld [vmem:[#allocation2 + $0x70] sm:$0xff]  ;;  %v232_v47 = vpack.c.bf16 %v224_v39, %v224_v39 }
  0x4a   :  { %5541 = vmatmul.msk.bf16.gmra.mxu0 %vm256_vm2, %v253_v7  ;;  %v320_v36 = vpack.c.b16 %v315_v30, %v314_v29  ;;  %v402_v37 = vpack.c.b16 %v397_v32, %v396_v31  ;;  %v462_v45 = vld [vmem:[#allocation2 + $0x69] sm:$0xff]  ;;  %v463_v46 = vld [vmem:[#allocation2 + $0x71] sm:$0xff]  ;;  %v233_v48 = vpack.c.bf16 %v225_v40, %v225_v40  ;;  %v215_v49 = vpack.c.bf16 %v207_v41, %v207_v41 }
  0x4b   :  { %5549 = vmatmul.msk.bf16.gmra.mxu2 %vm256_vm2, %v401_v9  ;;  %v492_v38 = vpack.c.b16 %v487_v34, %v486_v33  ;;  %v216_v50 = vpack.c.bf16 %v208_v42, %v208_v42  ;;  %v380_v51 = vpack.c.bf16 %v372_v43, %v372_v43  ;;  %v381_v52 = vpack.c.bf16 %v373_v44, %v373_v44  ;;  %v546_v3 = vld [vmem:[#allocation2 + $0xa] sm:$0xff]  ;;  %v547_v4 = vld [vmem:[#allocation2 + $0x12] sm:$0xff] }
  0x4c   :  { %5545 = vmatmul.msk.bf16.gmra.mxu1 %vm256_vm2, %v319_v8  ;;  %v470_v53 = vpack.c.bf16 %v462_v45, %v462_v45  ;;  %v471_v54 = vpack.c.bf16 %v463_v46, %v463_v46  ;;  %v250_v55 = vunpack.c.l.b16 %v232_v47  ;;  %v251_v56 = vunpack.c.l.b16 %v233_v48  ;;  %v549_v11 = vld [vmem:[#allocation2 + $0x32] sm:$0xff]  ;;  %v550_v17 = vld [vmem:[#allocation2 + $0x4a] sm:$0xff] }
  0x4d   :  { %5553 = vmatmul.msk.bf16.gmra.mxu3 %vm256_vm2, %v491_v10  ;;  %v316_v57 = vunpack.c.l.b16 %v215_v49  ;;  %v317_v58 = vunpack.c.l.b16 %v216_v50  ;;  %v398_v59 = vunpack.c.l.b16 %v380_v51  ;;  %v399_v60 = vunpack.c.l.b16 %v381_v52  ;;  %v548_v10 = vld [vmem:[#allocation2 + $0x2a] sm:$0xff]  ;;  %v551_v18 = vld [vmem:[#allocation2 + $0x52] sm:$0xff] }
  0x4e   :  { %v488_v61 = vunpack.c.l.b16 %v470_v53  ;;  %v489_v62 = vunpack.c.l.b16 %v471_v54  ;;  %v255_v63 = vpack.c.b16 %v251_v56, %v250_v55  ;;  %v554_v5 = vpack.c.bf16 %v546_v3, %v546_v3  ;;  %v552_v24 = vld [vmem:[#allocation2 + $0x6a] sm:$0xff]  ;;  %v553_v25 = vld [vmem:[#allocation2 + $0x72] sm:$0xff]  ;;  %v7319_v55 = vld [vmem:[#allocation14] ss:$0 sm:$0xff] }
  0x4f   :  { %v321_v0 = vpack.c.b16 %v317_v58, %v316_v57  ;;  %v403_v1 = vpack.c.b16 %v399_v60, %v398_v59  ;;  %v555_v6 = vpack.c.bf16 %v547_v4, %v547_v4  ;;  %v556_v12 = vpack.c.bf16 %v548_v10, %v548_v10  ;;  %v6491_v10 = vld [vmem:[%s8557_s2 + $0x50] sm:$0xff] }
  0x50   :  { %v493_v2 = vpack.c.b16 %v489_v62, %v488_v61  ;;  %v572_v7 = vunpack.c.l.b16 %v554_v5  ;;  %v557_v13 = vpack.c.bf16 %v549_v11, %v549_v11  ;;  %v558_v19 = vpack.c.bf16 %v550_v17, %v550_v17  ;;  %v6496_v5 = vld [vmem:[%s8557_s2 + $0x78] sm:$0xff]  ;;  %v6487_v11 = vld [vmem:[%s8557_s2 + $0x30] sm:$0xff] }
  0x51   :  { %v573_v8 = vunpack.c.l.b16 %v555_v6  ;;  %v574_v14 = vunpack.c.l.b16 %v556_v12  ;;  %v559_v20 = vpack.c.bf16 %v551_v18, %v551_v18  ;;  %v560_v26 = vpack.c.bf16 %v552_v24, %v552_v24  ;;  %1239 = vmatpush.bf16.msra.mxu0 %v6496_v5  ;;  %v6494_v24 = vld [vmem:[%s8557_s2 + $0x68] sm:$0xff] }
  0x52   :  { %v575_v15 = vunpack.c.l.b16 %v557_v13  ;;  %v576_v21 = vunpack.c.l.b16 %v558_v19  ;;  %v561_v27 = vpack.c.bf16 %v553_v25, %v553_v25 }
  0x53   :  { %v580_v9 = vpack.c.b16 %v573_v8, %v572_v7  ;;  %v577_v22 = vunpack.c.l.b16 %v559_v20  ;;  %v578_v28 = vunpack.c.l.b16 %v560_v26 }
  0x54   :  { %v581_v16 = vpack.c.b16 %v575_v15, %v574_v14  ;;  %v579_v29 = vunpack.c.l.b16 %v561_v27  ;;  %v6495_v14 = vld [vmem:[%s8557_s2 + $0x70] sm:$0xff] }
  0x55   :  { %v582_v23 = vpack.c.b16 %v577_v22, %v576_v21  ;;  %1240 = vmatpush.bf16.msra.mxu0 %v6495_v14  ;;  %v6482_v21 = vld [vmem:[%s8557_s2 + $0x8] sm:$0xff] }
  0x56   :  { %v583_v30 = vpack.c.b16 %v579_v29, %v578_v28  ;;  %v6490_v22 = vld [vmem:[%s8557_s2 + $0x48] sm:$0xff] }
  0x59   :  { %1241 = vmatpush.bf16.msra.mxu0 %v6494_v24 }
  0x5a   :  { %5542 = vmatmul.msk.bf16.gmra.mxu0 %vm256_vm2, %v254_v35  ;;  %v6484_v35 = vld [vmem:[%s8557_s2 + $0x18] sm:$0xff] }
  0x5b   :  { %5550 = vmatmul.msk.bf16.gmra.mxu2 %vm256_vm2, %v402_v37  ;;  %v6488_v37 = vld [vmem:[%s8557_s2 + $0x38] sm:$0xff] }
  0x5c   :  { %5546 = vmatmul.msk.bf16.gmra.mxu1 %vm256_vm2, %v320_v36  ;;  %v6492_v36 = vld [vmem:[%s8557_s2 + $0x58] sm:$0xff]  ;;  %1011 = vmatpush.bf16.msrb.mxu2 %v6484_v35 }
  0x5d   :  { %5554 = vmatmul.msk.bf16.gmra.mxu3 %vm256_vm2, %v492_v38  ;;  %926 = vmatpush.bf16.msrb.mxu1 %v6488_v37 }
  0x5e   :  { %1121 = vmatpush.bf16.msrb.mxu3 %v6492_v36  ;;  %v6493_v36 = vld [vmem:[%s8557_s2 + $0x60] sm:$0xff] }
  0x5f   :  { %1242 = vmatpush.bf16.msra.mxu0 %v6493_v36 }
  0x61   :  { %927 = vmatpush.bf16.msrb.mxu1 %v6487_v11 }
  0x62   :  { %1122 = vmatpush.bf16.msrb.mxu3 %v6491_v10 }
  0x66   :  { %1123 = vmatpush.bf16.msrb.mxu3 %v6490_v22 }
  0x6a   :  { %5543 = vmatmul.msk.bf16.gmra.mxu0 %vm256_vm2, %v255_v63 }
  0x6b   :  { %5551 = vmatmul.msk.bf16.gmra.mxu2 %vm256_vm2, %v403_v1 }
  0x6c   :  { %5547 = vmatmul.msk.bf16.gmra.mxu1 %vm256_vm2, %v321_v0 }
  0x6d   :  { %5555 = vmatmul.msk.bf16.gmra.mxu3 %vm256_vm2, %v493_v2 }
  0x7a   :  { %5556 = vmatmul.msk.bf16.vlgmr.msrb.gmra.mxu0 %vm256_vm2, %v580_v9  ;;  %v6483_v9 = vld [vmem:[%s8557_s2 + $0x10] sm:$0xff] }
  0x7b   :  { %1012 = vmatpush.bf16.msrb.mxu2 %v6483_v9 }
  0x7f   :  { %1013 = vmatpush.bf16.msrb.mxu2 %v6482_v21 }
  0x8a   :  { %5557 = vmatmul.msk.bf16.gmra.mxu0 %vm256_vm2, %v581_v16 }
  0x9a   :  { %5558 = vmatmul.msk.bf16.gmra.mxu0 %vm256_vm2, %v582_v23  ;;  %v6486_v23 = vld [vmem:[%s8557_s2 + $0x28] sm:$0xff] }
  0x9b   :  { %928 = vmatpush.bf16.msrb.mxu1 %v6486_v23 }
  0xaa   :  { %5559 = vmatmul.msk.bf16.gmra.mxu0 %vm256_vm2, %v583_v30 }
  0xb7   :  { %v282_v31 = vpop.f32.mrf.mxu0 }
  0xb9   :  { %v346_v39 = vpop.f32.mrf.mxu1 }
  0xba   :  { %v347_v50 = vadd.f32 %v346_v39, %v282_v31  ;;  %v6481_v31 = vld [vmem:[%s8557_s2] sm:$0xff] }
  0xbb   :  { %1014 = vmatpush.bf16.msrb.mxu2 %v6481_v31 }
  0xbe   :  { %v428_v40 = vpop.f32.mrf.mxu2 }
  0xbf   :  { %v284_v32 = vpop.f32.mrf.mxu0  ;;  %v448_v51 = vadd.f32 %v428_v40, %v347_v50 }
  0xc0   :  { %v518_v41 = vpop.f32.mrf.mxu3 }
  0xc1   :  { %v348_v43 = vpop.f32.mrf.mxu1  ;;  %v538_v53 = vadd.f32 %v518_v41, %v448_v51 }
  0xc2   :  { %v349_v57 = vadd.f32 %v348_v43, %v284_v32  ;;  %v6489_v32 = vld [vmem:[%s8557_s2 + $0x40] sm:$0xff] }
  0xc3   :  { %1124 = vmatpush.bf16.msrb.mxu3 %v6489_v32 }
  0xc6   :  { %v430_v44 = vpop.f32.mrf.mxu2 }
  0xc7   :  { %v287_v33 = vpop.f32.mrf.mxu0  ;;  %v449_v60 = vadd.f32 %v430_v44, %v349_v57 }
  0xc8   :  { %v520_v46 = vpop.f32.mrf.mxu3 }
  0xc9   :  { %v351_v47 = vpop.f32.mrf.mxu1  ;;  %v539_v0 = vadd.f32 %v520_v46, %v449_v60 }
  0xca   :  { %v352_v2 = vadd.f32 %v351_v47, %v287_v33  ;;  %v6485_v33 = vld [vmem:[%s8557_s2 + $0x20] sm:$0xff] }
  0xcb   :  { %929 = vmatpush.bf16.msrb.mxu1 %v6485_v33 }
  0xce   :  { %v433_v48 = vpop.f32.mrf.mxu2 }
  0xcf   :  { %v289_v34 = vpop.f32.mrf.mxu0  ;;  %v450_v6 = vadd.f32 %v433_v48, %v352_v2 }
  0xd0   :  { %v523_v52 = vpop.f32.mrf.mxu3 }
  0xd1   :  { %v353_v54 = vpop.f32.mrf.mxu1  ;;  %v540_v16 = vadd.f32 %v523_v52, %v450_v6 }
  0xd2   :  { %v354_v19 = vadd.f32 %v353_v54, %v289_v34 }
  0xd6   :  { %v435_v58 = vpop.f32.mrf.mxu2 }
  0xd7   :  { %v7311_v38 = vpop.f32.mrf.mxu0  ;;  %v451_v25 = vadd.f32 %v435_v58, %v354_v19 }
  0xd8   :  { %v525_v62 = vpop.f32.mrf.mxu3 }
  0xd9   :  { %v356_v3 = vpop.f32.mrf.mxu1  ;;  %v541_v37 = vadd.f32 %v525_v62, %v451_v25 }
  0xda   :  { %v357_v40 = vadd.f32 %v356_v3, %v7311_v38 }
  0xde   :  { %v438_v7 = vpop.f32.mrf.mxu2 }
  0xdf   :  { %v7313_v42 = vpop.f32.mrf.mxu0  ;;  %v452_v47 = vadd.f32 %v438_v7, %v357_v40 }
  0xe0   :  { %v528_v17 = vpop.f32.mrf.mxu3 }
  0xe1   :  { %v358_v26 = vpop.f32.mrf.mxu1  ;;  %v542_v58 = vadd.f32 %v528_v17, %v452_v47 }
  0xe6   :  { %v440_v29 = vpop.f32.mrf.mxu2 }
  0xe7   :  { %v7315_v45 = vpop.f32.mrf.mxu0 }
  0xe8   :  { %v530_v43 = vpop.f32.mrf.mxu3 }
  0xe9   :  { %v361_v54 = vpop.f32.mrf.mxu1 }
  0xee   :  { %v443_v62 = vpop.f32.mrf.mxu2 }
  0xef   :  { %v7317_v49 = vpop.f32.mrf.mxu0 }
  0xf0   :  { %v533_v10 = vpop.f32.mrf.mxu3 }
  0xf7   :  { %v608_v56 = vpop.f32.mrf.mxu0 }
  0xf8   :  { %v628_v59 = vadd.f32 %v608_v56, %v538_v53 }
  0xfa   :  { %v7322_v61 = vadd.f32 %v7319_v55, %v628_v59 }
  0xfc   :  { %v5560_v63 = vmul.f32 -1.442695, %v7322_v61 }
  0xfe   :  { %6675 = vpow2.f32 %v5560_v63 }
  0xff   :  { %v610_v1 = vpop.f32.mrf.mxu0 }
 0x100   :  { %v629_v4 = vadd.f32 %v610_v1, %v539_v0  ;;  %v359_v1 = vadd.f32 %v358_v26, %v7313_v42  ;;  %v445_v26 = vpop.f32.mrf.mxu2 }
 0x102   :  { %v7329_v8 = vadd.f32 %v7319_v55, %v629_v4  ;;  %v453_v7 = vadd.f32 %v440_v29, %v359_v1 }
 0x104   :  { %v6676_v12 = vpop.eup %6675  ;;  %v5561_v13 = vmul.f32 -1.442695, %v7329_v8  ;;  %v543_v17 = vadd.f32 %v530_v43, %v453_v7 }
 0x105   :  { %v672_v15 = vadd.f32 1.0, %v6676_v12 }
 0x106   :  { %6677 = vpow2.f32 %v5561_v13 }
 0x107   :  { %6679 = vrcp.f32 %v672_v15  ;;  %v613_v18 = vpop.f32.mrf.mxu0  ;;  %v691_v48 = vand.u32 2147483648, %v672_v15  ;;  %v689_v51 = vand.u32 2147483647, %v672_v15  ;;  %vm685_vm4 = vweird.f32 %v672_v15 }
 0x108   :  { %v630_v20 = vadd.f32 %v613_v18, %v540_v16  ;;  %v362_v16 = vadd.f32 %v361_v54, %v7315_v45 }
 0x109   :  { %v692_v59 = vor.u32 1.1754944e-38, %v691_v48  ;;  %vm690_vm6 = vcmp.eq.f32.partialorder %v689_v51, 8.507059e+37 }
 0x10a   :  { %v7357_v27 = vadd.f32 %v7319_v55, %v630_v20  ;;  %v363_v20 = vpop.f32.mrf.mxu1  ;;  %v454_v25 = vadd.f32 %v443_v62, %v362_v16 }
 0x10c   :  { %v6678_v28 = vpop.eup %6677  ;;  %v5562_v30 = vmul.f32 -1.442695, %v7357_v27 }
 0x10d   :  { %v6680_v34 = vpop.eup %6679  ;;  %v7369_v35 = vadd.f32 1.0, %v6678_v28 }
 0x10e   :  { %v681_v39 = vmul.f32 %v6680_v34, %v672_v15  ;;  %6681 = vpow2.f32 %v5562_v30  ;;  %vm686_vm3 = vweird.f32 %v6680_v34  ;;  %v364_v30 = vadd.f32 %v363_v20, %v7317_v49 }
 0x10f   :  { %6683 = vrcp.f32 %v7369_v35  ;;  %v615_v41 = vpop.f32.mrf.mxu0  ;;  %vm687_vm5 = vmor %vm685_vm4, %vm686_vm3  ;;  %v706_v9 = vand.u32 2147483648, %v7369_v35  ;;  %v704_v12 = vand.u32 2147483647, %v7369_v35  ;;  %vm700_vm9 = vweird.f32 %v7369_v35 }
 0x110   :  { %v682_v44 = vsub.f32 1.0, %v681_v39  ;;  %v631_v46 = vadd.f32 %v615_v41, %v541_v37  ;;  %v535_v37 = vpop.f32.mrf.mxu3 }
 0x111   :  { %v707_v18 = vor.u32 1.1754944e-38, %v706_v9  ;;  %vm705_vm11 = vcmp.eq.f32.partialorder %v704_v12, 8.507059e+37 }
 0x112   :  { %v683_v50 = vmul.f32 %v6680_v34, %v682_v44  ;;  %v7377_v52 = vadd.f32 %v7319_v55, %v631_v46 }
 0x114   :  { %v6682_v53 = vpop.eup %6681  ;;  %v684_v56 = vadd.f32 %v6680_v34, %v683_v50  ;;  %v5563_v38 = vmul.f32 -1.442695, %v7377_v52 }
 0x115   :  { %v6684_v57 = vpop.eup %6683  ;;  %v7380_v60 = vadd.f32 1.0, %v6682_v53 }
 0x116   :  { %v688_v63 = vsel %vm687_vm5, %v6680_v34, %v684_v56  ;;  %v696_v0 = vmul.f32 %v6684_v57, %v7369_v35  ;;  %6685 = vpow2.f32 %v5563_v38  ;;  %vm701_vm8 = vweird.f32 %v6684_v57 }
 0x117   :  { %v693_v2 = vsel %vm690_vm6, %v692_v59, %v688_v63  ;;  %6687 = vrcp.f32 %v7380_v60  ;;  %v618_v3 = vpop.f32.mrf.mxu0  ;;  %vm702_vm10 = vmor %vm700_vm9, %vm701_vm8  ;;  %v721_v31 = vand.u32 2147483648, %v7380_v60  ;;  %v719_v33 = vand.u32 2147483647, %v7380_v60 }
 0x118   :  { %v7386_v4 = vmul.f32 %v693_v2, %v7322_v61  ;;  %v697_v5 = vsub.f32 1.0, %v696_v0  ;;  %v632_v6 = vadd.f32 %v618_v3, %v542_v58  ;;  %v455_v35 = vadd.f32 %v445_v26, %v364_v30  ;;  %v6499_v0 = vld [vmem:[%s8557_s2 + $0x90] sm:$0xff] }
 0x119   :  { %vm715_vm13 = vweird.f32 %v7380_v60  ;;  %v722_v43 = vor.u32 1.1754944e-38, %v721_v31  ;;  %vm720_vm15 = vcmp.eq.f32.partialorder %v719_v33, 8.507059e+37 }
 0x11a   :  { %v698_v11 = vmul.f32 %v6684_v57, %v697_v5  ;;  %809 = vst.msk [vmem:[#allocation2 + $0x8] sm:$0xff] %vm808_vm7, %v7386_v4  ;;  %v7393_v42 = vadd.f32 %v7319_v55, %v632_v6  ;;  %v545_v54 = vadd.f32 %v535_v37, %v455_v35 }
 0x11c   :  { %v6686_v13 = vpop.eup %6685  ;;  %v699_v14 = vadd.f32 %v6684_v57, %v698_v11  ;;  %v5564_v61 = vmul.f32 -1.442695, %v7393_v42 }
 0x11d   :  { %v6688_v15 = vpop.eup %6687  ;;  %v7398_v19 = vadd.f32 1.0, %v6686_v13 }
 0x11e   :  { %v703_v21 = vsel %vm702_vm10, %v6684_v57, %v699_v14  ;;  %v711_v22 = vmul.f32 %v6688_v15, %v7380_v60  ;;  %6689 = vpow2.f32 %v5564_v61  ;;  %vm716_vm12 = vweird.f32 %v6688_v15 }
 0x11f   :  { %v708_v23 = vsel %vm705_vm11, %v707_v18, %v703_v21  ;;  %6691 = vrcp.f32 %v7398_v19  ;;  %v620_v24 = vpop.f32.mrf.mxu0  ;;  %vm717_vm14 = vmor %vm715_vm13, %vm716_vm12  ;;  %v734_v44 = vand.u32 2147483647, %v7398_v19  ;;  %v736_v46 = vand.u32 2147483648, %v7398_v19 }
 0x120   :  { %v7403_v28 = vmul.f32 %v708_v23, %v7329_v8  ;;  %v712_v45 = vsub.f32 1.0, %v711_v22  ;;  %v633_v29 = vadd.f32 %v620_v24, %v543_v17  ;;  %v544_v8 = vadd.f32 %v533_v10, %v454_v25 }
 0x121   :  { %v841_v40 = vld [vmem:[#allocation2 + $0x6] sm:$0xff]  ;;  %vm730_vm0 = vweird.f32 %v7398_v19  ;;  %vm7425_vm1 = vcmp.eq.f32.partialorder %v734_v44, 8.507059e+37  ;;  %v737_v1 = vor.u32 1.1754944e-38, %v736_v46  ;;  %v6508_v44 = vld [vmem:[%s8557_s2 + $0xd8] sm:$0xff] }
 0x122   :  { %810 = vst.msk [vmem:[#allocation2 + $0x10] sm:$0xff] %vm808_vm7, %v7403_v28  ;;  %v713_v32 = vmul.f32 %v6688_v15, %v712_v45  ;;  %v7411_v34 = vadd.f32 %v7319_v55, %v633_v29  ;;  %v817_v48 = vld [vmem:[#allocation2 + $0x5] sm:$0xff]  ;;  %v849_v57 = vpack.c.bf16 %v841_v40, %v841_v40  ;;  %v6500_v46 = vld [vmem:[%s8557_s2 + $0x98] sm:$0xff]  ;;  %1593 = vmatpush.bf16.msra.mxu3 %v6508_v44 }
 0x123   :  { %v1036_v53 = vld [vmem:[#allocation2 + $0x7] sm:$0xff]  ;;  %v825_v62 = vpack.c.bf16 %v817_v48, %v817_v48  ;;  %1357 = vmatpush.bf16.msra.mxu1 %v6500_v46 }
 0x124   :  { %v6690_v36 = vpop.eup %6689  ;;  %v714_v39 = vadd.f32 %v6688_v15, %v713_v32  ;;  %v5565_v49 = vmul.f32 -1.442695, %v7411_v34  ;;  %v1154_v63 = vld [vmem:[#allocation2 + $0x8] sm:$0xff]  ;;  %v1044_v6 = vpack.c.bf16 %v1036_v53, %v1036_v53  ;;  %v874_v17 = vunpack.c.l.b16 %v849_v57  ;;  %v6507_v57 = vld [vmem:[%s8557_s2 + $0xd0] sm:$0xff] }
 0x125   :  { %v6692_v41 = vpop.eup %6691  ;;  %v7417_v47 = vadd.f32 1.0, %v6690_v36  ;;  %v1162_v13 = vpack.c.bf16 %v1154_v63, %v1154_v63  ;;  %v959_v18 = vunpack.c.l.b16 %v825_v62 }
 0x126   :  { %v718_v50 = vsel %vm717_vm14, %v6688_v15, %v714_v39  ;;  %v726_v51 = vmul.f32 %v6692_v41, %v7398_v19  ;;  %6693 = vpow2.f32 %v5565_v49  ;;  %vm731_vm2 = vweird.f32 %v6692_v41  ;;  %1594 = vmatpush.bf16.msra.mxu3 %v6507_v57  ;;  %v6497_v57 = vld [vmem:[%s8557_s2 + $0x80] sm:$0xff] }
 0x127   :  { %v723_v56 = vsel %vm720_vm15, %v722_v43, %v718_v50  ;;  %6695 = vrcp.f32 %v7417_v47  ;;  %v623_v38 = vpop.f32.mrf.mxu0  ;;  %vm732_vm3 = vmor %vm730_vm0, %vm731_vm2  ;;  %v1069_v31 = vunpack.c.l.b16 %v1044_v6  ;;  %v1187_v32 = vunpack.c.l.b16 %v1162_v13  ;;  %1358 = vmatpush.bf16.msra.mxu1 %v6499_v0 }
 0x128   :  { %v7422_v58 = vmul.f32 %v723_v56, %v7357_v27  ;;  %v727_v59 = vsub.f32 1.0, %v726_v51  ;;  %v634_v60 = vadd.f32 %v623_v38, %v544_v8  ;;  %v751_v35 = vand.u32 2147483648, %v7417_v47  ;;  %v6503_v38 = vld [vmem:[%s8557_s2 + $0xb0] sm:$0xff] }
 0x129   :  { %v842_v2 = vld [vmem:[#allocation2 + $0xe] sm:$0xff]  ;;  %v749_v40 = vand.u32 2147483647, %v7417_v47  ;;  %vm745_vm5 = vweird.f32 %v7417_v47 }
 0x12a   :  { %v818_v3 = vld [vmem:[#allocation2 + $0xd] sm:$0xff]  ;;  %811 = vst.msk [vmem:[#allocation2 + $0x28] sm:$0xff] %vm808_vm7, %v7422_v58  ;;  %v728_v27 = vmul.f32 %v6692_v41, %v727_v59  ;;  %v7432_v7 = vadd.f32 %v7319_v55, %v634_v60  ;;  %v850_v9 = vpack.c.bf16 %v842_v2, %v842_v2 }
 0x12b   :  { %v1037_v5 = vld [vmem:[#allocation2 + $0xf] sm:$0xff]  ;;  %v826_v11 = vpack.c.bf16 %v818_v3, %v818_v3  ;;  %vm750_vm8 = vcmp.eq.f32.partialorder %v749_v40, 8.507059e+37 }
 0x12c   :  { %v1155_v10 = vld [vmem:[#allocation2 + $0x10] sm:$0xff]  ;;  %v1045_v12 = vpack.c.bf16 %v1037_v5, %v1037_v5  ;;  %v6694_v61 = vpop.eup %6693  ;;  %v729_v15 = vadd.f32 %v6692_v41, %v728_v27  ;;  %v5566_v16 = vmul.f32 -1.442695, %v7432_v7  ;;  %v875_v22 = vunpack.c.l.b16 %v850_v9  ;;  %v6502_v9 = vld [vmem:[%s8557_s2 + $0xa8] sm:$0xff] }
 0x12d   :  { %v1163_v14 = vpack.c.bf16 %v1155_v10, %v1155_v10  ;;  %v6696_v20 = vpop.eup %6695  ;;  %v7437_v21 = vadd.f32 1.0, %v6694_v61  ;;  %v960_v23 = vunpack.c.l.b16 %v826_v11  ;;  %v6506_v10 = vld [vmem:[%s8557_s2 + $0xc8] sm:$0xff] }
 0x12e   :  { %v1070_v24 = vunpack.c.l.b16 %v1045_v12  ;;  %v733_v25 = vsel %vm732_vm3, %v6692_v41, %v729_v15  ;;  %v741_v26 = vmul.f32 %v6696_v20, %v7417_v47  ;;  %6697 = vpow2.f32 %v5566_v16  ;;  %1595 = vmatpush.bf16.msra.mxu3 %v6506_v10 }
 0x12f   :  { %v1188_v45 = vunpack.c.l.b16 %v1163_v14  ;;  %v738_v29 = vsel %vm7425_vm1, %v737_v1, %v733_v25  ;;  %6699 = vrcp.f32 %v7437_v21  ;;  %v625_v30 = vpop.f32.mrf.mxu0  ;;  %vm746_vm4 = vweird.f32 %v6696_v20 }
 0x130   :  { %v7444_v19 = vmul.f32 %v738_v29, %v7377_v52  ;;  %v742_v33 = vsub.f32 1.0, %v741_v26  ;;  %v635_v36 = vadd.f32 %v625_v30, %v545_v54  ;;  %v882_v8 = vpack.c.b16 %v875_v22, %v874_v17  ;;  %v6504_v52 = vld [vmem:[%s8557_s2 + $0xb8] sm:$0xff]  ;;  %vm7466_vm6 = vmor %vm745_vm5, %vm746_vm4 }
 0x131   :  { %v967_v37 = vpack.c.b16 %v960_v23, %v959_v18  ;;  %v1077_v39 = vpack.c.b16 %v1070_v24, %v1069_v31  ;;  %v1195_v43 = vpack.c.b16 %v1188_v45, %v1187_v32  ;;  %v752_v47 = vor.u32 1.1754944e-38, %v751_v35  ;;  %1475 = vmatpush.bf16.msra.mxu2 %v6504_v52  ;;  %v843_v56 = vld [vmem:[#allocation2 + $0x26] sm:$0xff] }
 0x132   :  { %812 = vst.msk [vmem:[#allocation2 + $0x30] sm:$0xff] %vm808_vm7, %v7444_v19  ;;  %v743_v49 = vmul.f32 %v6696_v20, %v742_v33  ;;  %v7451_v41 = vadd.f32 %v7319_v55, %v635_v36  ;;  %5592 = vmatmul.msk.bf16.vlgmr.msrb.gmra.mxu1 %vm808_vm7, %v882_v8  ;;  %v819_v62 = vld [vmem:[#allocation2 + $0x25] sm:$0xff]  ;;  %v764_v2 = vand.u32 2147483647, %v7437_v21  ;;  %v766_v6 = vand.u32 2147483648, %v7437_v21 }
 0x133   :  { %5612 = vmatmul.msk.bf16.vlgmr.msrb.gmra.mxu2 %vm808_vm7, %v967_v37  ;;  %5640 = vmatmul.msk.bf16.vlgmr.msrb.gmra.mxu3 %vm808_vm7, %v1077_v39  ;;  %v1038_v63 = vld [vmem:[#allocation2 + $0x27] sm:$0xff]  ;;  %vm760_vm9 = vweird.f32 %v7437_v21  ;;  %v851_v12 = vpack.c.bf16 %v843_v56, %v843_v56  ;;  %v827_v14 = vpack.c.bf16 %v819_v62, %v819_v62 }
 0x134   :  { %v6698_v55 = vpop.eup %6697  ;;  %v744_v48 = vadd.f32 %v6696_v20, %v743_v49  ;;  %v5567_v51 = vmul.f32 -1.442695, %v7451_v41  ;;  %5668 = vmatmul.msk.bf16.vlgmr.msra.gmra.mxu0 %vm808_vm7, %v1195_v43  ;;  %v1156_v27 = vld [vmem:[#allocation2 + $0x28] sm:$0xff]  ;;  %v1046_v61 = vpack.c.bf16 %v1038_v63, %v1038_v63  ;;  %vm7510_vm11 = vcmp.eq.f32.partialorder %v764_v2, 8.507059e+37 }
 0x135   :  { %v7473_v53 = vpop.eup %6699  ;;  %v7475_v54 = vadd.f32 1.0, %v6698_v55  ;;  %1476 = vmatpush.bf16.msra.mxu2 %v6503_v38  ;;  %v1164_v24 = vpack.c.bf16 %v1156_v27, %v1156_v27  ;;  %v767_v29 = vor.u32 1.1754944e-38, %v766_v6  ;;  %v876_v35 = vunpack.c.l.b16 %v851_v12  ;;  %v6505_v38 = vld [vmem:[%s8557_s2 + $0xc0] sm:$0xff] }
 0x136   :  { %v748_v59 = vsel %vm7466_vm6, %v6696_v20, %v744_v48  ;;  %v756_v60 = vmul.f32 %v7473_v53, %v7437_v21  ;;  %6701 = vpow2.f32 %v5567_v51  ;;  %vm761_vm10 = vweird.f32 %v7473_v53  ;;  %v6498_v20 = vld [vmem:[%s8557_s2 + $0x88] sm:$0xff]  ;;  %1596 = vmatpush.bf16.msra.mxu3 %v6505_v38 }
 0x137   :  { %v753_v1 = vsel %vm750_vm8, %v752_v47, %v748_v59  ;;  %6703 = vrcp.f32 %v7475_v54  ;;  %vm762_vm12 = vmor %vm760_vm9, %vm761_vm10  ;;  %v961_v49 = vunpack.c.l.b16 %v827_v14  ;;  %v1071_v40 = vunpack.c.l.b16 %v1046_v61  ;;  %1359 = vmatpush.bf16.msra.mxu1 %v6498_v20 }
 0x138   :  { %v7493_v3 = vmul.f32 %v753_v1, %v7393_v42  ;;  %v757_v5 = vsub.f32 1.0, %v756_v60  ;;  %v1189_v52 = vunpack.c.l.b16 %v1164_v24  ;;  %v781_v48 = vand.u32 2147483648, %v7475_v54 }
 0x139   :  { %v844_v11 = vld [vmem:[#allocation2 + $0x2e] sm:$0xff]  ;;  %1477 = vmatpush.bf16.msra.mxu2 %v6502_v9  ;;  %v779_v47 = vand.u32 2147483647, %v7475_v54  ;;  %vm775_vm14 = vweird.f32 %v7475_v54  ;;  %vm1798_vm10 = vcmask 261120  }
 0x13a   :  { %v820_v13 = vld [vmem:[#allocation2 + $0x2d] sm:$0xff]  ;;  %813 = vst.msk [vmem:[#allocation2 + $0x48] sm:$0xff] %vm808_vm7, %v7493_v3  ;;  %v758_v15 = vmul.f32 %v7473_v53, %v757_v5  ;;  %v852_v16 = vpack.c.bf16 %v844_v11, %v844_v11  ;;  %v782_v60 = vor.u32 1.1754944e-38, %v781_v48 }
 0x13b   :  { %v1039_v42 = vld [vmem:[#allocation2 + $0x2f] sm:$0xff]  ;;  %v828_v17 = vpack.c.bf16 %v820_v13, %v820_v13  ;;  %vm780_vm0 = vcmp.eq.f32.partialorder %v779_v47, 8.507059e+37  ;;  %1360 = vmatpush.bf16.msra.mxu1 %v6497_v57 }
 0x13c   :  { %v1157_v18 = vld [vmem:[#allocation2 + $0x30] sm:$0xff]  ;;  %v1047_v23 = vpack.c.bf16 %v1039_v42, %v1039_v42  ;;  %v6702_v26 = vpop.eup %6701  ;;  %v759_v45 = vadd.f32 %v7473_v53, %v758_v15  ;;  %v877_v30 = vunpack.c.l.b16 %v852_v16 }
 0x13d   :  { %v1165_v25 = vpack.c.bf16 %v1157_v18, %v1157_v18  ;;  %v962_v31 = vunpack.c.l.b16 %v828_v17  ;;  %v6704_v32 = vpop.eup %6703  ;;  %v7519_v33 = vadd.f32 1.0, %v6702_v26 }
 0x13e   :  { %v1072_v36 = vunpack.c.l.b16 %v1047_v23  ;;  %v763_v37 = vsel %vm762_vm12, %v7473_v53, %v759_v45  ;;  %v771_v39 = vmul.f32 %v6704_v32, %v7475_v54  ;;  %v883_v21 = vpack.c.b16 %v877_v30, %v876_v35 }
 0x13f   :  { %v1190_v8 = vunpack.c.l.b16 %v1165_v25  ;;  %v768_v43 = vsel %vm7510_vm11, %v767_v29, %v763_v37  ;;  %6705 = vrcp.f32 %v7519_v33  ;;  %v968_v55 = vpack.c.b16 %v962_v31, %v961_v49 }
 0x140   :  { %v7527_v44 = vmul.f32 %v768_v43, %v7411_v34  ;;  %v772_v46 = vsub.f32 1.0, %v771_v39  ;;  %v1078_v50 = vpack.c.b16 %v1072_v36, %v1071_v40  ;;  %vm776_vm13 = vweird.f32 %v6704_v32  ;;  %v6501_v34 = vld [vmem:[%s8557_s2 + $0xa0] sm:$0xff] }
 0x141   :  { %v1196_v51 = vpack.c.b16 %v1190_v8, %v1189_v52  ;;  %vm777_vm15 = vmor %vm775_vm14, %vm776_vm13  ;;  %v845_v54 = vld [vmem:[#allocation2 + $0x46] sm:$0xff]  ;;  %1478 = vmatpush.bf16.msra.mxu2 %v6501_v34  ;;  %v794_v6 = vand.u32 2147483647, %v7519_v33  ;;  %v796_v10 = vand.u32 2147483648, %v7519_v33  ;;  %vm790_vm2 = vweird.f32 %v7519_v33 }
 0x142   :  { %814 = vst.msk [vmem:[#allocation2 + $0x50] sm:$0xff] %vm808_vm7, %v7527_v44  ;;  %v773_v53 = vmul.f32 %v6704_v32, %v772_v46  ;;  %5593 = vmatmul.msk.bf16.gmra.mxu1 %vm808_vm7, %v883_v21  ;;  %v821_v0 = vld [vmem:[#allocation2 + $0x45] sm:$0xff]  ;;  %v853_v11 = vpack.c.bf16 %v845_v54, %v845_v54 }
 0x143   :  { %5613 = vmatmul.msk.bf16.gmra.mxu2 %vm808_vm7, %v968_v55  ;;  %5641 = vmatmul.msk.bf16.gmra.mxu3 %vm808_vm7, %v1078_v50  ;;  %v1040_v1 = vld [vmem:[#allocation2 + $0x47] sm:$0xff]  ;;  %v829_v14 = vpack.c.bf16 %v821_v0, %v821_v0  ;;  %v797_v45 = vor.u32 1.1754944e-38, %v796_v10  ;;  %vm795_vm4 = vcmp.eq.f32.partialorder %v794_v6, 8.507059e+37 }
 0x144   :  { %v774_v56 = vadd.f32 %v6704_v32, %v773_v53  ;;  %5669 = vmatmul.msk.bf16.gmra.mxu0 %vm808_vm7, %v1196_v51  ;;  %v1158_v2 = vld [vmem:[#allocation2 + $0x48] sm:$0xff]  ;;  %v1048_v61 = vpack.c.bf16 %v1040_v1, %v1040_v1  ;;  %v878_v29 = vunpack.c.l.b16 %v853_v11 }
 0x145   :  { %v6706_v59 = vpop.eup %6705  ;;  %v1166_v15 = vpack.c.bf16 %v1158_v2, %v1158_v2  ;;  %v963_v30 = vunpack.c.l.b16 %v829_v14  ;;  %v1390_v14 = vld [vmem:[#allocation2 + $0xa] sm:$0xff] }
 0x146   :  { %v778_v62 = vsel %vm777_vm15, %v6704_v32, %v774_v56  ;;  %v786_v63 = vmul.f32 %v6706_v59, %v7519_v33  ;;  %vm791_vm1 = vweird.f32 %v6706_v59  ;;  %v1073_v35 = vunpack.c.l.b16 %v1048_v61  ;;  %v1508_v61 = vld [vmem:[#allocation2 + $0xb] sm:$0xff] }
 0x147   :  { %v783_v5 = vsel %vm780_vm0, %v782_v60, %v778_v62  ;;  %vm792_vm3 = vmor %vm790_vm2, %vm791_vm1  ;;  %v1191_v36 = vunpack.c.l.b16 %v1166_v15  ;;  %v1509_v15 = vld [vmem:[#allocation2 + $0x13] sm:$0xff] }
 0x148   :  { %v7550_v27 = vmul.f32 %v783_v5, %v7432_v7  ;;  %v787_v9 = vsub.f32 1.0, %v786_v63 }
 0x149   :  { %v846_v12 = vld [vmem:[#allocation2 + $0x4e] sm:$0xff] }
 0x14a   :  { %v822_v13 = vld [vmem:[#allocation2 + $0x4d] sm:$0xff]  ;;  %815 = vst.msk [vmem:[#allocation2 + $0x68] sm:$0xff] %vm808_vm7, %v7550_v27  ;;  %v788_v16 = vmul.f32 %v6706_v59, %v787_v9  ;;  %v854_v17 = vpack.c.bf16 %v846_v12, %v846_v12 }
 0x14b   :  { %v1041_v42 = vld [vmem:[#allocation2 + $0x4f] sm:$0xff]  ;;  %v830_v18 = vpack.c.bf16 %v822_v13, %v822_v13 }
 0x14c   :  { %v1049_v20 = vpack.c.bf16 %v1041_v42, %v1041_v42  ;;  %v1159_v7 = vld [vmem:[#allocation2 + $0x50] sm:$0xff]  ;;  %v789_v23 = vadd.f32 %v6706_v59, %v788_v16  ;;  %v879_v24 = vunpack.c.l.b16 %v854_v17 }
 0x14d   :  { %v1167_v22 = vpack.c.bf16 %v1159_v7, %v1159_v7  ;;  %v964_v25 = vunpack.c.l.b16 %v830_v18  ;;  %v1272_v12 = vld [vmem:[#allocation2 + $0x9] sm:$0xff]  ;;  %v1273_v13 = vld [vmem:[#allocation2 + $0x11] sm:$0xff]  ;;  %v1398_v18 = vpack.c.bf16 %v1390_v14, %v1390_v14  ;;  %v1516_v7 = vpack.c.bf16 %v1508_v61, %v1508_v61 }
 0x14e   :  { %v1074_v26 = vunpack.c.l.b16 %v1049_v20  ;;  %v793_v32 = vsel %vm792_vm3, %v6706_v59, %v789_v23  ;;  %v884_v37 = vpack.c.b16 %v879_v24, %v878_v29  ;;  %v1391_v42 = vld [vmem:[#allocation2 + $0x12] sm:$0xff]  ;;  %v1280_v16 = vpack.c.bf16 %v1272_v12, %v1272_v12 }
 0x14f   :  { %v1192_v31 = vunpack.c.l.b16 %v1167_v22  ;;  %v798_v8 = vsel %vm795_vm4, %v797_v45, %v793_v32  ;;  %v969_v39 = vpack.c.b16 %v964_v25, %v963_v30  ;;  %v1281_v17 = vpack.c.bf16 %v1273_v13, %v1273_v13 }
 0x150   :  { %v7558_v33 = vmul.f32 %v798_v8, %v7451_v41  ;;  %v1079_v49 = vpack.c.b16 %v1074_v26, %v1073_v35  ;;  %v1399_v20 = vpack.c.bf16 %v1391_v42, %v1391_v42  ;;  %v1517_v22 = vpack.c.bf16 %v1509_v15, %v1509_v15  ;;  %v1274_v35 = vld [vmem:[#allocation2 + $0x29] sm:$0xff] }
 0x151   :  { %v1197_v40 = vpack.c.b16 %v1192_v31, %v1191_v36  ;;  %v847_v43 = vld [vmem:[#allocation2 + $0x66] sm:$0xff]  ;;  %v1305_v23 = vunpack.c.l.b16 %v1280_v16  ;;  %v1306_v24 = vunpack.c.l.b16 %v1281_v17  ;;  %v1423_v25 = vunpack.c.l.b16 %v1398_v18  ;;  %v1275_v36 = vld [vmem:[#allocation2 + $0x31] sm:$0xff] }
 0x152   :  { %816 = vst.msk [vmem:[#allocation2 + $0x70] sm:$0xff] %vm808_vm7, %v7558_v33  ;;  %5594 = vmatmul.msk.bf16.gmra.mxu1 %vm808_vm7, %v884_v37  ;;  %v823_v21 = vld [vmem:[#allocation2 + $0x65] sm:$0xff]  ;;  %v855_v41 = vpack.c.bf16 %v847_v43, %v847_v43  ;;  %v1424_v26 = vunpack.c.l.b16 %v1399_v20  ;;  %v1541_v45 = vunpack.c.l.b16 %v1516_v7  ;;  %v1542_v29 = vunpack.c.l.b16 %v1517_v22  ;;  %v1393_v37 = vld [vmem:[#allocation2 + $0x32] sm:$0xff] }
 0x153   :  { %5614 = vmatmul.msk.bf16.gmra.mxu2 %vm808_vm7, %v969_v39  ;;  %5642 = vmatmul.msk.bf16.gmra.mxu3 %vm808_vm7, %v1079_v49  ;;  %v1042_v52 = vld [vmem:[#allocation2 + $0x67] sm:$0xff]  ;;  %v831_v50 = vpack.c.bf16 %v823_v21, %v823_v21  ;;  %v1313_v30 = vpack.c.b16 %v1306_v24, %v1305_v23  ;;  %v1511_v49 = vld [vmem:[#allocation2 + $0x33] sm:$0xff]  ;;  %v1283_v43 = vpack.c.bf16 %v1275_v36, %v1275_v36 }
 0x154   :  { %5670 = vmatmul.msk.bf16.gmra.mxu0 %vm808_vm7, %v1197_v40  ;;  %v1160_v46 = vld [vmem:[#allocation2 + $0x68] sm:$0xff]  ;;  %v1050_v53 = vpack.c.bf16 %v1042_v52, %v1042_v52  ;;  %v880_v63 = vunpack.c.l.b16 %v855_v41  ;;  %v1431_v31 = vpack.c.b16 %v1424_v26, %v1423_v25  ;;  %v1549_v32 = vpack.c.b16 %v1542_v29, %v1541_v45 }
 0x155   :  { %v1168_v57 = vpack.c.bf16 %v1160_v46, %v1160_v46  ;;  %v965_v0 = vunpack.c.l.b16 %v831_v50  ;;  %v1392_v8 = vld [vmem:[#allocation2 + $0x2a] sm:$0xff]  ;;  %v1282_v40 = vpack.c.bf16 %v1274_v35, %v1274_v35  ;;  %v1401_v52 = vpack.c.bf16 %v1393_v37, %v1393_v37 }
 0x156   :  { %v1075_v2 = vunpack.c.l.b16 %v1050_v53  ;;  %v1510_v39 = vld [vmem:[#allocation2 + $0x2b] sm:$0xff]  ;;  %v1400_v21 = vpack.c.bf16 %v1392_v8, %v1392_v8 }
 0x157   :  { %v1193_v5 = vunpack.c.l.b16 %v1168_v57  ;;  %v1518_v46 = vpack.c.bf16 %v1510_v39, %v1510_v39  ;;  %v1307_v41 = vunpack.c.l.b16 %v1282_v40  ;;  %v1276_v57 = vld [vmem:[#allocation2 + $0x49] sm:$0xff] }
 0x158   :  { %v1425_v50 = vunpack.c.l.b16 %v1400_v21 }
 0x159   :  { %v848_v55 = vld [vmem:[#allocation2 + $0x6e] sm:$0xff]  ;;  %v1543_v53 = vunpack.c.l.b16 %v1518_v46 }
 0x15a   :  { %v824_v48 = vld [vmem:[#allocation2 + $0x6d] sm:$0xff]  ;;  %v856_v47 = vpack.c.bf16 %v848_v55, %v848_v55  ;;  %v1519_v55 = vpack.c.bf16 %v1511_v49, %v1511_v49 }
 0x15b   :  { %v1043_v51 = vld [vmem:[#allocation2 + $0x6f] sm:$0xff]  ;;  %v832_v56 = vpack.c.bf16 %v824_v48, %v824_v48  ;;  %v1308_v48 = vunpack.c.l.b16 %v1283_v43 }
 0x15c   :  { %v1051_v34 = vpack.c.bf16 %v1043_v51, %v1043_v51  ;;  %v1161_v38 = vld [vmem:[#allocation2 + $0x70] sm:$0xff]  ;;  %v881_v60 = vunpack.c.l.b16 %v856_v47  ;;  %v1426_v51 = vunpack.c.l.b16 %v1401_v52  ;;  %v1544_v47 = vunpack.c.l.b16 %v1519_v55 }
 0x15d   :  { %v1169_v59 = vpack.c.bf16 %v1161_v38, %v1161_v38  ;;  %v966_v54 = vunpack.c.l.b16 %v832_v56  ;;  %v1314_v56 = vpack.c.b16 %v1308_v48, %v1307_v41  ;;  %v1278_v17 = vld [vmem:[#allocation2 + $0x69] sm:$0xff]  ;;  %v1279_v18 = vld [vmem:[#allocation2 + $0x71] sm:$0xff] }
 0x15e   :  { %v1076_v62 = vunpack.c.l.b16 %v1051_v34  ;;  %v885_v6 = vpack.c.b16 %v881_v60, %v880_v63  ;;  %v1432_v34 = vpack.c.b16 %v1426_v51, %v1425_v50  ;;  %v1550_v38 = vpack.c.b16 %v1544_v47, %v1543_v53  ;;  %v1394_v60 = vld [vmem:[#allocation2 + $0x4a] sm:$0xff]  ;;  %v1513_v63 = vld [vmem:[#allocation2 + $0x53] sm:$0xff] }
 0x15f   :  { %v1194_v1 = vunpack.c.l.b16 %v1169_v59  ;;  %v970_v9 = vpack.c.b16 %v966_v54, %v965_v0  ;;  %v1277_v59 = vld [vmem:[#allocation2 + $0x51] sm:$0xff]  ;;  %v1284_v0 = vpack.c.bf16 %v1276_v57, %v1276_v57  ;;  %v1286_v24 = vpack.c.bf16 %v1278_v17, %v1278_v17 }
 0x160   :  { %v1080_v10 = vpack.c.b16 %v1076_v62, %v1075_v2  ;;  %v1395_v54 = vld [vmem:[#allocation2 + $0x52] sm:$0xff]  ;;  %v1402_v2 = vpack.c.bf16 %v1394_v60, %v1394_v60  ;;  %v1396_v20 = vld [vmem:[#allocation2 + $0x6a] sm:$0xff]  ;;  %v1287_v25 = vpack.c.bf16 %v1279_v18, %v1279_v18 }
 0x161   :  { %v1198_v11 = vpack.c.b16 %v1194_v1, %v1193_v5  ;;  %v1512_v62 = vld [vmem:[#allocation2 + $0x4b] sm:$0xff]  ;;  %v1285_v1 = vpack.c.bf16 %v1277_v59, %v1277_v59  ;;  %v1403_v5 = vpack.c.bf16 %v1395_v54, %v1395_v54  ;;  %v1515_v23 = vld [vmem:[#allocation2 + $0x73] sm:$0xff]  ;;  %v1404_v26 = vpack.c.bf16 %v1396_v20, %v1396_v20  ;;  %v6510_v59 = vld [vmem:[#allocation5 + $0x8] sm:$0xff] }
 0x162   :  { %5595 = vmatmul.msk.bf16.gmra.mxu1 %vm808_vm7, %v885_v6  ;;  %v1520_v6 = vpack.c.bf16 %v1512_v62, %v1512_v62  ;;  %v1427_v12 = vunpack.c.l.b16 %v1402_v2  ;;  %v1397_v7 = vld [vmem:[#allocation2 + $0x72] sm:$0xff] }
 0x163   :  { %5615 = vmatmul.msk.bf16.gmra.mxu2 %vm808_vm7, %v970_v9  ;;  %5643 = vmatmul.msk.bf16.gmra.mxu3 %vm808_vm7, %v1080_v10  ;;  %v1521_v9 = vpack.c.bf16 %v1513_v63, %v1513_v63  ;;  %v1309_v10 = vunpack.c.l.b16 %v1284_v0  ;;  %v1428_v13 = vunpack.c.l.b16 %v1403_v5  ;;  %v1514_v22 = vld [vmem:[#allocation2 + $0x6b] sm:$0xff]  ;;  %v1405_v45 = vpack.c.bf16 %v1397_v7, %v1397_v7 }
 0x164   :  { %5671 = vmatmul.msk.bf16.gmra.mxu0 %vm808_vm7, %v1198_v11  ;;  %v1310_v11 = vunpack.c.l.b16 %v1285_v1  ;;  %v1545_v14 = vunpack.c.l.b16 %v1520_v6  ;;  %v1522_v29 = vpack.c.bf16 %v1514_v22, %v1514_v22  ;;  %v1429_v35 = vunpack.c.l.b16 %v1404_v26  ;;  %v6512_v57 = vld [vmem:[#allocation5 + $0x18] sm:$0xff]  ;;  %1971 = vmatpush.bf16.msrb.mxu1 %v6510_v59 }
 0x165   :  { %v1546_v42 = vunpack.c.l.b16 %v1521_v9  ;;  %v1433_v15 = vpack.c.b16 %v1428_v13, %v1427_v12  ;;  %v1430_v36 = vunpack.c.l.b16 %v1405_v45  ;;  %1898 = vmatpush.bf16.msrb.mxu0 %v6512_v57 }
 0x166   :  { %v1315_v61 = vpack.c.b16 %v1310_v11, %v1309_v10  ;;  %v1547_v8 = vunpack.c.l.b16 %v1522_v29 }
 0x167   :  { %v1551_v16 = vpack.c.b16 %v1546_v42, %v1545_v14  ;;  %v1434_v49 = vpack.c.b16 %v1430_v36, %v1429_v35 }
 0x172   :  { %5696 = vmatmul.msk.bf16.vlgmr.msra.gmra.mxu1 %vm808_vm7, %v1313_v30  ;;  %v1523_v30 = vpack.c.bf16 %v1515_v23, %v1515_v23  ;;  %v7604_v23 = vld [vmem:[#allocation14 + $0x1] ss:$0 sm:$0xff] }
 0x173   :  { %5724 = vmatmul.msk.bf16.vlgmr.msra.gmra.mxu2 %vm808_vm7, %v1431_v31  ;;  %5752 = vmatmul.msk.bf16.vlgmr.msra.gmra.mxu3 %vm808_vm7, %v1549_v32  ;;  %v1311_v31 = vunpack.c.l.b16 %v1286_v24  ;;  %v1312_v32 = vunpack.c.l.b16 %v1287_v25 }
 0x174   :  { %v1548_v37 = vunpack.c.l.b16 %v1523_v30 }
 0x175   :  { %v1316_v39 = vpack.c.b16 %v1312_v32, %v1311_v31 }
 0x176   :  { %v1552_v40 = vpack.c.b16 %v1548_v37, %v1547_v8 }
 0x182   :  { %5697 = vmatmul.msk.bf16.gmra.mxu1 %vm808_vm7, %v1314_v56 }
 0x183   :  { %5725 = vmatmul.msk.bf16.gmra.mxu2 %vm808_vm7, %v1432_v34  ;;  %5753 = vmatmul.msk.bf16.gmra.mxu3 %vm808_vm7, %v1550_v38  ;;  %v6514_v38 = vld [vmem:[#allocation5 + $0x28] sm:$0xff] }
 0x184   :  { %2065 = vmatpush.bf16.msrb.mxu2 %v6514_v38 }
 0x192   :  { %5698 = vmatmul.msk.bf16.gmra.mxu1 %vm808_vm7, %v1315_v61 }
 0x193   :  { %5726 = vmatmul.msk.bf16.gmra.mxu2 %vm808_vm7, %v1433_v15  ;;  %5754 = vmatmul.msk.bf16.gmra.mxu3 %vm808_vm7, %v1551_v16 }
 0x1a2   :  { %5699 = vmatmul.msk.bf16.gmra.mxu1 %vm808_vm7, %v1316_v39 }
 0x1a3   :  { %5727 = vmatmul.msk.bf16.gmra.mxu2 %vm808_vm7, %v1434_v49  ;;  %5755 = vmatmul.msk.bf16.gmra.mxu3 %vm808_vm7, %v1552_v40 }
 0x1af   :  { %v931_v43 = vpop.f32.mrf.mxu1 }
 0x1b1   :  { %v1244_v63 = vpop.f32.mrf.mxu0 }
 0x1b6   :  { %v1016_v21 = vpop.f32.mrf.mxu2  ;;  %v1126_v52 = vpop.f32.mrf.mxu3 }
 0x1b7   :  { %v933_v46 = vpop.f32.mrf.mxu1  ;;  %v1017_v11 = vadd.f32 %v1016_v21, %v931_v43 }
 0x1b9   :  { %v1246_v6 = vpop.f32.mrf.mxu0  ;;  %v1146_v13 = vadd.f32 %v1126_v52, %v1017_v11 }
 0x1bb   :  { %v1264_v16 = vadd.f32 %v1244_v63, %v1146_v13 }
 0x1be   :  { %v1018_v55 = vpop.f32.mrf.mxu2  ;;  %v1128_v41 = vpop.f32.mrf.mxu3 }
 0x1bf   :  { %v936_v48 = vpop.f32.mrf.mxu1  ;;  %v1019_v15 = vadd.f32 %v1018_v55, %v933_v46 }
 0x1c1   :  { %v1249_v61 = vpop.f32.mrf.mxu0  ;;  %v1147_v20 = vadd.f32 %v1128_v41, %v1019_v15 }
 0x1c3   :  { %v1265_v30 = vadd.f32 %v1246_v6, %v1147_v20 }
 0x1c6   :  { %v1021_v50 = vpop.f32.mrf.mxu2  ;;  %v1131_v51 = vpop.f32.mrf.mxu3 }
 0x1c7   :  { %v938_v53 = vpop.f32.mrf.mxu1  ;;  %v1022_v26 = vadd.f32 %v1021_v50, %v936_v48 }
 0x1c9   :  { %v1251_v45 = vpop.f32.mrf.mxu0  ;;  %v1148_v36 = vadd.f32 %v1131_v51, %v1022_v26  ;;  %v6509_v26 = vld [vmem:[#allocation5] sm:$0xff] }
 0x1ca   :  { %1972 = vmatpush.bf16.msrb.mxu1 %v6509_v26 }
 0x1cb   :  { %v1266_v21 = vadd.f32 %v1249_v61, %v1148_v36 }
 0x1ce   :  { %v1023_v47 = vpop.f32.mrf.mxu2  ;;  %v1133_v56 = vpop.f32.mrf.mxu3 }
 0x1cf   :  { %v7582_v34 = vpop.f32.mrf.mxu1  ;;  %v1024_v40 = vadd.f32 %v1023_v47, %v938_v53 }
 0x1d1   :  { %v1254_v46 = vpop.f32.mrf.mxu0  ;;  %v1149_v38 = vadd.f32 %v1133_v56, %v1024_v40 }
 0x1d3   :  { %v1267_v47 = vadd.f32 %v1251_v45, %v1149_v38 }
 0x1d6   :  { %v1026_v60 = vpop.f32.mrf.mxu2  ;;  %v7584_v54 = vpop.f32.mrf.mxu3 }
 0x1d7   :  { %v7586_v62 = vpop.f32.mrf.mxu1  ;;  %v1027_v11 = vadd.f32 %v1026_v60, %v7582_v34  ;;  %v6513_v60 = vld [vmem:[#allocation5 + $0x20] sm:$0xff] }
 0x1d8   :  { %2066 = vmatpush.bf16.msrb.mxu2 %v6513_v60  ;;  %v6515_v60 = vld [vmem:[#allocation5 + $0x30] sm:$0xff] }
 0x1de   :  { %v7588_v0 = vpop.f32.mrf.mxu2  ;;  %v7590_v1 = vpop.f32.mrf.mxu3 }
 0x1df   :  { %v7592_v2 = vpop.f32.mrf.mxu1 }
 0x1e6   :  { %v7594_v5 = vpop.f32.mrf.mxu2  ;;  %v7596_v9 = vpop.f32.mrf.mxu3 }
 0x1e7   :  { %v7598_v10 = vpop.f32.mrf.mxu1 }
 0x1ee   :  { %v7600_v12 = vpop.f32.mrf.mxu2  ;;  %v7602_v14 = vpop.f32.mrf.mxu3 }
 0x1ef   :  { %v1362_v42 = vpop.f32.mrf.mxu1 }
 0x1f0   :  { %v1382_v17 = vadd.f32 %v1362_v42, %v1264_v16  ;;  %v7621_v16 = vpop.f32.mrf.mxu0 }
 0x1f6   :  { %v1480_v18 = vpop.f32.mrf.mxu2  ;;  %v1598_v22 = vpop.f32.mrf.mxu3 }
 0x1f7   :  { %v1500_v7 = vadd.f32 %v1480_v18, %v1382_v17  ;;  %v1364_v24 = vpop.f32.mrf.mxu1 }
 0x1f8   :  { %v1383_v32 = vadd.f32 %v1364_v24, %v1265_v30  ;;  %v1259_v38 = vpop.f32.mrf.mxu0 }
 0x1f9   :  { %v1618_v25 = vadd.f32 %v1598_v22, %v1500_v7  ;;  %v1150_v22 = vadd.f32 %v7584_v54, %v1027_v11 }
 0x1fb   :  { %v7607_v29 = vadd.f32 %v7604_v23, %v1618_v25  ;;  %v6511_v25 = vld [vmem:[#allocation5 + $0x10] sm:$0xff] }
 0x1fc   :  { %1899 = vmatpush.bf16.msrb.mxu0 %v6511_v25 }
 0x1fd   :  { %v5756_v31 = vmul.f32 -1.442695, %v7607_v29 }
 0x1fe   :  { %v1482_v35 = vpop.f32.mrf.mxu2  ;;  %v1600_v37 = vpop.f32.mrf.mxu3 }
 0x1ff   :  { %6707 = vpow2.f32 %v5756_v31  ;;  %v1501_v8 = vadd.f32 %v1482_v35, %v1383_v32  ;;  %v1367_v39 = vpop.f32.mrf.mxu1 }
 0x200   :  { %v1384_v41 = vadd.f32 %v1367_v39, %v1266_v21  ;;  %v1029_v39 = vadd.f32 %v7588_v0, %v7586_v62 }
 0x201   :  { %v1619_v49 = vadd.f32 %v1600_v37, %v1501_v8  ;;  %v1268_v8 = vadd.f32 %v1254_v46, %v1150_v22 }
 0x203   :  { %v7611_v43 = vadd.f32 %v7604_v23, %v1619_v49 }
 0x205   :  { %v6708_v52 = vpop.eup %6707  ;;  %v5757_v55 = vmul.f32 -1.442695, %v7611_v43 }
 0x206   :  { %v1662_v48 = vadd.f32 1.0, %v6708_v52  ;;  %v1485_v50 = vpop.f32.mrf.mxu2  ;;  %v1603_v57 = vpop.f32.mrf.mxu3 }
 0x207   :  { %6709 = vpow2.f32 %v5757_v55  ;;  %v1502_v51 = vadd.f32 %v1485_v50, %v1384_v41  ;;  %v1369_v59 = vpop.f32.mrf.mxu1 }
 0x208   :  { %6711 = vrcp.f32 %v1662_v48  ;;  %v1385_v42 = vadd.f32 %v1369_v59, %v1267_v47  ;;  %v1679_v45 = vand.u32 2147483647, %v1662_v48  ;;  %v1681_v30 = vand.u32 2147483648, %v1662_v48 }
 0x209   :  { %v1620_v63 = vadd.f32 %v1603_v57, %v1502_v51  ;;  %vm1675_vm6 = vweird.f32 %v1662_v48  ;;  %v1151_v57 = vadd.f32 %v7590_v1, %v1029_v39  ;;  %v1032_v59 = vadd.f32 %v7594_v5, %v7592_v2 }
 0x20a   :  { %vm1680_vm9 = vcmp.eq.f32.partialorder %v1679_v45, 8.507059e+37  ;;  %v1682_v49 = vor.u32 1.1754944e-38, %v1681_v30 }
 0x20b   :  { %v7615_v53 = vadd.f32 %v7604_v23, %v1620_v63  ;;  %v1152_v5 = vadd.f32 %v7596_v9, %v1032_v59 }
 0x20d   :  { %v6710_v6 = vpop.eup %6709  ;;  %v5758_v13 = vmul.f32 -1.442695, %v7615_v53 }
 0x20e   :  { %v6712_v61 = vpop.eup %6711  ;;  %v7619_v15 = vadd.f32 1.0, %v6710_v6  ;;  %v1487_v56 = vpop.f32.mrf.mxu2 }
 0x20f   :  { %v1671_v17 = vmul.f32 %v6712_v61, %v1662_v48  ;;  %6713 = vpow2.f32 %v5758_v13  ;;  %v1503_v18 = vadd.f32 %v1487_v56, %v1385_v42  ;;  %v1605_v20 = vpop.f32.mrf.mxu3  ;;  %v1372_v7 = vpop.f32.mrf.mxu1  ;;  %vm1676_vm5 = vweird.f32 %v6712_v61 }
 0x210   :  { %6715 = vrcp.f32 %v7619_v15  ;;  %vm1677_vm8 = vmor %vm1675_vm6, %vm1676_vm5  ;;  %v1386_v41 = vadd.f32 %v1372_v7, %v1268_v8  ;;  %v1696_v63 = vand.u32 2147483648, %v7619_v15  ;;  %v1694_v6 = vand.u32 2147483647, %v7619_v15 }
 0x211   :  { %v1672_v24 = vsub.f32 1.0, %v1671_v17  ;;  %v1621_v34 = vadd.f32 %v1605_v20, %v1503_v18  ;;  %v1034_v13 = vadd.f32 %v7600_v12, %v7598_v10  ;;  %vm1690_vm12 = vweird.f32 %v7619_v15 }
 0x212   :  { %v1697_v56 = vor.u32 1.1754944e-38, %v1696_v63  ;;  %v1269_v18 = vadd.f32 %v7621_v16, %v1151_v57  ;;  %vm1695_vm14 = vcmp.eq.f32.partialorder %v1694_v6, 8.507059e+37 }
 0x213   :  { %v1673_v31 = vmul.f32 %v6712_v61, %v1672_v24  ;;  %v7626_v32 = vadd.f32 %v7604_v23, %v1621_v34  ;;  %v1153_v22 = vadd.f32 %v7602_v14, %v1034_v13 }
 0x215   :  { %v6714_v35 = vpop.eup %6713  ;;  %v1674_v36 = vadd.f32 %v6712_v61, %v1673_v31  ;;  %v5759_v54 = vmul.f32 -1.442695, %v7626_v32  ;;  %v1270_v31 = vadd.f32 %v1259_v38, %v1152_v5 }
 0x216   :  { %v6716_v37 = vpop.eup %6715  ;;  %v7631_v40 = vadd.f32 1.0, %v6714_v35  ;;  %v1490_v21 = vpop.f32.mrf.mxu2 }
 0x217   :  { %v1678_v52 = vsel %vm1677_vm8, %v6712_v61, %v1674_v36  ;;  %v1686_v55 = vmul.f32 %v6716_v37, %v7619_v15  ;;  %6717 = vpow2.f32 %v5759_v54  ;;  %v1608_v50 = vpop.f32.mrf.mxu3  ;;  %v1374_v46 = vpop.f32.mrf.mxu1  ;;  %v1504_v51 = vadd.f32 %v1490_v21, %v1386_v41 }
 0x218   :  { %v1683_v48 = vsel %vm1680_vm9, %v1682_v49, %v1678_v52  ;;  %6719 = vrcp.f32 %v7631_v40  ;;  %vm1691_vm11 = vweird.f32 %v6716_v37  ;;  %v1387_v9 = vadd.f32 %v1374_v46, %v1269_v18  ;;  %v1261_v35 = vpop.f32.mrf.mxu0 }
 0x219   :  { %v1790_v62 = vmul.f32 %v1683_v48, %v7607_v29  ;;  %v1687_v0 = vsub.f32 1.0, %v1686_v55  ;;  %v1622_v11 = vadd.f32 %v1608_v50, %v1504_v51  ;;  %v6516_v29 = vld [vmem:[#allocation5 + $0x38] sm:$0xff]  ;;  %vm1692_vm13 = vmor %vm1690_vm12, %vm1691_vm11  ;;  %v1709_v26 = vand.u32 2147483647, %v7631_v40 }
 0x21a   :  { %2167 = vmatpush.bf16.msrb.mxu3 %v6516_v29  ;;  %v1711_v45 = vand.u32 2147483648, %v7631_v40  ;;  %vm1705_vm0 = vweird.f32 %v7631_v40 }
 0x21b   :  { %v1688_v47 = vmul.f32 %v6716_v37, %v1687_v0  ;;  %1799 = vst.msk [vmem:[#allocation2 + $0x8] sm:$0xff] %vm1798_vm10, %v1790_v62  ;;  %v7646_v1 = vadd.f32 %v7604_v23, %v1622_v11  ;;  %vm7663_vm1 = vcmp.eq.f32.partialorder %v1709_v26, 8.507059e+37 }
 0x21c   :  { %v1712_v50 = vor.u32 1.1754944e-38, %v1711_v45 }
 0x21d   :  { %v6718_v42 = vpop.eup %6717  ;;  %v1689_v61 = vadd.f32 %v6716_v37, %v1688_v47  ;;  %v5760_v15 = vmul.f32 -1.442695, %v7646_v1 }
 0x21e   :  { %v6720_v2 = vpop.eup %6719  ;;  %v7649_v17 = vadd.f32 1.0, %v6718_v42  ;;  %v1492_v20 = vpop.f32.mrf.mxu2  ;;  %2168 = vmatpush.bf16.msrb.mxu3 %v6515_v60 }
 0x21f   :  { %v1693_v10 = vsel %vm1692_vm13, %v6716_v37, %v1689_v61  ;;  %v1701_v12 = vmul.f32 %v6720_v2, %v7631_v40  ;;  %v1610_v7 = vpop.f32.mrf.mxu3  ;;  %v1377_v34 = vpop.f32.mrf.mxu1  ;;  %v1505_v30 = vadd.f32 %v1492_v20, %v1387_v9  ;;  %vm1706_vm15 = vweird.f32 %v6720_v2 }
 0x220   :  { %v1698_v24 = vsel %vm1695_vm14, %v1697_v56, %v1693_v10  ;;  %6721 = vrcp.f32 %v7649_v17  ;;  %v1724_v14 = vand.u32 2147483647, %v7649_v17  ;;  %v1726_v54 = vand.u32 2147483648, %v7649_v17  ;;  %vm7667_vm2 = vmor %vm1705_vm0, %vm1706_vm15 }
 0x221   :  { %v1791_v25 = vmul.f32 %v1698_v24, %v7611_v43  ;;  %v1702_v16 = vsub.f32 1.0, %v1701_v12  ;;  %6723 = vpow2.f32 %v5760_v15  ;;  %v1623_v43 = vadd.f32 %v1610_v7, %v1505_v30 }
 0x222   :  { %v1827_v8 = vld [vmem:[#allocation2 + $0x6] sm:$0xff]  ;;  %v1271_v37 = vadd.f32 %v1261_v35, %v1153_v22  ;;  %v1388_v21 = vadd.f32 %v1377_v34, %v1270_v31  ;;  %vm1720_vm3 = vweird.f32 %v7649_v17  ;;  %vm7678_vm4 = vcmp.eq.f32.partialorder %v1724_v14, 8.507059e+37 }
 0x223   :  { %v1703_v36 = vmul.f32 %v6720_v2, %v1702_v16  ;;  %1800 = vst.msk [vmem:[#allocation2 + $0x10] sm:$0xff] %vm1798_vm10, %v1791_v25  ;;  %v1807_v52 = vld [vmem:[#allocation2 + $0x5] sm:$0xff]  ;;  %v7673_v48 = vadd.f32 %v7604_v23, %v1623_v43  ;;  %v1835_v38 = vpack.c.bf16 %v1827_v8, %v1827_v8  ;;  %v1727_v59 = vor.u32 1.1754944e-38, %v1726_v54 }
 0x224   :  { %v1994_v40 = vld [vmem:[#allocation2 + $0x7] sm:$0xff]  ;;  %v1815_v42 = vpack.c.bf16 %v1807_v52, %v1807_v52 }
 0x225   :  { %v1704_v39 = vadd.f32 %v6720_v2, %v1703_v36  ;;  %v2096_v6 = vld [vmem:[#allocation2 + $0x8] sm:$0xff]  ;;  %v5761_v29 = vmul.f32 -1.442695, %v7673_v48  ;;  %v2002_v18 = vpack.c.bf16 %v1994_v40, %v1994_v40  ;;  %v1856_v10 = vunpack.c.l.b16 %v1835_v38 }
 0x226   :  { %v6722_v55 = vpop.eup %6721  ;;  %v1495_v46 = vpop.f32.mrf.mxu2  ;;  %v2104_v7 = vpack.c.bf16 %v2096_v6, %v2096_v6  ;;  %v1929_v25 = vunpack.c.l.b16 %v1815_v42 }
 0x227   :  { %v6724_v62 = vpop.eup %6723  ;;  %v1708_v0 = vsel %vm7667_vm2, %v6720_v2, %v1704_v39  ;;  %v1716_v51 = vmul.f32 %v6722_v55, %v7649_v17  ;;  %v1506_v63 = vadd.f32 %v1495_v46, %v1388_v21  ;;  %v1613_v47 = vpop.f32.mrf.mxu3  ;;  %vm1721_vm5 = vweird.f32 %v6722_v55 }
 0x228   :  { %v1713_v11 = vsel %vm7663_vm1, %v1712_v50, %v1708_v0  ;;  %v7684_v13 = vadd.f32 1.0, %v6724_v62  ;;  %v1379_v56 = vpop.f32.mrf.mxu1  ;;  %vm1722_vm6 = vmor %vm1720_vm3, %vm1721_vm5  ;;  %v2023_v14 = vunpack.c.l.b16 %v2002_v18  ;;  %v2125_v8 = vunpack.c.l.b16 %v2104_v7  ;;  %v6517_v18 = vld [vmem:[#allocation5 + $0x40] sm:$0xff] }
 0x229   :  { %v1792_v61 = vmul.f32 %v1713_v11, %v7615_v53  ;;  %v1717_v2 = vsub.f32 1.0, %v1716_v51  ;;  %v1624_v5 = vadd.f32 %v1613_v47, %v1506_v63  ;;  %v1389_v34 = vadd.f32 %v1379_v56, %v1271_v37  ;;  %v6520_v63 = vld [vmem:[#allocation5 + $0x58] sm:$0xff]  ;;  %v6521_v56 = vld [vmem:[#allocation5 + $0x60] sm:$0xff] }
 0x22a   :  { %6725 = vrcp.f32 %v7684_v13  ;;  %v1828_v20 = vld [vmem:[#allocation2 + $0xe] sm:$0xff]  ;;  %v1741_v47 = vand.u32 2147483648, %v7684_v13  ;;  %v1739_v42 = vand.u32 2147483647, %v7684_v13  ;;  %2371 = vmatpush.bf16.msra.mxu1 %v6520_v63  ;;  %vm1735_vm9 = vweird.f32 %v7684_v13 }
 0x22b   :  { %v1808_v12 = vld [vmem:[#allocation2 + $0xd] sm:$0xff]  ;;  %v1718_v22 = vmul.f32 %v6722_v55, %v1717_v2  ;;  %6727 = vpow2.f32 %v5761_v29  ;;  %v7690_v24 = vadd.f32 %v7604_v23, %v1624_v5  ;;  %v1836_v9 = vpack.c.bf16 %v1828_v20, %v1828_v20  ;;  %1801 = vst.msk [vmem:[#allocation2 + $0x28] sm:$0xff] %vm1798_vm10, %v1792_v61  ;;  %v6519_v20 = vld [vmem:[#allocation5 + $0x50] sm:$0xff] }
 0x22c   :  { %v1995_v15 = vld [vmem:[#allocation2 + $0xf] sm:$0xff]  ;;  %v1816_v60 = vpack.c.bf16 %v1808_v12, %v1808_v12  ;;  %vm1740_vm12 = vcmp.eq.f32.partialorder %v1739_v42, 8.507059e+37 }
 0x22d   :  { %v2097_v53 = vld [vmem:[#allocation2 + $0x10] sm:$0xff]  ;;  %v2003_v16 = vpack.c.bf16 %v1995_v15, %v1995_v15  ;;  %v1719_v26 = vadd.f32 %v6722_v55, %v1718_v22  ;;  %v5762_v45 = vmul.f32 -1.442695, %v7690_v24  ;;  %v1857_v30 = vunpack.c.l.b16 %v1836_v9 }
 0x22e   :  { %v2105_v31 = vpack.c.bf16 %v2097_v53, %v2097_v53  ;;  %v1497_v35 = vpop.f32.mrf.mxu2  ;;  %v1930_v36 = vunpack.c.l.b16 %v1816_v60  ;;  %v1742_v15 = vor.u32 1.1754944e-38, %v1741_v47  ;;  %2372 = vmatpush.bf16.msra.mxu1 %v6519_v20 }
 0x22f   :  { %v2024_v54 = vunpack.c.l.b16 %v2003_v16  ;;  %v1723_v43 = vsel %vm1722_vm6, %v6722_v55, %v1719_v26  ;;  %6729 = vpow2.f32 %v5762_v45  ;;  %v1507_v37 = vadd.f32 %v1497_v35, %v1389_v34  ;;  %v1615_v52 = vpop.f32.mrf.mxu3 }
 0x230   :  { %v1864_v39 = vpack.c.b16 %v1857_v30, %v1856_v10  ;;  %v6726_v49 = vpop.eup %6725  ;;  %v1728_v21 = vsel %vm7678_vm4, %v1727_v59, %v1723_v43  ;;  %v1937_v41 = vpack.c.b16 %v1930_v36, %v1929_v25  ;;  %v2126_v46 = vunpack.c.l.b16 %v2105_v31  ;;  %v6522_v59 = vld [vmem:[#allocation5 + $0x68] sm:$0xff] }
 0x231   :  { %v2031_v50 = vpack.c.b16 %v2024_v54, %v2023_v14  ;;  %v6728_v38 = vpop.eup %6727  ;;  %v1793_v17 = vmul.f32 %v1728_v21, %v7626_v32  ;;  %v1731_v40 = vmul.f32 %v6726_v49, %v7684_v13  ;;  %v1625_v62 = vadd.f32 %v1615_v52, %v1507_v37  ;;  %v6518_v32 = vld [vmem:[#allocation5 + $0x48] sm:$0xff]  ;;  %2473 = vmatpush.bf16.msra.mxu2 %v6522_v59 }
 0x232   :  { %5772 = vmatmul.msk.bf16.vlgmr.msrb.gmra.mxu0 %vm1798_vm10, %v1864_v39  ;;  %v7702_v55 = vadd.f32 1.0, %v6728_v38  ;;  %5784 = vmatmul.msk.bf16.vlgmr.msrb.gmra.mxu1 %vm1798_vm10, %v1937_v41  ;;  %v2133_v0 = vpack.c.b16 %v2126_v46, %v2125_v8  ;;  %v1829_v6 = vld [vmem:[#allocation2 + $0x26] sm:$0xff]  ;;  %vm1736_vm8 = vweird.f32 %v6726_v49 }
 0x233   :  { %5796 = vmatmul.msk.bf16.vlgmr.msrb.gmra.mxu2 %vm1798_vm10, %v2031_v50  ;;  %v1732_v51 = vsub.f32 1.0, %v1731_v40  ;;  %v7707_v57 = vadd.f32 %v7604_v23, %v1625_v62  ;;  %1802 = vst.msk [vmem:[#allocation2 + $0x30] sm:$0xff] %vm1798_vm10, %v1793_v17  ;;  %2269 = vmatpush.bf16.msra.mxu0 %v6518_v32  ;;  %v1809_v61 = vld [vmem:[#allocation2 + $0x25] sm:$0xff]  ;;  %v1837_v12 = vpack.c.bf16 %v1829_v6, %v1829_v6  ;;  %vm1737_vm11 = vmor %vm1735_vm9, %vm1736_vm8 }
 0x234   :  { %6731 = vrcp.f32 %v7702_v55  ;;  %5808 = vmatmul.msk.bf16.vlgmr.msrb.gmra.mxu3 %vm1798_vm10, %v2133_v0  ;;  %v1996_v2 = vld [vmem:[#allocation2 + $0x27] sm:$0xff]  ;;  %v1817_v22 = vpack.c.bf16 %v1809_v61, %v1809_v61  ;;  %v1754_v25 = vand.u32 2147483647, %v7702_v55  ;;  %v1756_v13 = vand.u32 2147483648, %v7702_v55 }
 0x235   :  { %v6730_v11 = vpop.eup %6729  ;;  %v1733_v29 = vmul.f32 %v6726_v49, %v1732_v51  ;;  %v5763_v23 = vmul.f32 -1.442695, %v7707_v57  ;;  %v2004_v9 = vpack.c.bf16 %v1996_v2, %v1996_v2  ;;  %v2098_v53 = vld [vmem:[#allocation2 + $0x28] sm:$0xff]  ;;  %2474 = vmatpush.bf16.msra.mxu2 %v6521_v56  ;;  %v1858_v36 = vunpack.c.l.b16 %v1837_v12 }
 0x236   :  { %v7715_v5 = vadd.f32 1.0, %v6730_v11  ;;  %v2106_v43 = vpack.c.bf16 %v2098_v53, %v2098_v53  ;;  %v1931_v52 = vunpack.c.l.b16 %v1817_v22  ;;  %vm1750_vm14 = vweird.f32 %v7702_v55 }
 0x237   :  { %v1734_v10 = vadd.f32 %v6726_v49, %v1733_v29  ;;  %6733 = vpow2.f32 %v5763_v23  ;;  %2270 = vmatpush.bf16.msra.mxu0 %v6517_v18  ;;  %v2025_v41 = vunpack.c.l.b16 %v2004_v9  ;;  %vm1755_vm0 = vcmp.eq.f32.partialorder %v1754_v25, 8.507059e+37 }
 0x238   :  { %6735 = vrcp.f32 %v7715_v5  ;;  %v2127_v51 = vunpack.c.l.b16 %v2106_v43  ;;  %v1757_v6 = vor.u32 1.1754944e-38, %v1756_v13  ;;  %v1771_v11 = vand.u32 2147483648, %v7715_v5 }
 0x239   :  { %v1738_v7 = vsel %vm1737_vm11, %v6726_v49, %v1734_v10  ;;  %v1769_v61 = vand.u32 2147483647, %v7715_v5  ;;  %vm1765_vm2 = vweird.f32 %v7715_v5 }
 0x23a   :  { %v6732_v34 = vpop.eup %6731  ;;  %v1743_v60 = vsel %vm1740_vm12, %v1742_v15, %v1738_v7  ;;  %v1830_v16 = vld [vmem:[#allocation2 + $0x2e] sm:$0xff]  ;;  %v1772_v20 = vor.u32 1.1754944e-38, %v1771_v11 }
 0x23b   :  { %v1810_v26 = vld [vmem:[#allocation2 + $0x2d] sm:$0xff]  ;;  %v1794_v30 = vmul.f32 %v1743_v60, %v7646_v1  ;;  %v1746_v31 = vmul.f32 %v6732_v34, %v7702_v55  ;;  %v1838_v35 = vpack.c.bf16 %v1830_v16, %v1830_v16  ;;  %vm1751_vm13 = vweird.f32 %v6732_v34 }
 0x23c   :  { %v1997_v45 = vld [vmem:[#allocation2 + $0x2f] sm:$0xff]  ;;  %v1818_v54 = vpack.c.bf16 %v1810_v26, %v1810_v26  ;;  %vm1752_vm15 = vmor %vm1750_vm14, %vm1751_vm13  ;;  %vm1770_vm4 = vcmp.eq.f32.partialorder %v1769_v61, 8.507059e+37 }
 0x23d   :  { %v2099_v14 = vld [vmem:[#allocation2 + $0x30] sm:$0xff]  ;;  %v2005_v8 = vpack.c.bf16 %v1997_v45, %v1997_v45  ;;  %v6734_v39 = vpop.eup %6733  ;;  %v1747_v49 = vsub.f32 1.0, %v1746_v31  ;;  %1803 = vst.msk [vmem:[#allocation2 + $0x48] sm:$0xff] %vm1798_vm10, %v1794_v30  ;;  %v1859_v21 = vunpack.c.l.b16 %v1838_v35 }
 0x23e   :  { %v2107_v37 = vpack.c.bf16 %v2099_v14, %v2099_v14  ;;  %v6736_v50 = vpop.eup %6735  ;;  %v1669_v46 = vadd.f32 1.0, %v6734_v39  ;;  %v1932_v38 = vunpack.c.l.b16 %v1818_v54 }
 0x23f   :  { %v2026_v1 = vunpack.c.l.b16 %v2005_v8  ;;  %v1748_v40 = vmul.f32 %v6732_v34, %v1747_v49  ;;  %v1761_v62 = vmul.f32 %v6736_v50, %v7715_v5  ;;  %v1865_v0 = vpack.c.b16 %v1859_v21, %v1858_v36 }
 0x240   :  { %v2128_v17 = vunpack.c.l.b16 %v2107_v37  ;;  %6737 = vrcp.f32 %v1669_v46  ;;  %v1938_v63 = vpack.c.b16 %v1932_v38, %v1931_v52  ;;  %vm1766_vm1 = vweird.f32 %v6736_v50 }
 0x241   :  { %v1749_v59 = vadd.f32 %v6732_v34, %v1748_v40  ;;  %v1762_v32 = vsub.f32 1.0, %v1761_v62  ;;  %v2032_v47 = vpack.c.b16 %v2026_v1, %v2025_v41  ;;  %vm1767_vm3 = vmor %vm1765_vm2, %vm1766_vm1  ;;  %v1786_v60 = vand.u32 2147483648, %v1669_v46 }
 0x242   :  { %5773 = vmatmul.msk.bf16.gmra.mxu0 %vm1798_vm10, %v1865_v0  ;;  %v2134_v29 = vpack.c.b16 %v2128_v17, %v2127_v51  ;;  %5785 = vmatmul.msk.bf16.gmra.mxu1 %vm1798_vm10, %v1938_v63  ;;  %vm1780_vm6 = vweird.f32 %v1669_v46 }
 0x243   :  { %v1753_v42 = vsel %vm1752_vm15, %v6732_v34, %v1749_v59  ;;  %v1763_v23 = vmul.f32 %v6736_v50, %v1762_v32  ;;  %5797 = vmatmul.msk.bf16.gmra.mxu2 %vm1798_vm10, %v2032_v47  ;;  %v1787_v30 = vor.u32 1.1754944e-38, %v1786_v60 }
 0x244   :  { %v1758_v55 = vsel %vm1755_vm0, %v1757_v6, %v1753_v42  ;;  %5809 = vmatmul.msk.bf16.gmra.mxu3 %vm1798_vm10, %v2134_v29  ;;  %v1831_v15 = vld [vmem:[#allocation2 + $0x46] sm:$0xff] }
 0x245   :  { %v1795_v2 = vmul.f32 %v1758_v55, %v7673_v48  ;;  %v1764_v56 = vadd.f32 %v6736_v50, %v1763_v23  ;;  %v1811_v53 = vld [vmem:[#allocation2 + $0x45] sm:$0xff]  ;;  %v1784_v48 = vand.u32 2147483647, %v1669_v46  ;;  %v1839_v25 = vpack.c.bf16 %v1831_v15, %v1831_v15 }
 0x246   :  { %v6738_v18 = vpop.eup %6737  ;;  %v1998_v34 = vld [vmem:[#allocation2 + $0x47] sm:$0xff]  ;;  %v1819_v16 = vpack.c.bf16 %v1811_v53, %v1811_v53 }
 0x247   :  { %v1768_v10 = vsel %vm1767_vm3, %v6736_v50, %v1764_v56  ;;  %v1776_v12 = vmul.f32 %v6738_v18, %v1669_v46  ;;  %1804 = vst.msk [vmem:[#allocation2 + $0x50] sm:$0xff] %vm1798_vm10, %v1795_v2  ;;  %vm1781_vm5 = vweird.f32 %v6738_v18  ;;  %v2100_v13 = vld [vmem:[#allocation2 + $0x48] sm:$0xff]  ;;  %v2006_v26 = vpack.c.bf16 %v1998_v34, %v1998_v34 }
 0x248   :  { %v1773_v7 = vsel %vm1770_vm4, %v1772_v20, %v1768_v10  ;;  %vm1782_vm8 = vmor %vm1780_vm6, %vm1781_vm5  ;;  %vm1785_vm9 = vcmp.eq.f32.partialorder %v1784_v48, 8.507059e+37  ;;  %v2108_v14 = vpack.c.bf16 %v2100_v13, %v2100_v13  ;;  %v1933_v21 = vunpack.c.l.b16 %v1819_v16  ;;  %v2198_v16 = vld [vmem:[#allocation2 + $0x9] sm:$0xff] }
 0x249   :  { %v1796_v22 = vmul.f32 %v1773_v7, %v7690_v24  ;;  %v1777_v9 = vsub.f32 1.0, %v1776_v12  ;;  %v1860_v24 = vunpack.c.l.b16 %v1839_v25  ;;  %v2027_v52 = vunpack.c.l.b16 %v2006_v26  ;;  %v2199_v26 = vld [vmem:[#allocation2 + $0x11] sm:$0xff] }
 0x24a   :  { %v2129_v17 = vunpack.c.l.b16 %v2108_v14 }
 0x24b   :  { %v1778_v5 = vmul.f32 %v6738_v18, %v1777_v9  ;;  %1805 = vst.msk [vmem:[#allocation2 + $0x68] sm:$0xff] %vm1798_vm10, %v1796_v22 }
 0x24d   :  { %v1779_v45 = vadd.f32 %v6738_v18, %v1778_v5 }
 0x24e   :  { %v1832_v31 = vld [vmem:[#allocation2 + $0x4e] sm:$0xff] }
 0x24f   :  { %v1812_v35 = vld [vmem:[#allocation2 + $0x4d] sm:$0xff]  ;;  %v1783_v54 = vsel %vm1782_vm8, %v6738_v18, %v1779_v45  ;;  %v1840_v8 = vpack.c.bf16 %v1832_v31, %v1832_v31 }
 0x250   :  { %v1999_v36 = vld [vmem:[#allocation2 + $0x4f] sm:$0xff]  ;;  %v1820_v43 = vpack.c.bf16 %v1812_v35, %v1812_v35  ;;  %v1788_v49 = vsel %vm1785_vm9, %v1787_v30, %v1783_v54  ;;  %v2206_v35 = vpack.c.bf16 %v2198_v16, %v2198_v16 }
 0x251   :  { %v2007_v37 = vpack.c.bf16 %v1999_v36, %v1999_v36  ;;  %v2101_v39 = vld [vmem:[#allocation2 + $0x50] sm:$0xff]  ;;  %v1797_v50 = vmul.f32 %v1788_v49, %v7707_v57  ;;  %v1861_v46 = vunpack.c.l.b16 %v1840_v8  ;;  %v2207_v36 = vpack.c.bf16 %v2199_v26, %v2199_v26 }
 0x252   :  { %v2109_v41 = vpack.c.bf16 %v2101_v39, %v2101_v39  ;;  %v1934_v38 = vunpack.c.l.b16 %v1820_v43  ;;  %v1833_v57 = vld [vmem:[#allocation2 + $0x66] sm:$0xff]  ;;  %v2301_v30 = vld [vmem:[#allocation2 + $0x12] sm:$0xff] }
 0x253   :  { %v2028_v1 = vunpack.c.l.b16 %v2007_v37  ;;  %1806 = vst.msk [vmem:[#allocation2 + $0x70] sm:$0xff] %vm1798_vm10, %v1797_v50  ;;  %v1866_v62 = vpack.c.b16 %v1861_v46, %v1860_v24  ;;  %v1813_v32 = vld [vmem:[#allocation2 + $0x65] sm:$0xff]  ;;  %v1841_v11 = vpack.c.bf16 %v1833_v57, %v1833_v57  ;;  %v2403_v24 = vld [vmem:[#allocation2 + $0x13] sm:$0xff]  ;;  %v2309_v54 = vpack.c.bf16 %v2301_v30, %v2301_v30 }
 0x254   :  { %v2130_v40 = vunpack.c.l.b16 %v2109_v41  ;;  %v1939_v0 = vpack.c.b16 %v1934_v38, %v1933_v21  ;;  %v2000_v63 = vld [vmem:[#allocation2 + $0x67] sm:$0xff]  ;;  %v1821_v61 = vpack.c.bf16 %v1813_v32, %v1813_v32  ;;  %v2411_v43 = vpack.c.bf16 %v2403_v24, %v2403_v24 }
 0x255   :  { %v2033_v51 = vpack.c.b16 %v2028_v1, %v2027_v52  ;;  %5774 = vmatmul.msk.bf16.gmra.mxu0 %vm1798_vm10, %v1866_v62  ;;  %v2102_v47 = vld [vmem:[#allocation2 + $0x68] sm:$0xff]  ;;  %v2008_v18 = vpack.c.bf16 %v2000_v63, %v2000_v63  ;;  %v1862_v9 = vunpack.c.l.b16 %v1841_v11  ;;  %v2227_v37 = vunpack.c.l.b16 %v2206_v35  ;;  %v2303_v62 = vld [vmem:[#allocation2 + $0x32] sm:$0xff] }
 0x256   :  { %v2135_v59 = vpack.c.b16 %v2130_v40, %v2129_v17  ;;  %5786 = vmatmul.msk.bf16.gmra.mxu1 %vm1798_vm10, %v1939_v0  ;;  %v2110_v20 = vpack.c.bf16 %v2102_v47, %v2102_v47  ;;  %v1935_v53 = vunpack.c.l.b16 %v1821_v61  ;;  %v2300_v45 = vld [vmem:[#allocation2 + $0xa] sm:$0xff]  ;;  %v2228_v39 = vunpack.c.l.b16 %v2207_v36 }
 0x257   :  { %5798 = vmatmul.msk.bf16.gmra.mxu2 %vm1798_vm10, %v2033_v51  ;;  %v2029_v34 = vunpack.c.l.b16 %v2008_v18  ;;  %v2402_v31 = vld [vmem:[#allocation2 + $0xb] sm:$0xff]  ;;  %v2308_v14 = vpack.c.bf16 %v2300_v45, %v2300_v45  ;;  %v2330_v21 = vunpack.c.l.b16 %v2309_v54  ;;  %v2432_v41 = vunpack.c.l.b16 %v2411_v43  ;;  %v2405_v51 = vld [vmem:[#allocation2 + $0x33] sm:$0xff] }
 0x258   :  { %5810 = vmatmul.msk.bf16.gmra.mxu3 %vm1798_vm10, %v2135_v59  ;;  %v2131_v48 = vunpack.c.l.b16 %v2110_v20  ;;  %v2410_v8 = vpack.c.bf16 %v2402_v31, %v2402_v31  ;;  %v2235_v50 = vpack.c.b16 %v2228_v39, %v2227_v37  ;;  %v2200_v1 = vld [vmem:[#allocation2 + $0x29] sm:$0xff]  ;;  %v2201_v17 = vld [vmem:[#allocation2 + $0x31] sm:$0xff]  ;;  %v2311_v63 = vpack.c.bf16 %v2303_v62, %v2303_v62 }
 0x259   :  { %v2329_v49 = vunpack.c.l.b16 %v2308_v14  ;;  %v2302_v40 = vld [vmem:[#allocation2 + $0x2a] sm:$0xff]  ;;  %v2208_v59 = vpack.c.bf16 %v2200_v1, %v2200_v1  ;;  %v2209_v57 = vpack.c.bf16 %v2201_v17, %v2201_v17 }
 0x25a   :  { %v1834_v6 = vld [vmem:[#allocation2 + $0x6e] sm:$0xff]  ;;  %v2431_v52 = vunpack.c.l.b16 %v2410_v8  ;;  %v2310_v32 = vpack.c.bf16 %v2302_v40, %v2302_v40 }
 0x25b   :  { %v1814_v29 = vld [vmem:[#allocation2 + $0x6d] sm:$0xff]  ;;  %v1842_v23 = vpack.c.bf16 %v1834_v6, %v1834_v6  ;;  %v2337_v46 = vpack.c.b16 %v2330_v21, %v2329_v49  ;;  %v2413_v6 = vpack.c.bf16 %v2405_v51, %v2405_v51  ;;  %v2229_v11 = vunpack.c.l.b16 %v2208_v59 }
 0x25c   :  { %v2001_v42 = vld [vmem:[#allocation2 + $0x6f] sm:$0xff]  ;;  %v1822_v55 = vpack.c.bf16 %v1814_v29, %v1814_v29  ;;  %v2439_v38 = vpack.c.b16 %v2432_v41, %v2431_v52  ;;  %v2230_v29 = vunpack.c.l.b16 %v2209_v57 }
 0x25d   :  { %v2009_v2 = vpack.c.bf16 %v2001_v42, %v2001_v42  ;;  %v2103_v56 = vld [vmem:[#allocation2 + $0x70] sm:$0xff]  ;;  %v1863_v12 = vunpack.c.l.b16 %v1842_v23  ;;  %v2331_v42 = vunpack.c.l.b16 %v2310_v32  ;;  %v2332_v23 = vunpack.c.l.b16 %v2311_v63 }
 0x25e   :  { %v2111_v10 = vpack.c.bf16 %v2103_v56, %v2103_v56  ;;  %v1936_v15 = vunpack.c.l.b16 %v1822_v55  ;;  %v2404_v0 = vld [vmem:[#allocation2 + $0x2b] sm:$0xff]  ;;  %v2434_v55 = vunpack.c.l.b16 %v2413_v6  ;;  %v2409_v37 = vld [vmem:[#allocation2 + $0x73] sm:$0xff] }
 0x25f   :  { %v2030_v7 = vunpack.c.l.b16 %v2009_v2  ;;  %v1867_v60 = vpack.c.b16 %v1863_v12, %v1862_v9  ;;  %v2412_v47 = vpack.c.bf16 %v2404_v0, %v2404_v0  ;;  %v2236_v2 = vpack.c.b16 %v2230_v29, %v2229_v11  ;;  %v2202_v20 = vld [vmem:[#allocation2 + $0x49] sm:$0xff]  ;;  %v2205_v14 = vld [vmem:[#allocation2 + $0x71] sm:$0xff] }
 0x260   :  { %v2132_v22 = vunpack.c.l.b16 %v2111_v10  ;;  %v1940_v25 = vpack.c.b16 %v1936_v15, %v1935_v53  ;;  %v2338_v56 = vpack.c.b16 %v2332_v23, %v2331_v42  ;;  %v2203_v10 = vld [vmem:[#allocation2 + $0x51] sm:$0xff]  ;;  %v2210_v9 = vpack.c.bf16 %v2202_v20, %v2202_v20  ;;  %v2204_v36 = vld [vmem:[#allocation2 + $0x69] sm:$0xff]  ;;  %v6530_v20 = vld [vmem:[#allocation7 + $0x38] sm:$0xff] }
 0x261   :  { %v2034_v5 = vpack.c.b16 %v2030_v7, %v2029_v34  ;;  %v2433_v61 = vunpack.c.l.b16 %v2412_v47  ;;  %v2304_v12 = vld [vmem:[#allocation2 + $0x4a] sm:$0xff]  ;;  %v2305_v15 = vld [vmem:[#allocation2 + $0x52] sm:$0xff]  ;;  %v2211_v53 = vpack.c.bf16 %v2203_v10, %v2203_v10  ;;  %v2212_v39 = vpack.c.bf16 %v2204_v36, %v2204_v36  ;;  %v6526_v10 = vld [vmem:[#allocation7 + $0x18] sm:$0xff]  ;;  %2793 = vmatpush.bf16.msra.mxu3 %v6530_v20 }
 0x262   :  { %v2136_v13 = vpack.c.b16 %v2132_v22, %v2131_v48  ;;  %v2406_v7 = vld [vmem:[#allocation2 + $0x4b] sm:$0xff]  ;;  %v2407_v22 = vld [vmem:[#allocation2 + $0x53] sm:$0xff]  ;;  %v2312_v34 = vpack.c.bf16 %v2304_v12, %v2304_v12  ;;  %v2313_v48 = vpack.c.bf16 %v2305_v15, %v2305_v15  ;;  %v2213_v49 = vpack.c.bf16 %v2205_v14, %v2205_v14  ;;  %2878 = vmatpush.bf16.msrb.mxu0 %v6526_v10 }
 0x263   :  { %v2440_v18 = vpack.c.b16 %v2434_v55, %v2433_v61  ;;  %v2306_v54 = vld [vmem:[#allocation2 + $0x6a] sm:$0xff]  ;;  %v2307_v8 = vld [vmem:[#allocation2 + $0x72] sm:$0xff] }
 0x264   :  { %v2333_v16 = vunpack.c.l.b16 %v2312_v34  ;;  %v2334_v26 = vunpack.c.l.b16 %v2313_v48  ;;  %v2408_v43 = vld [vmem:[#allocation2 + $0x6b] sm:$0xff]  ;;  %v2314_v21 = vpack.c.bf16 %v2306_v54, %v2306_v54  ;;  %v2315_v52 = vpack.c.bf16 %v2307_v8, %v2307_v8  ;;  %v7784_v8 = vld [vmem:[#allocation14 + $0x2] ss:$0 sm:$0xff] }
 0x265   :  { %5775 = vmatmul.msk.bf16.gmra.mxu0 %vm1798_vm10, %v1867_v60  ;;  %v2414_v60 = vpack.c.bf16 %v2406_v7, %v2406_v7  ;;  %v2416_v41 = vpack.c.bf16 %v2408_v43, %v2408_v43 }
 0x266   :  { %5787 = vmatmul.msk.bf16.gmra.mxu1 %vm1798_vm10, %v1940_v25  ;;  %v2415_v25 = vpack.c.bf16 %v2407_v22, %v2407_v22  ;;  %v2339_v24 = vpack.c.b16 %v2334_v26, %v2333_v16  ;;  %v2335_v1 = vunpack.c.l.b16 %v2314_v21  ;;  %v2336_v17 = vunpack.c.l.b16 %v2315_v52 }
 0x267   :  { %5799 = vmatmul.msk.bf16.gmra.mxu2 %vm1798_vm10, %v2034_v5  ;;  %v2231_v5 = vunpack.c.l.b16 %v2210_v9  ;;  %v2435_v45 = vunpack.c.l.b16 %v2414_v60  ;;  %v2437_v40 = vunpack.c.l.b16 %v2416_v41 }
 0x268   :  { %5811 = vmatmul.msk.bf16.gmra.mxu3 %vm1798_vm10, %v2136_v13  ;;  %v2232_v13 = vunpack.c.l.b16 %v2211_v53  ;;  %v2436_v30 = vunpack.c.l.b16 %v2415_v25  ;;  %v2340_v51 = vpack.c.b16 %v2336_v17, %v2335_v1 }
 0x26a   :  { %v2237_v31 = vpack.c.b16 %v2232_v13, %v2231_v5  ;;  %v2441_v35 = vpack.c.b16 %v2436_v30, %v2435_v45 }
 0x275   :  { %5820 = vmatmul.msk.bf16.vlgmr.msra.gmra.mxu0 %vm1798_vm10, %v2235_v50  ;;  %v2417_v50 = vpack.c.bf16 %v2409_v37, %v2409_v37 }
 0x276   :  { %5832 = vmatmul.msk.bf16.vlgmr.msra.gmra.mxu1 %vm1798_vm10, %v2337_v46  ;;  %v2233_v46 = vunpack.c.l.b16 %v2212_v39 }
 0x277   :  { %5844 = vmatmul.msk.bf16.vlgmr.msra.gmra.mxu2 %vm1798_vm10, %v2439_v38  ;;  %v2234_v38 = vunpack.c.l.b16 %v2213_v49  ;;  %v2438_v62 = vunpack.c.l.b16 %v2417_v50  ;;  %v6534_v50 = vld [vmem:[#allocation7 + $0x58] sm:$0xff] }
 0x278   :  { %2988 = vmatpush.bf16.msrb.mxu1 %v6534_v50 }
 0x279   :  { %v2238_v0 = vpack.c.b16 %v2234_v38, %v2233_v46  ;;  %v2442_v59 = vpack.c.b16 %v2438_v62, %v2437_v40 }
 0x285   :  { %5821 = vmatmul.msk.bf16.gmra.mxu0 %vm1798_vm10, %v2236_v2 }
 0x286   :  { %5833 = vmatmul.msk.bf16.gmra.mxu1 %vm1798_vm10, %v2338_v56 }
 0x287   :  { %5845 = vmatmul.msk.bf16.gmra.mxu2 %vm1798_vm10, %v2440_v18 }
 0x295   :  { %5822 = vmatmul.msk.bf16.gmra.mxu0 %vm1798_vm10, %v2237_v31 }
 0x296   :  { %5834 = vmatmul.msk.bf16.gmra.mxu1 %vm1798_vm10, %v2339_v24 }
 0x297   :  { %5846 = vmatmul.msk.bf16.gmra.mxu2 %vm1798_vm10, %v2441_v35 }
 0x2a5   :  { %5823 = vmatmul.msk.bf16.gmra.mxu0 %vm1798_vm10, %v2238_v0 }
 0x2a6   :  { %5835 = vmatmul.msk.bf16.gmra.mxu1 %vm1798_vm10, %v2340_v51 }
 0x2a7   :  { %5847 = vmatmul.msk.bf16.gmra.mxu2 %vm1798_vm10, %v2442_v59 }
 0x2af   :  { %v1901_v57 = vpop.f32.mrf.mxu0  ;;  %v1974_v32 = vpop.f32.mrf.mxu1 }
 0x2b0   :  { %v1975_v13 = vadd.f32 %v1974_v32, %v1901_v57 }
 0x2b6   :  { %v2068_v63 = vpop.f32.mrf.mxu2 }
 0x2b7   :  { %v1903_v47 = vpop.f32.mrf.mxu0  ;;  %v1976_v6 = vpop.f32.mrf.mxu1  ;;  %v2088_v16 = vadd.f32 %v2068_v63, %v1975_v13 }
 0x2b8   :  { %v2170_v22 = vpop.f32.mrf.mxu3  ;;  %v1977_v24 = vadd.f32 %v1976_v6, %v1903_v47  ;;  %v6529_v47 = vld [vmem:[#allocation7 + $0x30] sm:$0xff] }
 0x2b9   :  { %v2190_v45 = vadd.f32 %v2170_v22, %v2088_v16  ;;  %2794 = vmatpush.bf16.msra.mxu3 %v6529_v47 }
 0x2be   :  { %v2070_v11 = vpop.f32.mrf.mxu2 }
 0x2bf   :  { %v1906_v29 = vpop.f32.mrf.mxu0  ;;  %v1979_v42 = vpop.f32.mrf.mxu1  ;;  %v2089_v14 = vadd.f32 %v2070_v11, %v1977_v24  ;;  %v6525_v11 = vld [vmem:[#allocation7 + $0x10] sm:$0xff] }
 0x2c0   :  { %v2172_v5 = vpop.f32.mrf.mxu3  ;;  %v1980_v52 = vadd.f32 %v1979_v42, %v1906_v29  ;;  %2879 = vmatpush.bf16.msrb.mxu0 %v6525_v11 }
 0x2c1   :  { %v2191_v37 = vadd.f32 %v2172_v5, %v2089_v14 }
 0x2c6   :  { %v2073_v23 = vpop.f32.mrf.mxu2 }
 0x2c7   :  { %v1908_v61 = vpop.f32.mrf.mxu0  ;;  %v1981_v55 = vpop.f32.mrf.mxu1  ;;  %v2090_v38 = vadd.f32 %v2073_v23, %v1980_v52 }
 0x2c8   :  { %v2175_v36 = vpop.f32.mrf.mxu3  ;;  %v1982_v32 = vadd.f32 %v1981_v55, %v1908_v61 }
 0x2c9   :  { %v2192_v0 = vadd.f32 %v2175_v36, %v2090_v38 }
 0x2ce   :  { %v2075_v2 = vpop.f32.mrf.mxu2 }
 0x2cf   :  { %v2091_v42 = vadd.f32 %v2075_v2, %v1982_v32 }
 0x2d0   :  { %v2177_v17 = vpop.f32.mrf.mxu3 }
 0x2d1   :  { %v2193_v13 = vadd.f32 %v2177_v17, %v2091_v42  ;;  %v6528_v17 = vld [vmem:[#allocation7 + $0x28] sm:$0xff] }
 0x2d2   :  { %v7760_v56 = vpop.f32.mrf.mxu0  ;;  %2795 = vmatpush.bf16.msra.mxu3 %v6528_v17 }
 0x2d3   :  { %v7762_v18 = vpop.f32.mrf.mxu1 }
 0x2d4   :  { %v1985_v55 = vadd.f32 %v7762_v18, %v7760_v56 }
 0x2da   :  { %v7764_v12 = vpop.f32.mrf.mxu2  ;;  %v7766_v15 = vpop.f32.mrf.mxu0 }
 0x2db   :  { %v7768_v7 = vpop.f32.mrf.mxu1  ;;  %v2180_v22 = vpop.f32.mrf.mxu3 }
 0x2e2   :  { %v7770_v9 = vpop.f32.mrf.mxu2  ;;  %v7772_v53 = vpop.f32.mrf.mxu0 }
 0x2e3   :  { %v7774_v34 = vpop.f32.mrf.mxu1 }
 0x2ea   :  { %v7776_v48 = vpop.f32.mrf.mxu2  ;;  %v7778_v60 = vpop.f32.mrf.mxu0 }
 0x2eb   :  { %v7780_v25 = vpop.f32.mrf.mxu1 }
 0x2f2   :  { %v7782_v26 = vpop.f32.mrf.mxu2  ;;  %v2272_v30 = vpop.f32.mrf.mxu0 }
 0x2f3   :  { %v2374_v31 = vpop.f32.mrf.mxu1  ;;  %v2292_v35 = vadd.f32 %v2272_v30, %v2190_v45 }
 0x2f5   :  { %v2394_v54 = vadd.f32 %v2374_v31, %v2292_v35  ;;  %v6533_v31 = vld [vmem:[#allocation7 + $0x50] sm:$0xff]  ;;  %v2092_v35 = vadd.f32 %v7764_v12, %v1985_v55  ;;  %v6532_v55 = vld [vmem:[#allocation7 + $0x48] sm:$0xff] }
 0x2f6   :  { %2989 = vmatpush.bf16.msrb.mxu1 %v6533_v31 }
 0x2fa   :  { %v2476_v43 = vpop.f32.mrf.mxu2  ;;  %v2274_v49 = vpop.f32.mrf.mxu0  ;;  %2990 = vmatpush.bf16.msrb.mxu1 %v6532_v55 }
 0x2fb   :  { %v2496_v39 = vadd.f32 %v2476_v43, %v2394_v54  ;;  %v2376_v21 = vpop.f32.mrf.mxu1  ;;  %v2293_v46 = vadd.f32 %v2274_v49, %v2191_v37  ;;  %v2194_v49 = vadd.f32 %v2180_v22, %v2092_v35  ;;  %v1990_v22 = vadd.f32 %v7774_v34, %v7772_v53 }
 0x2fd   :  { %v2508_v41 = vadd.f32 %v7784_v8, %v2496_v39  ;;  %v2395_v40 = vadd.f32 %v2376_v21, %v2293_v46  ;;  %v2182_v46 = vpop.f32.mrf.mxu3  ;;  %v2094_v31 = vadd.f32 %v7776_v48, %v1990_v22 }
 0x2ff   :  { %v5848_v1 = vmul.f32 -1.442695, %v2508_v41  ;;  %v1987_v41 = vadd.f32 %v7768_v7, %v7766_v15 }
 0x301   :  { %6739 = vpow2.f32 %v5848_v1 }
 0x302   :  { %v2478_v62 = vpop.f32.mrf.mxu2  ;;  %v2277_v59 = vpop.f32.mrf.mxu0 }
 0x303   :  { %v2497_v51 = vadd.f32 %v2478_v62, %v2395_v40  ;;  %v2379_v57 = vpop.f32.mrf.mxu1  ;;  %v2294_v6 = vadd.f32 %v2277_v59, %v2192_v0  ;;  %v6524_v62 = vld [vmem:[#allocation7 + $0x8] sm:$0xff] }
 0x304   :  { %2880 = vmatpush.bf16.msrb.mxu0 %v6524_v62 }
 0x305   :  { %v2509_v63 = vadd.f32 %v7784_v8, %v2497_v51  ;;  %v2396_v10 = vadd.f32 %v2379_v57, %v2294_v6  ;;  %v2093_v51 = vadd.f32 %v7770_v9, %v1987_v41  ;;  %v6523_v41 = vld [vmem:[#allocation7] sm:$0xff] }
 0x307   :  { %v6740_v29 = vpop.eup %6739  ;;  %v5849_v20 = vmul.f32 -1.442695, %v2509_v63 }
 0x308   :  { %v2540_v23 = vadd.f32 1.0, %v6740_v29  ;;  %v2195_v29 = vadd.f32 %v2182_v46, %v2093_v51  ;;  %2881 = vmatpush.bf16.msrb.mxu0 %v6523_v41 }
 0x309   :  { %6741 = vpow2.f32 %v5849_v20 }
 0x30a   :  { %6743 = vrcp.f32 %v2540_v23  ;;  %v2481_v5 = vpop.f32.mrf.mxu2  ;;  %v2279_v45 = vpop.f32.mrf.mxu0  ;;  %v2557_v12 = vand.u32 2147483647, %v2540_v23  ;;  %v2559_v50 = vand.u32 2147483648, %v2540_v23  ;;  %vm2553_vm11 = vweird.f32 %v2540_v23 }
 0x30b   :  { %v2498_v16 = vadd.f32 %v2481_v5, %v2396_v10  ;;  %v2381_v61 = vpop.f32.mrf.mxu1  ;;  %v2295_v2 = vadd.f32 %v2279_v45, %v2193_v13 }
 0x30c   :  { %vm2558_vm13 = vcmp.eq.f32.partialorder %v2557_v12, 8.507059e+37  ;;  %v2560_v15 = vor.u32 1.1754944e-38, %v2559_v50  ;;  %v6531_v12 = vld [vmem:[#allocation7 + $0x40] sm:$0xff]  ;;  %v1992_v50 = vadd.f32 %v7780_v25, %v7778_v60 }
 0x30d   :  { %v2510_v30 = vadd.f32 %v7784_v8, %v2498_v16  ;;  %v2397_v37 = vadd.f32 %v2381_v61, %v2295_v2  ;;  %v2185_v2 = vpop.f32.mrf.mxu3  ;;  %2991 = vmatpush.bf16.msrb.mxu1 %v6531_v12 }
 0x30f   :  { %v6742_v24 = vpop.eup %6741  ;;  %v5850_v36 = vmul.f32 -1.442695, %v2510_v30 }
 0x310   :  { %v6744_v14 = vpop.eup %6743  ;;  %v7792_v54 = vadd.f32 1.0, %v6742_v24 }
 0x311   :  { %v2549_v43 = vmul.f32 %v6744_v14, %v2540_v23  ;;  %6745 = vpow2.f32 %v5850_v36  ;;  %vm2554_vm10 = vweird.f32 %v6744_v14 }
 0x312   :  { %6747 = vrcp.f32 %v7792_v54  ;;  %v2483_v39 = vpop.f32.mrf.mxu2  ;;  %v2282_v21 = vpop.f32.mrf.mxu0  ;;  %vm2555_vm12 = vmor %vm2553_vm11, %vm2554_vm10  ;;  %v2572_v5 = vand.u32 2147483647, %v7792_v54  ;;  %v2574_v13 = vand.u32 2147483648, %v7792_v54  ;;  %vm2568_vm15 = vweird.f32 %v7792_v54 }
 0x313   :  { %v2550_v56 = vsub.f32 1.0, %v2549_v43  ;;  %v2499_v18 = vadd.f32 %v2483_v39, %v2397_v37  ;;  %v2384_v52 = vpop.f32.mrf.mxu1  ;;  %v2296_v40 = vadd.f32 %v2282_v21, %v2194_v49  ;;  %v2196_v49 = vadd.f32 %v2185_v2, %v2094_v31  ;;  %v6527_v21 = vld [vmem:[#allocation7 + $0x20] sm:$0xff] }
 0x314   :  { %vm2573_vm1 = vcmp.eq.f32.partialorder %v2572_v5, 8.507059e+37  ;;  %v2575_v35 = vor.u32 1.1754944e-38, %v2574_v13  ;;  %2796 = vmatpush.bf16.msra.mxu3 %v6527_v21 }
 0x315   :  { %v2551_v38 = vmul.f32 %v6744_v14, %v2550_v56  ;;  %v2511_v1 = vadd.f32 %v7784_v8, %v2499_v18  ;;  %v2398_v6 = vadd.f32 %v2384_v52, %v2296_v40  ;;  %v2095_v40 = vadd.f32 %v7782_v26, %v1992_v50 }
 0x317   :  { %v6746_v0 = vpop.eup %6745  ;;  %v2552_v59 = vadd.f32 %v6744_v14, %v2551_v38  ;;  %v5851_v57 = vmul.f32 -1.442695, %v2511_v1 }
 0x318   :  { %v6748_v32 = vpop.eup %6747  ;;  %v7799_v7 = vadd.f32 1.0, %v6746_v0 }
 0x319   :  { %v2556_v63 = vsel %vm2555_vm12, %v6744_v14, %v2552_v59  ;;  %v2564_v47 = vmul.f32 %v6748_v32, %v7792_v54  ;;  %6749 = vpow2.f32 %v5851_v57  ;;  %vm2569_vm14 = vweird.f32 %v6748_v32 }
 0x31a   :  { %v2561_v11 = vsel %vm2558_vm13, %v2560_v15, %v2556_v63  ;;  %6751 = vrcp.f32 %v7799_v7  ;;  %v2486_v9 = vpop.f32.mrf.mxu2  ;;  %v2284_v10 = vpop.f32.mrf.mxu0  ;;  %vm2570_vm0 = vmor %vm2568_vm15, %vm2569_vm14  ;;  %v2587_v46 = vand.u32 2147483647, %v7799_v7  ;;  %v2589_v38 = vand.u32 2147483648, %v7799_v7 }
 0x31b   :  { %v2668_v42 = vmul.f32 %v2561_v11, %v7386_v4  ;;  %v2565_v20 = vsub.f32 1.0, %v2564_v47  ;;  %v2500_v23 = vadd.f32 %v2486_v9, %v2398_v6  ;;  %v2386_v16 = vpop.f32.mrf.mxu1  ;;  %v2297_v30 = vadd.f32 %v2284_v10, %v2195_v29  ;;  %v2187_v15 = vpop.f32.mrf.mxu3 }
 0x31c   :  { %vm2583_vm3 = vweird.f32 %v7799_v7  ;;  %vm2588_vm5 = vcmp.eq.f32.partialorder %v2587_v46, 8.507059e+37  ;;  %v2590_v59 = vor.u32 1.1754944e-38, %v2589_v38  ;;  %v2197_v11 = vadd.f32 %v2187_v15, %v2095_v40 }
 0x31d   :  { %2676 = vst.msk [vmem:[#allocation2 + $0x8] sm:$0xff] %vm808_vm7, %v2668_v42  ;;  %v2566_v45 = vmul.f32 %v6748_v32, %v2565_v20  ;;  %v2512_v61 = vadd.f32 %v7784_v8, %v2500_v23  ;;  %v2399_v37 = vadd.f32 %v2386_v16, %v2297_v30 }
 0x31f   :  { %v6750_v4 = vpop.eup %6749  ;;  %v2567_v24 = vadd.f32 %v6748_v32, %v2566_v45  ;;  %v5852_v53 = vmul.f32 -1.442695, %v2512_v61 }
 0x320   :  { %v6752_v34 = vpop.eup %6751  ;;  %v7812_v36 = vadd.f32 1.0, %v6750_v4 }
 0x321   :  { %v2571_v14 = vsel %vm2570_vm0, %v6748_v32, %v2567_v24  ;;  %v2579_v43 = vmul.f32 %v6752_v34, %v7799_v7  ;;  %6753 = vpow2.f32 %v5852_v53  ;;  %vm2584_vm2 = vweird.f32 %v6752_v34 }
 0x322   :  { %v2576_v39 = vsel %vm2573_vm1, %v2575_v35, %v2571_v14  ;;  %6755 = vrcp.f32 %v7812_v36  ;;  %v2488_v48 = vpop.f32.mrf.mxu2  ;;  %v2287_v52 = vpop.f32.mrf.mxu0  ;;  %vm2585_vm4 = vmor %vm2583_vm3, %vm2584_vm2  ;;  %v2602_v57 = vand.u32 2147483647, %v7812_v36  ;;  %v2604_v20 = vand.u32 2147483648, %v7812_v36 }
 0x323   :  { %v2669_v54 = vmul.f32 %v2576_v39, %v7403_v28  ;;  %v2580_v56 = vsub.f32 1.0, %v2579_v43  ;;  %v2501_v18 = vadd.f32 %v2488_v48, %v2399_v37  ;;  %v2298_v28 = vadd.f32 %v2287_v52, %v2196_v49  ;;  %v2389_v62 = vpop.f32.mrf.mxu1 }
 0x324   :  { %v2708_v6 = vld [vmem:[#allocation2 + $0x8] sm:$0xff]  ;;  %vm2598_vm6 = vweird.f32 %v7812_v36  ;;  %vm7834_vm9 = vcmp.eq.f32.partialorder %v2602_v57, 8.507059e+37  ;;  %v2605_v43 = vor.u32 1.1754944e-38, %v2604_v20 }
 0x325   :  { %2677 = vst.msk [vmem:[#allocation2 + $0x10] sm:$0xff] %vm808_vm7, %v2669_v54  ;;  %v2581_v1 = vmul.f32 %v6752_v34, %v2580_v56  ;;  %v2513_v17 = vadd.f32 %v7784_v8, %v2501_v18  ;;  %v2400_v47 = vadd.f32 %v2389_v62, %v2298_v28  ;;  %v2684_v22 = vld [vmem:[#allocation2 + $0x6] sm:$0xff]  ;;  %v2716_v16 = vpack.c.bf16 %v2708_v6, %v2708_v6 }
 0x326   :  { %v2692_v2 = vpack.c.bf16 %v2684_v22, %v2684_v22 }
 0x327   :  { %v6754_v0 = vpop.eup %6753  ;;  %v2582_v51 = vadd.f32 %v6752_v34, %v2581_v1  ;;  %v5853_v60 = vmul.f32 -1.442695, %v2513_v17  ;;  %v2741_v38 = vunpack.c.l.b16 %v2716_v16 }
 0x328   :  { %v6756_v25 = vpop.eup %6755  ;;  %v7827_v32 = vadd.f32 1.0, %v6754_v0 }
 0x329   :  { %v2586_v63 = vsel %vm2585_vm4, %v6752_v34, %v2582_v51  ;;  %v2594_v26 = vmul.f32 %v6756_v25, %v7812_v36  ;;  %6757 = vpow2.f32 %v5853_v60  ;;  %vm2599_vm8 = vweird.f32 %v6756_v25 }
 0x32a   :  { %v2591_v9 = vsel %vm2588_vm5, %v2590_v59, %v2586_v63  ;;  %6759 = vrcp.f32 %v7827_v32  ;;  %v2491_v7 = vpop.f32.mrf.mxu2  ;;  %v2289_v10 = vpop.f32.mrf.mxu0  ;;  %vm2600_vm10 = vmor %vm2598_vm6, %vm2599_vm8  ;;  %v2826_v36 = vunpack.c.l.b16 %v2692_v2  ;;  %v2619_v40 = vand.u32 2147483648, %v7827_v32 }
 0x32b   :  { %v2670_v29 = vmul.f32 %v2591_v9, %v7422_v58  ;;  %v2595_v42 = vsub.f32 1.0, %v2594_v26  ;;  %v2502_v23 = vadd.f32 %v2491_v7, %v2400_v47  ;;  %v2299_v30 = vadd.f32 %v2289_v10, %v2197_v11  ;;  %v2391_v54 = vpop.f32.mrf.mxu1 }
 0x32c   :  { %v2709_v13 = vld [vmem:[#allocation2 + $0x10] sm:$0xff]  ;;  %vm2613_vm12 = vweird.f32 %v7827_v32  ;;  %v2620_v26 = vor.u32 1.1754944e-38, %v2619_v40 }
 0x32d   :  { %v2685_v45 = vld [vmem:[#allocation2 + $0xe] sm:$0xff]  ;;  %2678 = vst.msk [vmem:[#allocation2 + $0x28] sm:$0xff] %vm808_vm7, %v2670_v29  ;;  %v2596_v58 = vmul.f32 %v6756_v25, %v2595_v42  ;;  %v2514_v55 = vadd.f32 %v7784_v8, %v2502_v23  ;;  %v2717_v4 = vpack.c.bf16 %v2709_v13, %v2709_v13  ;;  %v2401_v12 = vadd.f32 %v2391_v54, %v2299_v30 }
 0x32e   :  { %v2903_v61 = vld [vmem:[#allocation2 + $0xa] sm:$0xff]  ;;  %v2904_v31 = vld [vmem:[#allocation2 + $0x12] sm:$0xff]  ;;  %v2693_v24 = vpack.c.bf16 %v2685_v45, %v2685_v45 }
 0x32f   :  { %v2911_v53 = vpack.c.bf16 %v2903_v61, %v2903_v61  ;;  %v2912_v34 = vpack.c.bf16 %v2904_v31, %v2904_v31  ;;  %v6758_v35 = vpop.eup %6757  ;;  %v2597_v14 = vadd.f32 %v6756_v25, %v2596_v58  ;;  %v5854_v37 = vmul.f32 -1.442695, %v2514_v55 }
 0x330   :  { %v2742_v39 = vunpack.c.l.b16 %v2717_v4  ;;  %v6760_v48 = vpop.eup %6759  ;;  %v7843_v49 = vadd.f32 1.0, %v6758_v35  ;;  %v2827_v56 = vunpack.c.l.b16 %v2693_v24 }
 0x331   :  { %v2936_v18 = vunpack.c.l.b16 %v2911_v53  ;;  %v2937_v21 = vunpack.c.l.b16 %v2912_v34  ;;  %v2601_v52 = vsel %vm2600_vm10, %v6756_v25, %v2597_v14  ;;  %v2609_v41 = vmul.f32 %v6760_v48, %v7827_v32 }
 0x332   :  { %6761 = vpow2.f32 %v5854_v37  ;;  %v2606_v50 = vsel %vm7834_vm9, %v2605_v43, %v2601_v52  ;;  %v2493_v46 = vpop.f32.mrf.mxu2  ;;  %v2749_v62 = vpack.c.b16 %v2742_v39, %v2741_v38  ;;  %v2834_v0 = vpack.c.b16 %v2827_v56, %v2826_v36 }
 0x333   :  { %6763 = vrcp.f32 %v7843_v49  ;;  %v2671_v1 = vmul.f32 %v2606_v50, %v7444_v19  ;;  %v2610_v17 = vsub.f32 1.0, %v2609_v41  ;;  %v2503_v28 = vadd.f32 %v2493_v46, %v2401_v12 }
 0x334   :  { %v2944_v51 = vpack.c.b16 %v2937_v21, %v2936_v18  ;;  %vm2614_vm11 = vweird.f32 %v6760_v48  ;;  %v2617_v25 = vand.u32 2147483647, %v7827_v32  ;;  %5872 = vmatmul.msk.bf16.vlgmr.msra.gmra.mxu3 %vm808_vm7, %v2749_v62  ;;  %5892 = vmatmul.msk.bf16.vlgmr.msrb.gmra.mxu0 %vm808_vm7, %v2834_v0  ;;  %v2710_v11 = vld [vmem:[#allocation2 + $0x28] sm:$0xff]  ;;  %v2634_v42 = vand.u32 2147483648, %v7843_v49 }
 0x335   :  { %2679 = vst.msk [vmem:[#allocation2 + $0x30] sm:$0xff] %vm808_vm7, %v2671_v1  ;;  %v2611_v60 = vmul.f32 %v6760_v48, %v2610_v17  ;;  %v2515_v59 = vadd.f32 %v7784_v8, %v2503_v28  ;;  %vm2615_vm13 = vmor %vm2613_vm12, %vm2614_vm11  ;;  %v2686_v9 = vld [vmem:[#allocation2 + $0x26] sm:$0xff]  ;;  %v2632_v20 = vand.u32 2147483647, %v7843_v49  ;;  %v2718_v10 = vpack.c.bf16 %v2710_v11, %v2710_v11 }
 0x336   :  { %5912 = vmatmul.msk.bf16.vlgmr.msrb.gmra.mxu1 %vm808_vm7, %v2944_v51  ;;  %vm2618_vm14 = vcmp.eq.f32.partialorder %v2617_v25, 8.507059e+37  ;;  %v2694_v5 = vpack.c.bf16 %v2686_v9, %v2686_v9  ;;  %vm2628_vm0 = vweird.f32 %v7843_v49  ;;  %v2635_v31 = vor.u32 1.1754944e-38, %v2634_v42 }
 0x337   :  { %v2612_v57 = vadd.f32 %v6760_v48, %v2611_v60  ;;  %v5855_v15 = vmul.f32 -1.442695, %v2515_v59  ;;  %v2743_v35 = vunpack.c.l.b16 %v2718_v10  ;;  %vm2633_vm2 = vcmp.eq.f32.partialorder %v2632_v20, 8.507059e+37 }
 0x338   :  { %v6762_v19 = vpop.eup %6761 }
 0x339   :  { %v6764_v63 = vpop.eup %6763  ;;  %v7858_v47 = vadd.f32 1.0, %v6762_v19  ;;  %v2616_v6 = vsel %vm2615_vm13, %v6760_v48, %v2612_v57  ;;  %6765 = vpow2.f32 %v5855_v15  ;;  %v2828_v48 = vunpack.c.l.b16 %v2694_v5 }
 0x33a   :  { %v2624_v8 = vmul.f32 %v6764_v63, %v7843_v49  ;;  %v2621_v7 = vsel %vm2618_vm14, %v2620_v26, %v2616_v6  ;;  %vm2629_vm15 = vweird.f32 %v6764_v63 }
 0x33b   :  { %6767 = vrcp.f32 %v7858_v47  ;;  %v2672_v32 = vmul.f32 %v2621_v7, %v7493_v3  ;;  %vm2630_vm1 = vmor %vm2628_vm0, %vm2629_vm15  ;;  %v2649_v52 = vand.u32 2147483648, %v7858_v47  ;;  %v2647_v50 = vand.u32 2147483647, %v7858_v47 }
 0x33c   :  { %v2625_v29 = vsub.f32 1.0, %v2624_v8  ;;  %v2711_v23 = vld [vmem:[#allocation2 + $0x30] sm:$0xff]  ;;  %vm2643_vm4 = vweird.f32 %v7858_v47 }
 0x33d   :  { %v2687_v22 = vld [vmem:[#allocation2 + $0x2e] sm:$0xff]  ;;  %2680 = vst.msk [vmem:[#allocation2 + $0x48] sm:$0xff] %vm808_vm7, %v2672_v32  ;;  %v2719_v45 = vpack.c.bf16 %v2711_v23, %v2711_v23  ;;  %v2650_v38 = vor.u32 1.1754944e-38, %v2649_v52  ;;  %vm2648_vm6 = vcmp.eq.f32.partialorder %v2647_v50, 8.507059e+37 }
 0x33e   :  { %v2905_v13 = vld [vmem:[#allocation2 + $0x2a] sm:$0xff]  ;;  %v2626_v16 = vmul.f32 %v6764_v63, %v2625_v29  ;;  %v2695_v61 = vpack.c.bf16 %v2687_v22, %v2687_v22  ;;  %v2906_v58 = vld [vmem:[#allocation2 + $0x32] sm:$0xff] }
 0x33f   :  { %v2913_v3 = vpack.c.bf16 %v2905_v13, %v2905_v13  ;;  %v2914_v55 = vpack.c.bf16 %v2906_v58, %v2906_v58  ;;  %v6766_v30 = vpop.eup %6765  ;;  %v2744_v2 = vunpack.c.l.b16 %v2719_v45 }
 0x340   :  { %v2627_v4 = vadd.f32 %v6764_v63, %v2626_v16  ;;  %v2829_v24 = vunpack.c.l.b16 %v2695_v61  ;;  %v7867_v34 = vadd.f32 1.0, %v6766_v30 }
 0x341   :  { %v6768_v53 = vpop.eup %6767  ;;  %v2938_v14 = vunpack.c.l.b16 %v2913_v3  ;;  %v2939_v43 = vunpack.c.l.b16 %v2914_v55  ;;  %v2750_v54 = vpack.c.b16 %v2744_v2, %v2743_v35 }
 0x342   :  { %v2631_v37 = vsel %vm2630_vm1, %v6764_v63, %v2627_v4  ;;  %v2639_v39 = vmul.f32 %v6768_v53, %v7858_v47  ;;  %6769 = vrcp.f32 %v7867_v34  ;;  %v2835_v21 = vpack.c.b16 %v2829_v24, %v2828_v48 }
 0x343   :  { %v2636_v49 = vsel %vm2633_vm2, %v2635_v31, %v2631_v37  ;;  %v2945_v41 = vpack.c.b16 %v2939_v43, %v2938_v14  ;;  %vm2644_vm3 = vweird.f32 %v6768_v53  ;;  %v2662_v51 = vand.u32 2147483647, %v7867_v34 }
 0x344   :  { %v2673_v56 = vmul.f32 %v2636_v49, %v7527_v44  ;;  %v2640_v18 = vsub.f32 1.0, %v2639_v39  ;;  %5873 = vmatmul.msk.bf16.gmra.mxu3 %vm808_vm7, %v2750_v54  ;;  %5893 = vmatmul.msk.bf16.gmra.mxu0 %vm808_vm7, %v2835_v21  ;;  %vm2645_vm5 = vmor %vm2643_vm4, %vm2644_vm3  ;;  %v2712_v17 = vld [vmem:[#allocation2 + $0x48] sm:$0xff]  ;;  %v2664_v60 = vand.u32 2147483648, %v7867_v34  ;;  %vm2658_vm9 = vweird.f32 %v7867_v34  ;;  %v6542_v21 = vld [vmem:[%s8560_s5 + $0x38] sm:$0xff] }
 0x345   :  { %v2688_v28 = vld [vmem:[#allocation2 + $0x46] sm:$0xff]  ;;  %v2720_v59 = vpack.c.bf16 %v2712_v17, %v2712_v17  ;;  %vm2663_vm11 = vcmp.eq.f32.partialorder %v2662_v51, 8.507059e+37  ;;  %3439 = vmatpush.bf16.msrb.mxu3 %v6542_v21  ;;  %v6549_v17 = vld [vmem:[%s8560_s5 + $0x70] sm:$0xff] }
 0x346   :  { %2681 = vst.msk [vmem:[#allocation2 + $0x50] sm:$0xff] %vm808_vm7, %v2673_v56  ;;  %v2641_v12 = vmul.f32 %v6768_v53, %v2640_v18  ;;  %5913 = vmatmul.msk.bf16.gmra.mxu1 %vm808_vm7, %v2945_v41  ;;  %v2696_v57 = vpack.c.bf16 %v2688_v28, %v2688_v28  ;;  %v2665_v29 = vor.u32 1.1754944e-38, %v2664_v60  ;;  %v6550_v18 = vld [vmem:[%s8560_s5 + $0x78] sm:$0xff]  ;;  %v6541_v28 = vld [vmem:[%s8560_s5 + $0x30] sm:$0xff] }
 0x347   :  { %v2745_v42 = vunpack.c.l.b16 %v2720_v59  ;;  %3338 = vmatpush.bf16.msrb.mxu2 %v6550_v18  ;;  %v6537_v18 = vld [vmem:[%s8560_s5 + $0x10] sm:$0xff] }
 0x348   :  { %v2642_v46 = vadd.f32 %v6768_v53, %v2641_v12  ;;  %v6770_v44 = vpop.eup %6769  ;;  %v2830_v20 = vunpack.c.l.b16 %v2696_v57  ;;  %v6553_v21 = vld [vmem:[%s8560_s5 + $0x90] sm:$0xff] }
 0x349   :  { %v2654_v1 = vmul.f32 %v6770_v44, %v7867_v34  ;;  %vm2659_vm8 = vweird.f32 %v6770_v44  ;;  %3440 = vmatpush.bf16.msrb.mxu3 %v6541_v28 }
 0x34a   :  { %v2646_v36 = vsel %vm2645_vm5, %v6768_v53, %v2642_v46  ;;  %vm2660_vm10 = vmor %vm2658_vm9, %vm2659_vm8  ;;  %v7900_v46 = vld [vmem:[#allocation14 + $0x3] ss:$0 sm:$0xff] }
 0x34b   :  { %v2651_v40 = vsel %vm2648_vm6, %v2650_v38, %v2646_v36  ;;  %v2655_v0 = vsub.f32 1.0, %v2654_v1  ;;  %3339 = vmatpush.bf16.msrb.mxu2 %v6549_v17 }
 0x34c   :  { %v2674_v62 = vmul.f32 %v2651_v40, %v7550_v27  ;;  %v6558_v40 = vld [vmem:[%s8560_s5 + $0xb8] sm:$0xff] }
 0x34d   :  { %v2713_v25 = vld [vmem:[#allocation2 + $0x50] sm:$0xff]  ;;  %v2656_v63 = vmul.f32 %v6770_v44, %v2655_v0  ;;  %3573 = vmatpush.bf16.msra.mxu0 %v6558_v40  ;;  %v6536_v40 = vld [vmem:[%s8560_s5 + $0x8] sm:$0xff] }
 0x34e   :  { %v2689_v19 = vld [vmem:[#allocation2 + $0x4e] sm:$0xff]  ;;  %2682 = vst.msk [vmem:[#allocation2 + $0x68] sm:$0xff] %vm808_vm7, %v2674_v62  ;;  %v2721_v26 = vpack.c.bf16 %v2713_v25, %v2713_v25 }
 0x34f   :  { %v2907_v15 = vld [vmem:[#allocation2 + $0x4a] sm:$0xff]  ;;  %v2697_v47 = vpack.c.bf16 %v2689_v19, %v2689_v19  ;;  %v2908_v6 = vld [vmem:[#allocation2 + $0x52] sm:$0xff]  ;;  %v2657_v11 = vadd.f32 %v6770_v44, %v2656_v63 }
 0x350   :  { %v2915_v8 = vpack.c.bf16 %v2907_v15, %v2907_v15  ;;  %v2916_v27 = vpack.c.bf16 %v2908_v6, %v2908_v6  ;;  %v2746_v9 = vunpack.c.l.b16 %v2721_v26  ;;  %v6548_v19 = vld [vmem:[%s8560_s5 + $0x68] sm:$0xff]  ;;  %v6557_v63 = vld [vmem:[%s8560_s5 + $0xb0] sm:$0xff] }
 0x351   :  { %v2831_v7 = vunpack.c.l.b16 %v2697_v47  ;;  %v2661_v10 = vsel %vm2660_vm10, %v6770_v44, %v2657_v11  ;;  %v6540_v15 = vld [vmem:[%s8560_s5 + $0x28] sm:$0xff]  ;;  %3340 = vmatpush.bf16.msrb.mxu2 %v6548_v19  ;;  %3574 = vmatpush.bf16.msra.mxu0 %v6557_v63 }
 0x352   :  { %v2940_v32 = vunpack.c.l.b16 %v2915_v8  ;;  %v2941_v23 = vunpack.c.l.b16 %v2916_v27  ;;  %v2666_v22 = vsel %vm2663_vm11, %v2665_v29, %v2661_v10  ;;  %v2751_v5 = vpack.c.b16 %v2746_v9, %v2745_v42  ;;  %3441 = vmatpush.bf16.msrb.mxu3 %v6540_v15  ;;  %v6547_v27 = vld [vmem:[%s8560_s5 + $0x60] sm:$0xff]  ;;  %v6556_v29 = vld [vmem:[%s8560_s5 + $0xa8] sm:$0xff]  ;;  %v6546_v42 = vld [vmem:[%s8560_s5 + $0x58] sm:$0xff] }
 0x353   :  { %v2836_v13 = vpack.c.b16 %v2831_v7, %v2830_v20  ;;  %v2675_v16 = vmul.f32 %v2666_v22, %v7558_v33 }
 0x354   :  { %v2946_v45 = vpack.c.b16 %v2941_v23, %v2940_v32  ;;  %5874 = vmatmul.msk.bf16.gmra.mxu3 %vm808_vm7, %v2751_v5  ;;  %v6539_v23 = vld [vmem:[%s8560_s5 + $0x20] sm:$0xff] }
 0x355   :  { %2683 = vst.msk [vmem:[#allocation2 + $0x70] sm:$0xff] %vm808_vm7, %v2675_v16  ;;  %5894 = vmatmul.msk.bf16.gmra.mxu0 %vm808_vm7, %v2836_v13  ;;  %v2714_v61 = vld [vmem:[#allocation2 + $0x68] sm:$0xff]  ;;  %3341 = vmatpush.bf16.msrb.mxu2 %v6547_v27 }
 0x356   :  { %5914 = vmatmul.msk.bf16.gmra.mxu1 %vm808_vm7, %v2946_v45  ;;  %v2690_v58 = vld [vmem:[#allocation2 + $0x66] sm:$0xff]  ;;  %v2722_v55 = vpack.c.bf16 %v2714_v61, %v2714_v61  ;;  %3575 = vmatpush.bf16.msra.mxu0 %v6556_v29  ;;  %v6545_v61 = vld [vmem:[%s8560_s5 + $0x50] sm:$0xff] }
 0x357   :  { %v2698_v4 = vpack.c.bf16 %v2690_v58, %v2690_v58  ;;  %3442 = vmatpush.bf16.msrb.mxu3 %v6539_v23  ;;  %v6555_v45 = vld [vmem:[%s8560_s5 + $0xa0] sm:$0xff] }
 0x358   :  { %v2747_v37 = vunpack.c.l.b16 %v2722_v55 }
 0x359   :  { %v2832_v39 = vunpack.c.l.b16 %v2698_v4  ;;  %3342 = vmatpush.bf16.msrb.mxu2 %v6546_v42 }
 0x35a   :  { %3576 = vmatpush.bf16.msra.mxu0 %v6555_v45 }
 0x35c   :  { %v2715_v3 = vld [vmem:[#allocation2 + $0x70] sm:$0xff] }
 0x35d   :  { %v2691_v30 = vld [vmem:[#allocation2 + $0x6e] sm:$0xff]  ;;  %v2723_v2 = vpack.c.bf16 %v2715_v3, %v2715_v3  ;;  %3343 = vmatpush.bf16.msrb.mxu2 %v6545_v61 }
 0x35e   :  { %v2909_v31 = vld [vmem:[#allocation2 + $0x6a] sm:$0xff]  ;;  %v2699_v24 = vpack.c.bf16 %v2691_v30, %v2691_v30  ;;  %v2910_v53 = vld [vmem:[#allocation2 + $0x72] sm:$0xff] }
 0x35f   :  { %v2917_v33 = vpack.c.bf16 %v2909_v31, %v2909_v31  ;;  %v2918_v34 = vpack.c.bf16 %v2910_v53, %v2910_v53  ;;  %v2748_v35 = vunpack.c.l.b16 %v2723_v2  ;;  %v6554_v53 = vld [vmem:[%s8560_s5 + $0x98] sm:$0xff] }
 0x360   :  { %v2833_v14 = vunpack.c.l.b16 %v2699_v24  ;;  %v6538_v24 = vld [vmem:[%s8560_s5 + $0x18] sm:$0xff]  ;;  %3577 = vmatpush.bf16.msra.mxu0 %v6554_v53 }
 0x361   :  { %v2942_v43 = vunpack.c.l.b16 %v2917_v33  ;;  %v2943_v48 = vunpack.c.l.b16 %v2918_v34  ;;  %v2752_v49 = vpack.c.b16 %v2748_v35, %v2747_v37  ;;  %v6544_v33 = vld [vmem:[%s8560_s5 + $0x48] sm:$0xff]  ;;  %3443 = vmatpush.bf16.msrb.mxu3 %v6538_v24 }
 0x362   :  { %v2837_v54 = vpack.c.b16 %v2833_v14, %v2832_v39  ;;  %3344 = vmatpush.bf16.msrb.mxu2 %v6544_v33 }
 0x363   :  { %v2947_v56 = vpack.c.b16 %v2943_v48, %v2942_v43 }
 0x364   :  { %5875 = vmatmul.msk.bf16.gmra.mxu3 %vm808_vm7, %v2752_v49  ;;  %3578 = vmatpush.bf16.msra.mxu0 %v6553_v21 }
 0x365   :  { %5895 = vmatmul.msk.bf16.gmra.mxu0 %vm808_vm7, %v2837_v54  ;;  %3444 = vmatpush.bf16.msrb.mxu3 %v6537_v18 }
 0x366   :  { %5915 = vmatmul.msk.bf16.gmra.mxu1 %vm808_vm7, %v2947_v56 }
 0x369   :  { %3445 = vmatpush.bf16.msrb.mxu3 %v6536_v40 }
 0x3b1   :  { %v2883_v52 = vpop.f32.mrf.mxu0 }
 0x3b3   :  { %v2993_v41 = vpop.f32.mrf.mxu1 }
 0x3b7   :  { %v2798_v12 = vpop.f32.mrf.mxu3 }
 0x3b8   :  { %v2884_v50 = vadd.f32 %v2883_v52, %v2798_v12  ;;  %v6543_v52 = vld [vmem:[%s8560_s5 + $0x40] sm:$0xff] }
 0x3b9   :  { %v2885_v44 = vpop.f32.mrf.mxu0  ;;  %3345 = vmatpush.bf16.msrb.mxu2 %v6543_v52 }
 0x3ba   :  { %v3013_v38 = vadd.f32 %v2993_v41, %v2884_v50 }
 0x3bb   :  { %v2995_v36 = vpop.f32.mrf.mxu1 }
 0x3bc   :  { %v7903_v1 = vadd.f32 %v7900_v46, %v3013_v38 }
 0x3be   :  { %v5916_v62 = vmul.f32 -1.442695, %v7903_v1 }
 0x3bf   :  { %v2800_v0 = vpop.f32.mrf.mxu3 }
 0x3c0   :  { %6771 = vpow2.f32 %v5916_v62  ;;  %v2886_v51 = vadd.f32 %v2885_v44, %v2800_v0  ;;  %v6552_v62 = vld [vmem:[%s8560_s5 + $0x88] sm:$0xff] }
 0x3c1   :  { %v2888_v60 = vpop.f32.mrf.mxu0  ;;  %3579 = vmatpush.bf16.msra.mxu0 %v6552_v62 }
 0x3c2   :  { %v3014_v25 = vadd.f32 %v2995_v36, %v2886_v51 }
 0x3c3   :  { %v2998_v59 = vpop.f32.mrf.mxu1 }
 0x3c4   :  { %v7919_v57 = vadd.f32 %v7900_v46, %v3014_v25 }
 0x3c6   :  { %v6772_v26 = vpop.eup %6771  ;;  %v5917_v47 = vmul.f32 -1.442695, %v7919_v57 }
 0x3c7   :  { %v3057_v6 = vadd.f32 1.0, %v6772_v26  ;;  %v2803_v8 = vpop.f32.mrf.mxu3 }
 0x3c8   :  { %6773 = vpow2.f32 %v5917_v47  ;;  %v2889_v11 = vadd.f32 %v2888_v60, %v2803_v8  ;;  %v6551_v8 = vld [vmem:[%s8560_s5 + $0x80] sm:$0xff] }
 0x3c9   :  { %6775 = vrcp.f32 %v3057_v6  ;;  %v2890_v9 = vpop.f32.mrf.mxu0  ;;  %v3076_v31 = vand.u32 2147483648, %v3057_v6  ;;  %v3074_v35 = vand.u32 2147483647, %v3057_v6  ;;  %vm3070_vm13 = vweird.f32 %v3057_v6  ;;  %3580 = vmatpush.bf16.msra.mxu0 %v6551_v8 }
 0x3ca   :  { %v3015_v7 = vadd.f32 %v2998_v59, %v2889_v11 }
 0x3cb   :  { %v3000_v32 = vpop.f32.mrf.mxu1  ;;  %v3077_v49 = vor.u32 1.1754944e-38, %v3076_v31  ;;  %vm3075_vm15 = vcmp.eq.f32.partialorder %v3074_v35, 8.507059e+37 }
 0x3cc   :  { %v7938_v20 = vadd.f32 %v7900_v46, %v3015_v7 }
 0x3ce   :  { %v6774_v10 = vpop.eup %6773  ;;  %v5918_v22 = vmul.f32 -1.442695, %v7938_v20 }
 0x3cf   :  { %v6776_v5 = vpop.eup %6775  ;;  %v7944_v13 = vadd.f32 1.0, %v6774_v10  ;;  %v2805_v16 = vpop.f32.mrf.mxu3 }
 0x3d0   :  { %v3066_v58 = vmul.f32 %v6776_v5, %v3057_v6  ;;  %6777 = vpow2.f32 %v5918_v22  ;;  %v2891_v3 = vadd.f32 %v2890_v9, %v2805_v16  ;;  %vm3071_vm12 = vweird.f32 %v6776_v5  ;;  %v6535_v6 = vld [vmem:[%s8560_s5] sm:$0xff] }
 0x3d1   :  { %6779 = vrcp.f32 %v7944_v13  ;;  %vm3072_vm14 = vmor %vm3070_vm13, %vm3071_vm12  ;;  %v3091_v17 = vand.u32 2147483648, %v7944_v13  ;;  %v3089_v51 = vand.u32 2147483647, %v7944_v13  ;;  %vm3085_vm1 = vweird.f32 %v7944_v13  ;;  %3446 = vmatpush.bf16.msrb.mxu3 %v6535_v6 }
 0x3d2   :  { %v2893_v55 = vpop.f32.mrf.mxu0  ;;  %v3067_v30 = vsub.f32 1.0, %v3066_v58  ;;  %v3016_v4 = vadd.f32 %v3000_v32, %v2891_v3 }
 0x3d3   :  { %v3003_v2 = vpop.f32.mrf.mxu1  ;;  %v3092_v63 = vor.u32 1.1754944e-38, %v3091_v17  ;;  %vm3090_vm3 = vcmp.eq.f32.partialorder %v3089_v51, 8.507059e+37 }
 0x3d4   :  { %v3068_v34 = vmul.f32 %v6776_v5, %v3067_v30  ;;  %v7963_v14 = vadd.f32 %v7900_v46, %v3016_v4 }
 0x3d6   :  { %v6778_v43 = vpop.eup %6777  ;;  %v3069_v37 = vadd.f32 %v6776_v5, %v3068_v34  ;;  %v5919_v39 = vmul.f32 -1.442695, %v7963_v14 }
 0x3d7   :  { %v6780_v48 = vpop.eup %6779  ;;  %v7966_v54 = vadd.f32 1.0, %v6778_v43  ;;  %v2808_v56 = vpop.f32.mrf.mxu3 }
 0x3d8   :  { %v3073_v41 = vsel %vm3072_vm14, %v6776_v5, %v3069_v37  ;;  %v3081_v12 = vmul.f32 %v6780_v48, %v7944_v13  ;;  %6781 = vpow2.f32 %v5919_v39  ;;  %v2894_v36 = vadd.f32 %v2893_v55, %v2808_v56 }
 0x3d9   :  { %v3078_v50 = vsel %vm3075_vm15, %v3077_v49, %v3073_v41  ;;  %6783 = vrcp.f32 %v7966_v54  ;;  %vm3086_vm0 = vweird.f32 %v6780_v48  ;;  %v3106_v42 = vand.u32 2147483648, %v7966_v54 }
 0x3da   :  { %v3185_v44 = vmul.f32 %v3078_v50, %v7903_v1  ;;  %v3082_v38 = vsub.f32 1.0, %v3081_v12  ;;  %v2895_v28 = vpop.f32.mrf.mxu0  ;;  %v3017_v1 = vadd.f32 %v3003_v2, %v2894_v36  ;;  %vm3087_vm2 = vmor %vm3085_vm1, %vm3086_vm0  ;;  %v3104_v5 = vand.u32 2147483647, %v7966_v54 }
 0x3db   :  { %v3005_v60 = vpop.f32.mrf.mxu1  ;;  %vm3100_vm5 = vweird.f32 %v7966_v54 }
 0x3dc   :  { %3193 = vst [vmem:[#allocation2 + $0x8] sm:$0xff] %v3185_v44  ;;  %v3083_v0 = vmul.f32 %v6780_v48, %v3082_v38  ;;  %v7990_v19 = vadd.f32 %v7900_v46, %v3017_v1  ;;  %v3241_v10 = vpack.c.bf16 %v3185_v44, %v3185_v44  ;;  %vm3105_vm8 = vcmp.eq.f32.partialorder %v3104_v5, 8.507059e+37 }
 0x3de   :  { %v6782_v25 = vpop.eup %6781  ;;  %v3084_v59 = vadd.f32 %v6780_v48, %v3083_v0  ;;  %v5920_v9 = vmul.f32 -1.442695, %v7990_v19  ;;  %v3274_v31 = vunpack.c.l.b16 %v3241_v10 }
 0x3df   :  { %v6784_v15 = vpop.eup %6783  ;;  %v7992_v26 = vadd.f32 1.0, %v6782_v25  ;;  %v2810_v47 = vpop.f32.mrf.mxu3 }
 0x3e0   :  { %v3088_v27 = vsel %vm3087_vm2, %v6780_v48, %v3084_v59  ;;  %v3096_v11 = vmul.f32 %v6784_v15, %v7966_v54  ;;  %v2896_v23 = vadd.f32 %v2895_v28, %v2810_v47  ;;  %vm3101_vm4 = vweird.f32 %v6784_v15 }
 0x3e1   :  { %v3093_v7 = vsel %vm3090_vm3, %v3092_v63, %v3088_v27  ;;  %6785 = vrcp.f32 %v7992_v26  ;;  %vm3102_vm6 = vmor %vm3100_vm5, %vm3101_vm4  ;;  %v3119_v18 = vand.u32 2147483647, %v7992_v26  ;;  %v3121_v21 = vand.u32 2147483648, %v7992_v26 }
 0x3e2   :  { %v3186_v32 = vmul.f32 %v3093_v7, %v7919_v57  ;;  %v3097_v29 = vsub.f32 1.0, %v3096_v11  ;;  %6787 = vpow2.f32 %v5920_v9  ;;  %v3018_v16 = vadd.f32 %v3005_v60, %v2896_v23  ;;  %v2898_v45 = vpop.f32.mrf.mxu0 }
 0x3e3   :  { %v3107_v57 = vor.u32 1.1754944e-38, %v3106_v42  ;;  %v3008_v30 = vpop.f32.mrf.mxu1  ;;  %v3201_v2 = vld [vmem:[#allocation2 + $0x4] sm:$0xff]  ;;  %vm3115_vm10 = vweird.f32 %v7992_v26  ;;  %vm3120_vm12 = vcmp.eq.f32.partialorder %v3119_v18, 8.507059e+37  ;;  %v3122_v40 = vor.u32 1.1754944e-38, %v3121_v21 }
 0x3e4   :  { %3194 = vst [vmem:[#allocation2 + $0x10] sm:$0xff] %v3186_v32  ;;  %v3098_v22 = vmul.f32 %v6784_v15, %v3097_v29  ;;  %v3242_v13 = vpack.c.bf16 %v3186_v32, %v3186_v32  ;;  %v8008_v55 = vadd.f32 %v7900_v46, %v3018_v16  ;;  %v3209_v56 = vpack.c.bf16 %v3201_v2, %v3201_v2 }
 0x3e6   :  { %v3099_v61 = vadd.f32 %v6784_v15, %v3098_v22  ;;  %v3275_v58 = vunpack.c.l.b16 %v3242_v13  ;;  %v5921_v37 = vmul.f32 -1.442695, %v8008_v55  ;;  %v3375_v17 = vunpack.c.l.b16 %v3209_v56 }
 0x3e7   :  { %v6786_v3 = vpop.eup %6785  ;;  %v2813_v4 = vpop.f32.mrf.mxu3 }
 0x3e8   :  { %v6788_v24 = vpop.eup %6787  ;;  %v3103_v53 = vsel %vm3102_vm6, %v6784_v15, %v3099_v61  ;;  %v3111_v33 = vmul.f32 %v6786_v3, %v7992_v26  ;;  %v2899_v34 = vadd.f32 %v2898_v45, %v2813_v4  ;;  %v3282_v39 = vpack.c.b16 %v3275_v58, %v3274_v31 }
 0x3e9   :  { %v3108_v35 = vsel %vm3105_vm8, %v3107_v57, %v3103_v53  ;;  %v8011_v43 = vadd.f32 1.0, %v6788_v24  ;;  %vm3116_vm9 = vweird.f32 %v6786_v3 }
 0x3ea   :  { %v3187_v48 = vmul.f32 %v3108_v35, %v7938_v20  ;;  %v3112_v49 = vsub.f32 1.0, %v3111_v33  ;;  %v3019_v54 = vadd.f32 %v3008_v30, %v2899_v34  ;;  %3346 = vmatmul.bf16.vlgmr.msrb.gmra.mxu2 %v3282_v39  ;;  %vm3117_vm11 = vmor %vm3115_vm10, %vm3116_vm9  ;;  %v2900_v62 = vpop.f32.mrf.mxu0 }
 0x3eb   :  { %6789 = vrcp.f32 %v8011_v43  ;;  %v3202_v52 = vld [vmem:[#allocation2 + $0xc] sm:$0xff]  ;;  %v3469_v41 = vld [vmem:[#allocation2 + $0x14] sm:$0xff]  ;;  %v3010_v63 = vpop.f32.mrf.mxu1  ;;  %v3134_v42 = vand.u32 2147483647, %v8011_v43  ;;  %v3136_v23 = vand.u32 2147483648, %v8011_v43  ;;  %vm3130_vm14 = vweird.f32 %v8011_v43 }
 0x3ec   :  { %3195 = vst [vmem:[#allocation2 + $0x28] sm:$0xff] %v3187_v48  ;;  %v3113_v12 = vmul.f32 %v6786_v3, %v3112_v49  ;;  %6791 = vpow2.f32 %v5921_v37  ;;  %v8019_v50 = vadd.f32 %v7900_v46, %v3019_v54  ;;  %v3210_v20 = vpack.c.bf16 %v3202_v52, %v3202_v52 }
 0x3ed   :  { %v3477_v44 = vpack.c.bf16 %v3469_v41, %v3469_v41  ;;  %v3243_v47 = vpack.c.bf16 %v3187_v48, %v3187_v48  ;;  %v3137_v58 = vor.u32 1.1754944e-38, %v3136_v23  ;;  %vm3135_vm0 = vcmp.eq.f32.partialorder %v3134_v42, 8.507059e+37 }
 0x3ee   :  { %v3114_v38 = vadd.f32 %v6786_v3, %v3113_v12  ;;  %v5922_v36 = vmul.f32 -1.442695, %v8019_v50  ;;  %v3376_v28 = vunpack.c.l.b16 %v3210_v20 }
 0x3ef   :  { %v2815_v0 = vpop.f32.mrf.mxu3  ;;  %v3510_v51 = vunpack.c.l.b16 %v3477_v44  ;;  %v3276_v10 = vunpack.c.l.b16 %v3243_v47 }
 0x3f0   :  { %v3118_v1 = vsel %vm3117_vm11, %v6786_v3, %v3114_v38  ;;  %6793 = vpow2.f32 %v5922_v36  ;;  %v2901_v60 = vadd.f32 %v2900_v62, %v2815_v0  ;;  %v3383_v25 = vpack.c.b16 %v3376_v28, %v3375_v17 }
 0x3f1   :  { %v6790_v59 = vpop.eup %6789  ;;  %v3123_v15 = vsel %vm3120_vm12, %v3122_v40, %v3118_v1  ;;  %v3517_v26 = vpack.c.b16 %v3510_v51, %v3376_v28 }
 0x3f2   :  { %v6792_v6 = vpop.eup %6791  ;;  %v3188_v8 = vmul.f32 %v3123_v15, %v7963_v14  ;;  %v3126_v27 = vmul.f32 %v6790_v59, %v8011_v43  ;;  %v3020_v11 = vadd.f32 %v3010_v63, %v2901_v60  ;;  %3447 = vmatmul.bf16.vlgmr.msrb.gmra.mxu3 %v3383_v25  ;;  %vm3131_vm13 = vweird.f32 %v6790_v59 }
 0x3f3   :  { %v3062_v9 = vadd.f32 1.0, %v6792_v6  ;;  %3581 = vmatmul.bf16.vlgmr.msra.gmra.mxu0 %v3517_v26  ;;  %v3203_v45 = vld [vmem:[#allocation2 + $0x24] sm:$0xff]  ;;  %vm3132_vm15 = vmor %vm3130_vm14, %vm3131_vm13 }
 0x3f4   :  { %3196 = vst [vmem:[#allocation2 + $0x30] sm:$0xff] %v3188_v8  ;;  %v3127_v7 = vsub.f32 1.0, %v3126_v27  ;;  %v8027_v32 = vadd.f32 %v7900_v46, %v3020_v11  ;;  %v3244_v29 = vpack.c.bf16 %v3188_v8, %v3188_v8  ;;  %v3211_v57 = vpack.c.bf16 %v3203_v45, %v3203_v45 }
 0x3f5   :  { %6795 = vrcp.f32 %v3062_v9  ;;  %v3149_v49 = vand.u32 2147483647, %v3062_v9  ;;  %v3151_v54 = vand.u32 2147483648, %v3062_v9  ;;  %vm3145_vm2 = vweird.f32 %v3062_v9 }
 0x3f6   :  { %v6794_v22 = vpop.eup %6793  ;;  %v3128_v14 = vmul.f32 %v6790_v59, %v3127_v7  ;;  %v5923_v5 = vmul.f32 -1.442695, %v8027_v32  ;;  %v3277_v13 = vunpack.c.l.b16 %v3244_v29  ;;  %v3377_v37 = vunpack.c.l.b16 %v3211_v57 }
 0x3f7   :  { %v3063_v16 = vadd.f32 1.0, %v6794_v22  ;;  %vm3150_vm4 = vcmp.eq.f32.partialorder %v3149_v49, 8.507059e+37  ;;  %v3152_v44 = vor.u32 1.1754944e-38, %v3151_v54  ;;  %v6566_v54 = vld [vmem:[%s8561_s6 + $0x38] sm:$0xff] }
 0x3f8   :  { %v3129_v61 = vadd.f32 %v6790_v59, %v3128_v14  ;;  %6797 = vpow2.f32 %v5923_v5  ;;  %v3283_v46 = vpack.c.b16 %v3277_v13, %v3276_v10  ;;  %4028 = vmatpush.bf16.msra.mxu2 %v6566_v54  ;;  %v6577_v54 = vld [vmem:[%s8561_s6 + $0x90] sm:$0xff] }
 0x3f9   :  { %6799 = vrcp.f32 %v3063_v16  ;;  %v3166_v38 = vand.u32 2147483648, %v3063_v16  ;;  %v3164_v28 = vand.u32 2147483647, %v3063_v16  ;;  %vm3160_vm6 = vweird.f32 %v3063_v16 }
 0x3fa   :  { %v3133_v3 = vsel %vm3132_vm15, %v6790_v59, %v3129_v61  ;;  %3351 = vmatmul.bf16.gmra.mxu2 %v3283_v46 }
 0x3fb   :  { %v6796_v30 = vpop.eup %6795  ;;  %v3138_v4 = vsel %vm3135_vm0, %v3137_v58, %v3133_v3  ;;  %v3204_v31 = vld [vmem:[#allocation2 + $0x2c] sm:$0xff]  ;;  %v3471_v2 = vld [vmem:[#allocation2 + $0x34] sm:$0xff]  ;;  %v3167_v60 = vor.u32 1.1754944e-38, %v3166_v38  ;;  %vm3165_vm9 = vcmp.eq.f32.partialorder %v3164_v28, 8.507059e+37 }
 0x3fc   :  { %v3189_v24 = vmul.f32 %v3138_v4, %v7990_v19  ;;  %v3141_v53 = vmul.f32 %v6796_v30, %v3062_v9  ;;  %v3212_v33 = vpack.c.bf16 %v3204_v31, %v3204_v31  ;;  %v3479_v34 = vpack.c.bf16 %v3471_v2, %v3471_v2  ;;  %v6574_v38 = vld [vmem:[%s8561_s6 + $0x78] sm:$0xff]  ;;  %v6581_v28 = vld [vmem:[%s8561_s6 + $0xb0] sm:$0xff] }
 0x3fd   :  { %vm3146_vm1 = vweird.f32 %v6796_v30  ;;  %3927 = vmatpush.bf16.msra.mxu1 %v6574_v38  ;;  %v6560_v38 = vld [vmem:[%s8561_s6 + $0x8] sm:$0xff] }
 0x3fe   :  { %v6798_v35 = vpop.eup %6797  ;;  %3197 = vst [vmem:[#allocation2 + $0x48] sm:$0xff] %v3189_v24  ;;  %v3142_v43 = vsub.f32 1.0, %v3141_v53  ;;  %v3378_v39 = vunpack.c.l.b16 %v3212_v33  ;;  %v3512_v18 = vunpack.c.l.b16 %v3479_v34  ;;  %vm3147_vm3 = vmor %vm3145_vm2, %vm3146_vm1  ;;  %v3245_v51 = vpack.c.bf16 %v3189_v24, %v3189_v24 }
 0x3ff   :  { %v6800_v48 = vpop.eup %6799  ;;  %v3064_v56 = vadd.f32 1.0, %v6798_v35 }
 0x400   :  { %v3143_v21 = vmul.f32 %v6796_v30, %v3142_v43  ;;  %v3156_v52 = vmul.f32 %v6800_v48, %v3063_v16  ;;  %v3384_v41 = vpack.c.b16 %v3378_v39, %v3377_v37  ;;  %v3518_v20 = vpack.c.b16 %v3512_v18, %v3378_v39 }
 0x401   :  { %6801 = vrcp.f32 %v3064_v56  ;;  %vm3161_vm5 = vweird.f32 %v6800_v48  ;;  %v3278_v6 = vunpack.c.l.b16 %v3245_v51  ;;  %v3181_v27 = vand.u32 2147483648, %v3064_v56 }
 0x402   :  { %v3144_v12 = vadd.f32 %v6796_v30, %v3143_v21  ;;  %v3157_v19 = vsub.f32 1.0, %v3156_v52  ;;  %3452 = vmatmul.bf16.gmra.mxu3 %v3384_v41  ;;  %vm3162_vm8 = vmor %vm3160_vm6, %vm3161_vm5  ;;  %v3179_v9 = vand.u32 2147483647, %v3064_v56  ;;  %vm3175_vm11 = vweird.f32 %v3064_v56 }
 0x403   :  { %3586 = vmatmul.bf16.gmra.mxu0 %v3518_v20  ;;  %v3182_v23 = vor.u32 1.1754944e-38, %v3181_v27 }
 0x404   :  { %v3148_v36 = vsel %vm3147_vm3, %v6796_v30, %v3144_v12  ;;  %v3158_v17 = vmul.f32 %v6800_v48, %v3157_v19  ;;  %vm3180_vm13 = vcmp.eq.f32.partialorder %v3179_v9, 8.507059e+37  ;;  %v8043_v12 = vld [vmem:[#allocation14 + $0x4] ss:$0 sm:$0xff] }
 0x405   :  { %v3153_v40 = vsel %vm3150_vm4, %v3152_v44, %v3148_v36  ;;  %v3205_v11 = vld [vmem:[#allocation2 + $0x44] sm:$0xff] }
 0x406   :  { %v3190_v62 = vmul.f32 %v3153_v40, %v8008_v55  ;;  %v3159_v0 = vadd.f32 %v6800_v48, %v3158_v17  ;;  %v3213_v42 = vpack.c.bf16 %v3205_v11, %v3205_v11  ;;  %v6565_v17 = vld [vmem:[%s8561_s6 + $0x30] sm:$0xff]  ;;  %v6571_v11 = vld [vmem:[%s8561_s6 + $0x60] sm:$0xff] }
 0x407   :  { %v6802_v1 = vpop.eup %6801  ;;  %4029 = vmatpush.bf16.msra.mxu2 %v6565_v17  ;;  %v6576_v17 = vld [vmem:[%s8561_s6 + $0x88] sm:$0xff] }
 0x408   :  { %3198 = vst [vmem:[#allocation2 + $0x50] sm:$0xff] %v3190_v62  ;;  %v3163_v25 = vsel %vm3162_vm8, %v6800_v48, %v3159_v0  ;;  %v3171_v59 = vmul.f32 %v6802_v1, %v3064_v56  ;;  %v3246_v15 = vpack.c.bf16 %v3190_v62, %v3190_v62  ;;  %vm3176_vm10 = vweird.f32 %v6802_v1  ;;  %v6582_v56 = vld [vmem:[%s8561_s6 + $0xb8] sm:$0xff]  ;;  %v6573_v0 = vld [vmem:[%s8561_s6 + $0x70] sm:$0xff] }
 0x409   :  { %v3168_v63 = vsel %vm3165_vm9, %v3167_v60, %v3163_v25  ;;  %vm3177_vm12 = vmor %vm3175_vm11, %vm3176_vm10  ;;  %v3379_v45 = vunpack.c.l.b16 %v3213_v42  ;;  %4162 = vmatpush.bf16.msra.mxu3 %v6582_v56  ;;  %3928 = vmatpush.bf16.msra.mxu1 %v6573_v0  ;;  %v6567_v56 = vld [vmem:[%s8561_s6 + $0x40] sm:$0xff] }
 0x40a   :  { %v3191_v26 = vmul.f32 %v3168_v63, %v8019_v50  ;;  %v3172_v47 = vsub.f32 1.0, %v3171_v59  ;;  %v3279_v8 = vunpack.c.l.b16 %v3246_v15  ;;  %v6572_v59 = vld [vmem:[%s8561_s6 + $0x68] sm:$0xff] }
 0x40b   :  { %v6564_v63 = vld [vmem:[%s8561_s6 + $0x28] sm:$0xff] }
 0x40c   :  { %3199 = vst [vmem:[#allocation2 + $0x68] sm:$0xff] %v3191_v26  ;;  %v3173_v55 = vmul.f32 %v6802_v1, %v3172_v47  ;;  %v3284_v7 = vpack.c.b16 %v3279_v8, %v3278_v6  ;;  %v3247_v57 = vpack.c.bf16 %v3191_v26, %v3191_v26  ;;  %v6580_v26 = vld [vmem:[%s8561_s6 + $0xa8] sm:$0xff]  ;;  %4030 = vmatpush.bf16.msra.mxu2 %v6564_v63  ;;  %v6559_v63 = vld [vmem:[%s8561_s6] sm:$0xff] }
 0x40d   :  { %4163 = vmatpush.bf16.msra.mxu3 %v6581_v28  ;;  %3929 = vmatpush.bf16.msra.mxu1 %v6572_v59 }
 0x40e   :  { %v3174_v29 = vadd.f32 %v6802_v1, %v3173_v55  ;;  %3356 = vmatmul.bf16.gmra.mxu2 %v3284_v7  ;;  %v3280_v31 = vunpack.c.l.b16 %v3247_v57 }
 0x40f   :  { %v3206_v10 = vld [vmem:[#allocation2 + $0x4c] sm:$0xff]  ;;  %v3473_v22 = vld [vmem:[#allocation2 + $0x54] sm:$0xff] }
 0x410   :  { %v3178_v14 = vsel %vm3177_vm12, %v6802_v1, %v3174_v29  ;;  %v3214_v50 = vpack.c.bf16 %v3206_v10, %v3206_v10  ;;  %v3481_v5 = vpack.c.bf16 %v3473_v22, %v3473_v22  ;;  %v6570_v29 = vld [vmem:[%s8561_s6 + $0x58] sm:$0xff]  ;;  %v6579_v10 = vld [vmem:[%s8561_s6 + $0xa0] sm:$0xff] }
 0x411   :  { %v3183_v13 = vsel %vm3180_vm13, %v3182_v23, %v3178_v14  ;;  %4164 = vmatpush.bf16.msra.mxu3 %v6580_v26  ;;  %3930 = vmatpush.bf16.msra.mxu1 %v6571_v11  ;;  %v6563_v23 = vld [vmem:[%s8561_s6 + $0x20] sm:$0xff] }
 0x412   :  { %v3192_v16 = vmul.f32 %v3183_v13, %v8027_v32  ;;  %v3380_v61 = vunpack.c.l.b16 %v3214_v50  ;;  %v3514_v46 = vunpack.c.l.b16 %v3481_v5  ;;  %4031 = vmatpush.bf16.msra.mxu2 %v6563_v23  ;;  %v6575_v26 = vld [vmem:[%s8561_s6 + $0x80] sm:$0xff] }
 0x413   :  { %v3207_v2 = vld [vmem:[#allocation2 + $0x64] sm:$0xff] }
 0x414   :  { %3200 = vst [vmem:[#allocation2 + $0x70] sm:$0xff] %v3192_v16  ;;  %v3385_v58 = vpack.c.b16 %v3380_v61, %v3379_v45  ;;  %v3519_v3 = vpack.c.b16 %v3514_v46, %v3380_v61  ;;  %v3248_v30 = vpack.c.bf16 %v3192_v16, %v3192_v16  ;;  %v3215_v34 = vpack.c.bf16 %v3207_v2, %v3207_v2  ;;  %v6569_v45 = vld [vmem:[%s8561_s6 + $0x50] sm:$0xff] }
 0x415   :  { %3931 = vmatpush.bf16.msra.mxu1 %v6570_v29  ;;  %4165 = vmatpush.bf16.msra.mxu3 %v6579_v10 }
 0x416   :  { %3457 = vmatmul.bf16.gmra.mxu3 %v3385_v58  ;;  %3591 = vmatmul.bf16.gmra.mxu0 %v3519_v3  ;;  %v3281_v4 = vunpack.c.l.b16 %v3248_v30  ;;  %v3381_v39 = vunpack.c.l.b16 %v3215_v34  ;;  %v6562_v30 = vld [vmem:[%s8561_s6 + $0x18] sm:$0xff] }
 0x417   :  { %4032 = vmatpush.bf16.msra.mxu2 %v6562_v30 }
 0x418   :  { %v3285_v24 = vpack.c.b16 %v3281_v4, %v3280_v31  ;;  %v6578_v4 = vld [vmem:[%s8561_s6 + $0x98] sm:$0xff]  ;;  %v6568_v31 = vld [vmem:[%s8561_s6 + $0x48] sm:$0xff] }
 0x419   :  { %3932 = vmatpush.bf16.msra.mxu1 %v6569_v45  ;;  %4166 = vmatpush.bf16.msra.mxu3 %v6578_v4 }
 0x41b   :  { %v3208_v53 = vld [vmem:[#allocation2 + $0x6c] sm:$0xff]  ;;  %v3475_v33 = vld [vmem:[#allocation2 + $0x74] sm:$0xff] }
 0x41c   :  { %v3216_v35 = vpack.c.bf16 %v3208_v53, %v3208_v53  ;;  %v3483_v43 = vpack.c.bf16 %v3475_v33, %v3475_v33 }
 0x41d   :  { %3933 = vmatpush.bf16.msra.mxu1 %v6568_v31  ;;  %4167 = vmatpush.bf16.msra.mxu3 %v6577_v54 }
 0x41e   :  { %3361 = vmatmul.bf16.gmra.mxu2 %v3285_v24  ;;  %v3382_v32 = vunpack.c.l.b16 %v3216_v35  ;;  %v3516_v37 = vunpack.c.l.b16 %v3483_v43 }
 0x420   :  { %v3386_v48 = vpack.c.b16 %v3382_v32, %v3381_v39  ;;  %v3520_v49 = vpack.c.b16 %v3516_v37, %v3382_v32 }
 0x421   :  { %3934 = vmatpush.bf16.msra.mxu1 %v6567_v56  ;;  %4168 = vmatpush.bf16.msra.mxu3 %v6576_v17 }
 0x425   :  { %4169 = vmatpush.bf16.msra.mxu3 %v6575_v26 }
 0x426   :  { %3462 = vmatmul.bf16.gmra.mxu3 %v3386_v48  ;;  %3596 = vmatmul.bf16.gmra.mxu0 %v3520_v49  ;;  %v6561_v49 = vld [vmem:[%s8561_s6 + $0x10] sm:$0xff] }
 0x427   :  { %4033 = vmatpush.bf16.msra.mxu2 %v6561_v49 }
 0x42b   :  { %4034 = vmatpush.bf16.msra.mxu2 %v6560_v38 }
 0x42f   :  { %4035 = vmatpush.bf16.msra.mxu2 %v6559_v63 }
 0x46d   :  { %v3347_v18 = vpop.f32.mrf.mxu2 }
 0x470   :  { %v3582_v21 = vpop.f32.mrf.mxu0 }
 0x475   :  { %v3448_v52 = vpop.f32.mrf.mxu3  ;;  %v3349_v19 = vpop.f32.mrf.mxu2 }
 0x476   :  { %v3449_v41 = vadd.f32 %v3448_v52, %v3347_v18 }
 0x478   :  { %v3602_v20 = vadd.f32 %v3582_v21, %v3449_v41  ;;  %v3584_v44 = vpop.f32.mrf.mxu0 }
 0x47a   :  { %v8049_v36 = vadd.f32 %v8043_v12, %v3602_v20 }
 0x47c   :  { %v6052_v40 = vmul.f32 -1.442695, %v8049_v36 }
 0x47d   :  { %v3450_v62 = vpop.f32.mrf.mxu3  ;;  %v3352_v1 = vpop.f32.mrf.mxu2 }
 0x47e   :  { %6803 = vpow2.f32 %v6052_v40  ;;  %v3451_v51 = vadd.f32 %v3450_v62, %v3349_v19 }
 0x480   :  { %v3603_v60 = vadd.f32 %v3584_v44, %v3451_v51  ;;  %v3587_v25 = vpop.f32.mrf.mxu0 }
 0x482   :  { %v8065_v15 = vadd.f32 %v8043_v12, %v3603_v60 }
 0x484   :  { %v6804_v47 = vpop.eup %6803  ;;  %v6053_v6 = vmul.f32 -1.442695, %v8065_v15 }
 0x485   :  { %v3646_v8 = vadd.f32 1.0, %v6804_v47  ;;  %v3453_v27 = vpop.f32.mrf.mxu3  ;;  %v3354_v7 = vpop.f32.mrf.mxu2 }
 0x486   :  { %6805 = vpow2.f32 %v6053_v6  ;;  %v3454_v55 = vadd.f32 %v3453_v27, %v3352_v1 }
 0x487   :  { %6807 = vrcp.f32 %v3646_v8  ;;  %v3665_v57 = vand.u32 2147483648, %v3646_v8  ;;  %v3663_v24 = vand.u32 2147483647, %v3646_v8  ;;  %vm3659_vm15 = vweird.f32 %v3646_v8 }
 0x488   :  { %v3604_v9 = vadd.f32 %v3587_v25, %v3454_v55  ;;  %v3589_v22 = vpop.f32.mrf.mxu0 }
 0x489   :  { %v3666_v37 = vor.u32 1.1754944e-38, %v3665_v57  ;;  %vm3664_vm1 = vcmp.eq.f32.partialorder %v3663_v24, 8.507059e+37 }
 0x48a   :  { %v8081_v42 = vadd.f32 %v8043_v12, %v3604_v9 }
 0x48c   :  { %v6806_v14 = vpop.eup %6805  ;;  %v6054_v50 = vmul.f32 -1.442695, %v8081_v42 }
 0x48d   :  { %v6808_v5 = vpop.eup %6807  ;;  %v8090_v13 = vadd.f32 1.0, %v6806_v14  ;;  %v3455_v16 = vpop.f32.mrf.mxu3 }
 0x48e   :  { %v3655_v61 = vmul.f32 %v6808_v5, %v3646_v8  ;;  %6809 = vpow2.f32 %v6054_v50  ;;  %v3456_v46 = vadd.f32 %v3455_v16, %v3354_v7  ;;  %vm3660_vm14 = vweird.f32 %v6808_v5 }
 0x48f   :  { %6811 = vrcp.f32 %v8090_v13  ;;  %vm3661_vm0 = vmor %vm3659_vm15, %vm3660_vm14  ;;  %v3680_v20 = vand.u32 2147483648, %v8090_v13  ;;  %vm3674_vm3 = vweird.f32 %v8090_v13 }
 0x490   :  { %v3656_v58 = vsub.f32 1.0, %v3655_v61  ;;  %v3605_v3 = vadd.f32 %v3589_v22, %v3456_v46 }
 0x491   :  { %v3357_v33 = vpop.f32.mrf.mxu2  ;;  %v3681_v60 = vor.u32 1.1754944e-38, %v3680_v20 }
 0x492   :  { %v3657_v2 = vmul.f32 %v6808_v5, %v3656_v58  ;;  %v8106_v53 = vadd.f32 %v8043_v12, %v3605_v3 }
 0x493   :  { %v3592_v48 = vpop.f32.mrf.mxu0 }
 0x494   :  { %v6810_v34 = vpop.eup %6809  ;;  %v3658_v35 = vadd.f32 %v6808_v5, %v3657_v2  ;;  %v6055_v43 = vmul.f32 -1.442695, %v8106_v53 }
 0x495   :  { %v6812_v32 = vpop.eup %6811  ;;  %v8109_v39 = vadd.f32 1.0, %v6810_v34 }
 0x496   :  { %v3662_v18 = vsel %vm3661_vm0, %v6808_v5, %v3658_v35  ;;  %v3670_v21 = vmul.f32 %v6812_v32, %v8090_v13  ;;  %6813 = vpow2.f32 %v6055_v43  ;;  %vm3675_vm2 = vweird.f32 %v6812_v32 }
 0x497   :  { %v3667_v52 = vsel %vm3664_vm1, %v3666_v37, %v3662_v18  ;;  %6815 = vrcp.f32 %v8109_v39  ;;  %vm3676_vm4 = vmor %vm3674_vm3, %vm3675_vm2  ;;  %v3693_v29 = vand.u32 2147483647, %v8109_v39  ;;  %v3695_v23 = vand.u32 2147483648, %v8109_v39 }
 0x498   :  { %v8123_v41 = vmul.f32 %v3667_v52, %v8049_v36  ;;  %v3671_v19 = vsub.f32 1.0, %v3670_v21  ;;  %v3678_v36 = vand.u32 2147483647, %v8090_v13  ;;  %vm3689_vm8 = vweird.f32 %v8109_v39 }
 0x499   :  { %v3458_v44 = vpop.f32.mrf.mxu3  ;;  %v3359_v59 = vpop.f32.mrf.mxu2  ;;  %v3696_v61 = vor.u32 1.1754944e-38, %v3695_v23  ;;  %vm3694_vm10 = vcmp.eq.f32.partialorder %v3693_v29, 8.507059e+37 }
 0x49a   :  { %3782 = vst [vmem:[#allocation2 + $0x8] sm:$0xff] %v8123_v41  ;;  %v3672_v28 = vmul.f32 %v6812_v32, %v3671_v19  ;;  %v3459_v40 = vadd.f32 %v3458_v44, %v3357_v33  ;;  %vm3679_vm5 = vcmp.eq.f32.partialorder %v3678_v36, 8.507059e+37  ;;  %v3830_v22 = vpack.c.bf16 %v8123_v41, %v8123_v41 }
 0x49b   :  { %v3594_v11 = vpop.f32.mrf.mxu0 }
 0x49c   :  { %v6814_v62 = vpop.eup %6813  ;;  %v3673_v0 = vadd.f32 %v6812_v32, %v3672_v28  ;;  %v3606_v51 = vadd.f32 %v3592_v48, %v3459_v40  ;;  %v3863_v46 = vunpack.c.l.b16 %v3830_v22 }
 0x49d   :  { %v6816_v1 = vpop.eup %6815  ;;  %v8135_v25 = vadd.f32 1.0, %v6814_v62 }
 0x49e   :  { %v3677_v47 = vsel %vm3676_vm4, %v6812_v32, %v3673_v0  ;;  %v3685_v6 = vmul.f32 %v6816_v1, %v8109_v39  ;;  %v8145_v8 = vadd.f32 %v8043_v12, %v3606_v51  ;;  %vm3690_vm6 = vweird.f32 %v6816_v1 }
 0x49f   :  { %v3682_v27 = vsel %vm3679_vm5, %v3681_v60, %v3677_v47  ;;  %6817 = vrcp.f32 %v8135_v25  ;;  %vm3691_vm9 = vmor %vm3689_vm8, %vm3690_vm6  ;;  %v3708_v32 = vand.u32 2147483647, %v8135_v25  ;;  %v3710_v37 = vand.u32 2147483648, %v8135_v25 }
 0x4a0   :  { %v8149_v55 = vmul.f32 %v3682_v27, %v8065_v15  ;;  %v3686_v9 = vsub.f32 1.0, %v3685_v6  ;;  %v6056_v7 = vmul.f32 -1.442695, %v8145_v8  ;;  %vm3704_vm12 = vweird.f32 %v8135_v25 }
 0x4a1   :  { %v3460_v10 = vpop.f32.mrf.mxu3  ;;  %v3790_v16 = vld [vmem:[#allocation2 + $0x7] sm:$0xff]  ;;  %v3362_v31 = vpop.f32.mrf.mxu2  ;;  %vm3709_vm14 = vcmp.eq.f32.partialorder %v3708_v32, 8.507059e+37  ;;  %v3711_v28 = vor.u32 1.1754944e-38, %v3710_v37 }
 0x4a2   :  { %3783 = vst [vmem:[#allocation2 + $0x10] sm:$0xff] %v8149_v55  ;;  %v3687_v14 = vmul.f32 %v6816_v1, %v3686_v9  ;;  %6819 = vpow2.f32 %v6056_v7  ;;  %v3461_v50 = vadd.f32 %v3460_v10, %v3359_v59  ;;  %v3831_v15 = vpack.c.bf16 %v8149_v55, %v8149_v55 }
 0x4a3   :  { %v3798_v24 = vpack.c.bf16 %v3790_v16, %v3790_v16  ;;  %v3597_v48 = vpop.f32.mrf.mxu0 }
 0x4a4   :  { %v3688_v5 = vadd.f32 %v6816_v1, %v3687_v14  ;;  %v3607_v13 = vadd.f32 %v3594_v11, %v3461_v50  ;;  %v3864_v58 = vunpack.c.l.b16 %v3831_v15 }
 0x4a5   :  { %v6818_v45 = vpop.eup %6817  ;;  %v3964_v19 = vunpack.c.l.b16 %v3798_v24 }
 0x4a6   :  { %v3692_v3 = vsel %vm3691_vm9, %v6816_v1, %v3688_v5  ;;  %v3700_v57 = vmul.f32 %v6818_v45, %v8135_v25  ;;  %v8162_v30 = vadd.f32 %v8043_v12, %v3607_v13  ;;  %v3871_v2 = vpack.c.b16 %v3864_v58, %v3863_v46 }
 0x4a7   :  { %v3697_v4 = vsel %vm3694_vm10, %v3696_v61, %v3692_v3  ;;  %vm3705_vm11 = vweird.f32 %v6818_v45 }
 0x4a8   :  { %v6820_v33 = vpop.eup %6819  ;;  %v8165_v34 = vmul.f32 %v3697_v4, %v8081_v42  ;;  %v3701_v35 = vsub.f32 1.0, %v3700_v57  ;;  %v6057_v43 = vmul.f32 -1.442695, %v8162_v30  ;;  %3935 = vmatmul.bf16.vlgmr.msra.gmra.mxu1 %v3871_v2  ;;  %vm3706_vm13 = vmor %vm3704_vm12, %vm3705_vm11 }
 0x4a9   :  { %v8170_v39 = vadd.f32 1.0, %v6820_v33  ;;  %v3463_v49 = vpop.f32.mrf.mxu3  ;;  %v3791_v54 = vld [vmem:[#allocation2 + $0xf] sm:$0xff]  ;;  %v3364_v6 = vpop.f32.mrf.mxu2 }
 0x4aa   :  { %v4057_v56 = vld [vmem:[#allocation2 + $0x9] sm:$0xff]  ;;  %3784 = vst [vmem:[#allocation2 + $0x28] sm:$0xff] %v8165_v34  ;;  %v3702_v18 = vmul.f32 %v6818_v45, %v3701_v35  ;;  %6821 = vpow2.f32 %v6057_v43  ;;  %v3464_v42 = vadd.f32 %v3463_v49, %v3362_v31  ;;  %v3799_v21 = vpack.c.bf16 %v3791_v54, %v3791_v54  ;;  %v4058_v52 = vld [vmem:[#allocation2 + $0x11] sm:$0xff] }
 0x4ab   :  { %6823 = vrcp.f32 %v8170_v39  ;;  %v4065_v17 = vpack.c.bf16 %v4057_v56, %v4057_v56  ;;  %v4066_v36 = vpack.c.bf16 %v4058_v52, %v4058_v52  ;;  %v3832_v9 = vpack.c.bf16 %v8165_v34, %v8165_v34 }
 0x4ac   :  { %v3703_v20 = vadd.f32 %v6818_v45, %v3702_v18  ;;  %v3608_v44 = vadd.f32 %v3597_v48, %v3464_v42  ;;  %v3965_v38 = vunpack.c.l.b16 %v3799_v21  ;;  %v3723_v14 = vand.u32 2147483647, %v8170_v39 }
 0x4ad   :  { %v4098_v51 = vunpack.c.l.b16 %v4065_v17  ;;  %v4099_v60 = vunpack.c.l.b16 %v4066_v36  ;;  %v3725_v50 = vand.u32 2147483648, %v8170_v39  ;;  %v3865_v15 = vunpack.c.l.b16 %v3832_v9 }
 0x4ae   :  { %v3707_v40 = vsel %vm3706_vm13, %v6818_v45, %v3703_v20  ;;  %v8177_v62 = vadd.f32 %v8043_v12, %v3608_v44  ;;  %v3972_v0 = vpack.c.b16 %v3965_v38, %v3964_v19  ;;  %vm3719_vm0 = vweird.f32 %v8170_v39 }
 0x4af   :  { %v3712_v1 = vsel %vm3709_vm14, %v3711_v28, %v3707_v40  ;;  %v4106_v11 = vpack.c.b16 %v4099_v60, %v4098_v51  ;;  %vm3724_vm2 = vcmp.eq.f32.partialorder %v3723_v14, 8.507059e+37  ;;  %v3726_v4 = vor.u32 1.1754944e-38, %v3725_v50 }
 0x4b0   :  { %v6822_v25 = vpop.eup %6821  ;;  %v8180_v59 = vmul.f32 %v3712_v1, %v8106_v53  ;;  %v6058_v63 = vmul.f32 -1.442695, %v8177_v62  ;;  %4036 = vmatmul.bf16.vlgmr.msra.gmra.mxu2 %v3972_v0  ;;  %v3599_v53 = vpop.f32.mrf.mxu0 }
 0x4b1   :  { %v6824_v26 = vpop.eup %6823  ;;  %v8183_v47 = vadd.f32 1.0, %v6822_v25  ;;  %v3465_v27 = vpop.f32.mrf.mxu3  ;;  %4170 = vmatmul.bf16.vlgmr.msra.gmra.mxu3 %v4106_v11  ;;  %v3792_v45 = vld [vmem:[#allocation2 + $0x27] sm:$0xff] }
 0x4b2   :  { %3785 = vst [vmem:[#allocation2 + $0x30] sm:$0xff] %v8180_v59  ;;  %v3715_v7 = vmul.f32 %v6824_v26, %v8170_v39  ;;  %6825 = vpow2.f32 %v6058_v63  ;;  %v3466_v29 = vadd.f32 %v3465_v27, %v3364_v6  ;;  %v3833_v22 = vpack.c.bf16 %v8180_v59, %v8180_v59 }
 0x4b3   :  { %6827 = vrcp.f32 %v8183_v47  ;;  %vm3720_vm15 = vweird.f32 %v6824_v26  ;;  %v3738_v49 = vand.u32 2147483647, %v8183_v47  ;;  %v3740_v54 = vand.u32 2147483648, %v8183_v47 }
 0x4b4   :  { %v3716_v23 = vsub.f32 1.0, %v3715_v7  ;;  %v3609_v10 = vadd.f32 %v3599_v53, %v3466_v29  ;;  %v3866_v16 = vunpack.c.l.b16 %v3833_v22  ;;  %vm3721_vm1 = vmor %vm3719_vm0, %vm3720_vm15  ;;  %vm3734_vm4 = vweird.f32 %v8183_v47 }
 0x4b5   :  { %v3741_v28 = vor.u32 1.1754944e-38, %v3740_v54  ;;  %vm3739_vm6 = vcmp.eq.f32.partialorder %v3738_v49, 8.507059e+37 }
 0x4b6   :  { %v3717_v5 = vmul.f32 %v6824_v26, %v3716_v23  ;;  %v8195_v13 = vadd.f32 %v8043_v12, %v3609_v10  ;;  %v3872_v3 = vpack.c.b16 %v3866_v16, %v3865_v15  ;;  %v3800_v12 = vpack.c.bf16 %v3792_v45, %v3792_v45 }
 0x4b8   :  { %v6826_v61 = vpop.eup %6825  ;;  %v3718_v46 = vadd.f32 %v6824_v26, %v3717_v5  ;;  %v6059_v58 = vmul.f32 -1.442695, %v8195_v13  ;;  %3940 = vmatmul.bf16.gmra.mxu1 %v3872_v3  ;;  %v3966_v21 = vunpack.c.l.b16 %v3800_v12 }
 0x4b9   :  { %v6828_v57 = vpop.eup %6827  ;;  %v3652_v31 = vadd.f32 1.0, %v6826_v61  ;;  %v3793_v2 = vld [vmem:[#allocation2 + $0x2f] sm:$0xff] }
 0x4ba   :  { %v3722_v24 = vsel %vm3721_vm1, %v6824_v26, %v3718_v46  ;;  %v3730_v33 = vmul.f32 %v6828_v57, %v8183_v47  ;;  %6829 = vpow2.f32 %v6059_v58  ;;  %v4059_v35 = vld [vmem:[#allocation2 + $0x29] sm:$0xff]  ;;  %v4060_v43 = vld [vmem:[#allocation2 + $0x31] sm:$0xff]  ;;  %v3801_v48 = vpack.c.bf16 %v3793_v2, %v3793_v2 }
 0x4bb   :  { %v3727_v32 = vsel %vm3724_vm2, %v3726_v4, %v3722_v24  ;;  %6831 = vrcp.f32 %v3652_v31  ;;  %v4067_v56 = vpack.c.bf16 %v4059_v35, %v4059_v35  ;;  %v4068_v18 = vpack.c.bf16 %v4060_v43, %v4060_v43 }
 0x4bc   :  { %v8201_v37 = vmul.f32 %v3727_v32, %v8145_v8  ;;  %v3731_v39 = vsub.f32 1.0, %v3730_v33  ;;  %vm3735_vm3 = vweird.f32 %v6828_v57  ;;  %v3967_v52 = vunpack.c.l.b16 %v3801_v48 }
 0x4bd   :  { %v4100_v19 = vunpack.c.l.b16 %v4067_v56  ;;  %v4101_v20 = vunpack.c.l.b16 %v4068_v18  ;;  %vm3736_vm5 = vmor %vm3734_vm4, %vm3735_vm3  ;;  %v3755_v26 = vand.u32 2147483648, %v3652_v31  ;;  %v3753_v6 = vand.u32 2147483647, %v3652_v31 }
 0x4be   :  { %3786 = vst [vmem:[#allocation2 + $0x48] sm:$0xff] %v8201_v37  ;;  %v3732_v42 = vmul.f32 %v6828_v57, %v3731_v39  ;;  %v3973_v8 = vpack.c.b16 %v3967_v52, %v3966_v21  ;;  %v3834_v63 = vpack.c.bf16 %v8201_v37, %v8201_v37  ;;  %vm3749_vm9 = vweird.f32 %v3652_v31 }
 0x4bf   :  { %v4107_v40 = vpack.c.b16 %v4101_v20, %v4100_v19  ;;  %v3756_v53 = vor.u32 1.1754944e-38, %v3755_v26  ;;  %vm3754_vm11 = vcmp.eq.f32.partialorder %v3753_v6, 8.507059e+37  ;;  %v6590_v26 = vld [vmem:[#allocation8 + $0x38] sm:$0xff] }
 0x4c0   :  { %v6830_v44 = vpop.eup %6829  ;;  %v3733_v38 = vadd.f32 %v6828_v57, %v3732_v42  ;;  %4041 = vmatmul.bf16.gmra.mxu2 %v3973_v8  ;;  %v3867_v9 = vunpack.c.l.b16 %v3834_v63  ;;  %v6598_v63 = vld [vmem:[#allocation8 + $0x78] sm:$0xff]  ;;  %4617 = vmatpush.bf16.msrb.mxu1 %v6590_v26  ;;  %v6585_v26 = vld [vmem:[#allocation8 + $0x10] sm:$0xff] }
 0x4c1   :  { %v6832_v17 = vpop.eup %6831  ;;  %v3653_v36 = vadd.f32 1.0, %v6830_v44  ;;  %4175 = vmatmul.bf16.gmra.mxu3 %v4107_v40  ;;  %4516 = vmatpush.bf16.msrb.mxu0 %v6598_v63  ;;  %v6601_v63 = vld [vmem:[#allocation8 + $0x90] sm:$0xff] }
 0x4c2   :  { %v3737_v0 = vsel %vm3736_vm5, %v6828_v57, %v3733_v38  ;;  %v3745_v51 = vmul.f32 %v6832_v17, %v3652_v31  ;;  %vm3750_vm8 = vweird.f32 %v6832_v17 }
 0x4c3   :  { %v3742_v1 = vsel %vm3739_vm6, %v3741_v28, %v3737_v0  ;;  %6833 = vrcp.f32 %v3653_v36  ;;  %vm3751_vm10 = vmor %vm3749_vm9, %vm3750_vm8  ;;  %v3768_v16 = vand.u32 2147483647, %v3653_v36  ;;  %v3770_v45 = vand.u32 2147483648, %v3653_v36 }
 0x4c4   :  { %v8208_v60 = vmul.f32 %v3742_v1, %v8162_v30  ;;  %v3746_v25 = vsub.f32 1.0, %v3745_v51  ;;  %vm3764_vm13 = vweird.f32 %v3653_v36 }
 0x4c5   :  { %v3794_v29 = vld [vmem:[#allocation2 + $0x47] sm:$0xff]  ;;  %v3771_v35 = vor.u32 1.1754944e-38, %v3770_v45  ;;  %vm3769_vm15 = vcmp.eq.f32.partialorder %v3768_v16, 8.507059e+37 }
 0x4c6   :  { %3787 = vst [vmem:[#allocation2 + $0x50] sm:$0xff] %v8208_v60  ;;  %v3747_v47 = vmul.f32 %v6832_v17, %v3746_v25  ;;  %v3835_v27 = vpack.c.bf16 %v8208_v60, %v8208_v60  ;;  %v3802_v50 = vpack.c.bf16 %v3794_v29, %v3794_v29  ;;  %v6606_v25 = vld [vmem:[#allocation8 + $0xb8] sm:$0xff] }
 0x4c7   :  { %4751 = vmatpush.bf16.msrb.mxu2 %v6606_v25 }
 0x4c8   :  { %v3748_v11 = vadd.f32 %v6832_v17, %v3747_v47  ;;  %v3868_v7 = vunpack.c.l.b16 %v3835_v27  ;;  %v3968_v2 = vunpack.c.l.b16 %v3802_v50 }
 0x4c9   :  { %v6834_v30 = vpop.eup %6833 }
 0x4ca   :  { %v3752_v23 = vsel %vm3751_vm10, %v6832_v17, %v3748_v11  ;;  %v3760_v10 = vmul.f32 %v6834_v30, %v3653_v36  ;;  %v3873_v22 = vpack.c.b16 %v3868_v7, %v3867_v9  ;;  %vm3765_vm12 = vweird.f32 %v6834_v30  ;;  %v8228_v9 = vld [vmem:[#allocation14 + $0x5] ss:$0 sm:$0xff] }
 0x4cb   :  { %v3757_v14 = vsel %vm3754_vm11, %v3756_v53, %v3752_v23  ;;  %vm3766_vm14 = vmor %vm3764_vm13, %vm3765_vm12  ;;  %v6605_v53 = vld [vmem:[#allocation8 + $0xb0] sm:$0xff] }
 0x4cc   :  { %v8216_v15 = vmul.f32 %v3757_v14, %v8177_v62  ;;  %v3761_v5 = vsub.f32 1.0, %v3760_v10  ;;  %3945 = vmatmul.bf16.gmra.mxu1 %v3873_v22  ;;  %v6597_v23 = vld [vmem:[#allocation8 + $0x70] sm:$0xff]  ;;  %4752 = vmatpush.bf16.msrb.mxu2 %v6605_v53 }
 0x4cd   :  { %v3795_v61 = vld [vmem:[#allocation2 + $0x4f] sm:$0xff]  ;;  %4517 = vmatpush.bf16.msrb.mxu0 %v6597_v23 }
 0x4ce   :  { %v4061_v46 = vld [vmem:[#allocation2 + $0x49] sm:$0xff]  ;;  %v4062_v58 = vld [vmem:[#allocation2 + $0x51] sm:$0xff]  ;;  %3788 = vst [vmem:[#allocation2 + $0x68] sm:$0xff] %v8216_v15  ;;  %v3762_v3 = vmul.f32 %v6834_v30, %v3761_v5  ;;  %v3803_v57 = vpack.c.bf16 %v3795_v61, %v3795_v61  ;;  %v3836_v54 = vpack.c.bf16 %v8216_v15, %v8216_v15 }
 0x4cf   :  { %v4069_v4 = vpack.c.bf16 %v4061_v46, %v4061_v46  ;;  %v4070_v31 = vpack.c.bf16 %v4062_v58, %v4062_v58  ;;  %v6589_v10 = vld [vmem:[#allocation8 + $0x30] sm:$0xff]  ;;  %v6596_v61 = vld [vmem:[#allocation8 + $0x68] sm:$0xff] }
 0x4d0   :  { %v3763_v24 = vadd.f32 %v6834_v30, %v3762_v3  ;;  %v3969_v33 = vunpack.c.l.b16 %v3803_v57  ;;  %v3869_v18 = vunpack.c.l.b16 %v3836_v54  ;;  %4618 = vmatpush.bf16.msrb.mxu1 %v6589_v10  ;;  %v6604_v58 = vld [vmem:[#allocation8 + $0xa8] sm:$0xff]  ;;  %v6587_v54 = vld [vmem:[#allocation8 + $0x20] sm:$0xff] }
 0x4d1   :  { %v4102_v62 = vunpack.c.l.b16 %v4069_v4  ;;  %v4103_v12 = vunpack.c.l.b16 %v4070_v31  ;;  %4518 = vmatpush.bf16.msrb.mxu0 %v6596_v61  ;;  %v6588_v3 = vld [vmem:[#allocation8 + $0x28] sm:$0xff]  ;;  %4753 = vmatpush.bf16.msrb.mxu2 %v6604_v58  ;;  %v6595_v31 = vld [vmem:[#allocation8 + $0x60] sm:$0xff] }
 0x4d2   :  { %v3767_v43 = vsel %vm3766_vm14, %v6834_v30, %v3763_v24  ;;  %v3974_v32 = vpack.c.b16 %v3969_v33, %v3968_v2 }
 0x4d3   :  { %v4108_v39 = vpack.c.b16 %v4103_v12, %v4102_v62  ;;  %v3772_v48 = vsel %vm3769_vm15, %v3771_v35, %v3767_v43  ;;  %v6594_v35 = vld [vmem:[#allocation8 + $0x58] sm:$0xff] }
 0x4d4   :  { %v8221_v49 = vmul.f32 %v3772_v48, %v8195_v13  ;;  %4046 = vmatmul.bf16.gmra.mxu2 %v3974_v32  ;;  %4619 = vmatpush.bf16.msrb.mxu1 %v6588_v3  ;;  %v6603_v48 = vld [vmem:[#allocation8 + $0xa0] sm:$0xff] }
 0x4d5   :  { %4180 = vmatmul.bf16.gmra.mxu3 %v4108_v39  ;;  %v3796_v21 = vld [vmem:[#allocation2 + $0x67] sm:$0xff]  ;;  %4519 = vmatpush.bf16.msrb.mxu0 %v6595_v31 }
 0x4d6   :  { %3789 = vst [vmem:[#allocation2 + $0x70] sm:$0xff] %v8221_v49  ;;  %v3837_v56 = vpack.c.bf16 %v8221_v49, %v8221_v49  ;;  %v3804_v19 = vpack.c.bf16 %v3796_v21, %v3796_v21  ;;  %4754 = vmatpush.bf16.msrb.mxu2 %v6603_v48 }
 0x4d8   :  { %v3870_v42 = vunpack.c.l.b16 %v3837_v56  ;;  %v3970_v28 = vunpack.c.l.b16 %v3804_v19  ;;  %v6593_v56 = vld [vmem:[#allocation8 + $0x50] sm:$0xff]  ;;  %4620 = vmatpush.bf16.msrb.mxu1 %v6587_v54 }
 0x4d9   :  { %4520 = vmatpush.bf16.msrb.mxu0 %v6594_v35 }
 0x4da   :  { %v3874_v52 = vpack.c.b16 %v3870_v42, %v3869_v18 }
 0x4dc   :  { %3950 = vmatmul.bf16.gmra.mxu1 %v3874_v52 }
 0x4dd   :  { %v3797_v20 = vld [vmem:[#allocation2 + $0x6f] sm:$0xff]  ;;  %4521 = vmatpush.bf16.msrb.mxu0 %v6593_v56 }
 0x4de   :  { %v4063_v44 = vld [vmem:[#allocation2 + $0x69] sm:$0xff]  ;;  %v4064_v13 = vld [vmem:[#allocation2 + $0x71] sm:$0xff]  ;;  %v3805_v38 = vpack.c.bf16 %v3797_v20, %v3797_v20 }
 0x4df   :  { %v4071_v8 = vpack.c.bf16 %v4063_v44, %v4063_v44  ;;  %v4072_v17 = vpack.c.bf16 %v4064_v13, %v4064_v13 }
 0x4e0   :  { %v3971_v36 = vunpack.c.l.b16 %v3805_v38  ;;  %v6602_v38 = vld [vmem:[#allocation8 + $0x98] sm:$0xff] }
 0x4e1   :  { %v4104_v40 = vunpack.c.l.b16 %v4071_v8  ;;  %v4105_v0 = vunpack.c.l.b16 %v4072_v17  ;;  %v6586_v8 = vld [vmem:[#allocation8 + $0x18] sm:$0xff]  ;;  %v6592_v17 = vld [vmem:[#allocation8 + $0x48] sm:$0xff]  ;;  %4755 = vmatpush.bf16.msrb.mxu2 %v6602_v38 }
 0x4e2   :  { %v3975_v51 = vpack.c.b16 %v3971_v36, %v3970_v28  ;;  %4621 = vmatpush.bf16.msrb.mxu1 %v6586_v8  ;;  %4522 = vmatpush.bf16.msrb.mxu0 %v6592_v17 }
 0x4e3   :  { %v4109_v1 = vpack.c.b16 %v4105_v0, %v4104_v40 }
 0x4e4   :  { %4051 = vmatmul.bf16.gmra.mxu2 %v3975_v51 }
 0x4e5   :  { %4185 = vmatmul.bf16.gmra.mxu3 %v4109_v1  ;;  %4756 = vmatpush.bf16.msrb.mxu2 %v6601_v63 }
 0x4e6   :  { %4622 = vmatpush.bf16.msrb.mxu1 %v6585_v26 }
 0x525   :  { %v3936_v47 = vpop.f32.mrf.mxu1 }
 0x52d   :  { %v3938_v27 = vpop.f32.mrf.mxu1 }
 0x533   :  { %v4037_v6 = vpop.f32.mrf.mxu2 }
 0x534   :  { %v4038_v11 = vadd.f32 %v4037_v6, %v3936_v47  ;;  %v4171_v7 = vpop.f32.mrf.mxu3  ;;  %v6591_v47 = vld [vmem:[#allocation8 + $0x40] sm:$0xff] }
 0x535   :  { %v3941_v5 = vpop.f32.mrf.mxu1  ;;  %4523 = vmatpush.bf16.msrb.mxu0 %v6591_v47 }
 0x536   :  { %v4191_v29 = vadd.f32 %v4171_v7, %v4038_v11 }
 0x538   :  { %v8231_v30 = vadd.f32 %v8228_v9, %v4191_v29 }
 0x53a   :  { %v6188_v22 = vmul.f32 -1.442695, %v8231_v30 }
 0x53b   :  { %v4039_v14 = vpop.f32.mrf.mxu2 }
 0x53c   :  { %v4040_v50 = vadd.f32 %v4039_v14, %v3938_v27  ;;  %6835 = vpow2.f32 %v6188_v22  ;;  %v4173_v16 = vpop.f32.mrf.mxu3 }
 0x53d   :  { %v3943_v12 = vpop.f32.mrf.mxu1 }
 0x53e   :  { %v4192_v45 = vadd.f32 %v4173_v16, %v4040_v50  ;;  %v6600_v16 = vld [vmem:[#allocation8 + $0x88] sm:$0xff] }
 0x53f   :  { %4757 = vmatpush.bf16.msrb.mxu2 %v6600_v16 }
 0x540   :  { %v8235_v46 = vadd.f32 %v8228_v9, %v4192_v45  ;;  %v6584_v45 = vld [vmem:[#allocation8 + $0x8] sm:$0xff] }
 0x541   :  { %4623 = vmatpush.bf16.msrb.mxu1 %v6584_v45 }
 0x542   :  { %v6836_v57 = vpop.eup %6835  ;;  %v6189_v4 = vmul.f32 -1.442695, %v8235_v46 }
 0x543   :  { %v4235_v2 = vadd.f32 1.0, %v6836_v57  ;;  %v4042_v24 = vpop.f32.mrf.mxu2 }
 0x544   :  { %6837 = vpow2.f32 %v6189_v4  ;;  %v4176_v33 = vpop.f32.mrf.mxu3  ;;  %v4043_v62 = vadd.f32 %v4042_v24, %v3941_v5  ;;  %v6583_v24 = vld [vmem:[#allocation8] sm:$0xff] }
 0x545   :  { %6839 = vrcp.f32 %v4235_v2  ;;  %v4254_v28 = vand.u32 2147483648, %v4235_v2  ;;  %v4252_v40 = vand.u32 2147483647, %v4235_v2  ;;  %vm4248_vm1 = vweird.f32 %v4235_v2  ;;  %4624 = vmatpush.bf16.msrb.mxu1 %v6583_v24 }
 0x546   :  { %v4193_v43 = vadd.f32 %v4176_v33, %v4043_v62 }
 0x547   :  { %v4255_v27 = vor.u32 1.1754944e-38, %v4254_v28  ;;  %vm4253_vm3 = vcmp.eq.f32.partialorder %v4252_v40, 8.507059e+37 }
 0x548   :  { %v8239_v39 = vadd.f32 %v8228_v9, %v4193_v43 }
 0x549   :  { %v3946_v51 = vpop.f32.mrf.mxu1 }
 0x54a   :  { %v6838_v32 = vpop.eup %6837  ;;  %v6190_v52 = vmul.f32 -1.442695, %v8239_v39 }
 0x54b   :  { %v6840_v18 = vpop.eup %6839  ;;  %v8241_v42 = vadd.f32 1.0, %v6838_v32  ;;  %v4044_v19 = vpop.f32.mrf.mxu2 }
 0x54c   :  { %v4244_v21 = vmul.f32 %v6840_v18, %v4235_v2  ;;  %v4178_v20 = vpop.f32.mrf.mxu3  ;;  %v4045_v13 = vadd.f32 %v4044_v19, %v3943_v12  ;;  %vm4249_vm0 = vweird.f32 %v6840_v18  ;;  %v6599_v2 = vld [vmem:[#allocation8 + $0x80] sm:$0xff] }
 0x54d   :  { %6841 = vrcp.f32 %v8241_v42  ;;  %vm4250_vm2 = vmor %vm4248_vm1, %vm4249_vm0  ;;  %v4269_v61 = vand.u32 2147483648, %v8241_v42  ;;  %v4267_v3 = vand.u32 2147483647, %v8241_v42  ;;  %vm4263_vm5 = vweird.f32 %v8241_v42  ;;  %4758 = vmatpush.bf16.msrb.mxu2 %v6599_v2 }
 0x54e   :  { %v4245_v44 = vsub.f32 1.0, %v4244_v21  ;;  %6843 = vpow2.f32 %v6190_v52  ;;  %v4194_v0 = vadd.f32 %v4178_v20, %v4045_v13 }
 0x54f   :  { %v4270_v33 = vor.u32 1.1754944e-38, %v4269_v61  ;;  %vm4268_vm8 = vcmp.eq.f32.partialorder %v4267_v3, 8.507059e+37 }
 0x550   :  { %v4246_v36 = vmul.f32 %v6840_v18, %v4245_v44  ;;  %v8246_v25 = vadd.f32 %v8228_v9, %v4194_v0 }
 0x551   :  { %v3948_v31 = vpop.f32.mrf.mxu1 }
 0x552   :  { %v4247_v1 = vadd.f32 %v6840_v18, %v4246_v36  ;;  %v6191_v53 = vmul.f32 -1.442695, %v8246_v25 }
 0x553   :  { %v6842_v6 = vpop.eup %6841 }
 0x554   :  { %v6844_v11 = vpop.eup %6843  ;;  %v4251_v7 = vsel %vm4250_vm2, %v6840_v18, %v4247_v1  ;;  %v4259_v29 = vmul.f32 %v6842_v6, %v8241_v42  ;;  %6845 = vpow2.f32 %v6191_v53  ;;  %vm4264_vm4 = vweird.f32 %v6842_v6 }
 0x555   :  { %v4256_v23 = vsel %vm4253_vm3, %v4255_v27, %v4251_v7  ;;  %v8250_v10 = vadd.f32 1.0, %v6844_v11  ;;  %vm4265_vm6 = vmor %vm4263_vm5, %vm4264_vm4 }
 0x556   :  { %v4363_v22 = vmul.f32 %v4256_v23, %v8231_v30  ;;  %v4260_v14 = vsub.f32 1.0, %v4259_v29 }
 0x557   :  { %v4047_v50 = vpop.f32.mrf.mxu2  ;;  %6847 = vrcp.f32 %v8250_v10  ;;  %v4282_v13 = vand.u32 2147483647, %v8250_v10  ;;  %v4284_v38 = vand.u32 2147483648, %v8250_v10  ;;  %vm4278_vm10 = vweird.f32 %v8250_v10 }
 0x558   :  { %v4181_v5 = vpop.f32.mrf.mxu3  ;;  %4371 = vst [vmem:[#allocation2 + $0x8] sm:$0xff] %v4363_v22  ;;  %v4261_v58 = vmul.f32 %v6842_v6, %v4260_v14  ;;  %v4048_v57 = vadd.f32 %v4047_v50, %v3946_v51  ;;  %v4419_v54 = vpack.c.bf16 %v4363_v22, %v4363_v22 }
 0x559   :  { %v3951_v51 = vpop.f32.mrf.mxu1  ;;  %v4285_v26 = vor.u32 1.1754944e-38, %v4284_v38  ;;  %vm4283_vm12 = vcmp.eq.f32.partialorder %v4282_v13, 8.507059e+37 }
 0x55a   :  { %v4262_v4 = vadd.f32 %v6842_v6, %v4261_v58  ;;  %v4195_v30 = vadd.f32 %v4181_v5, %v4048_v57  ;;  %v6846_v62 = vpop.eup %6845  ;;  %v4452_v8 = vunpack.c.l.b16 %v4419_v54 }
 0x55b   :  { %v8260_v48 = vadd.f32 1.0, %v6846_v62 }
 0x55c   :  { %v4266_v12 = vsel %vm4265_vm6, %v6842_v6, %v4262_v4  ;;  %v8258_v35 = vadd.f32 %v8228_v9, %v4195_v30 }
 0x55d   :  { %v6848_v43 = vpop.eup %6847  ;;  %v4271_v32 = vsel %vm4268_vm8, %v4270_v33, %v4266_v12  ;;  %6849 = vrcp.f32 %v8260_v48  ;;  %v4297_v23 = vand.u32 2147483647, %v8260_v48  ;;  %v4299_v3 = vand.u32 2147483648, %v8260_v48 }
 0x55e   :  { %v4364_v56 = vmul.f32 %v4271_v32, %v8235_v46  ;;  %v4274_v18 = vmul.f32 %v6848_v43, %v8250_v10  ;;  %v6192_v42 = vmul.f32 -1.442695, %v8258_v35  ;;  %vm4279_vm9 = vweird.f32 %v6848_v43 }
 0x55f   :  { %v4049_v21 = vpop.f32.mrf.mxu2  ;;  %v4379_v36 = vld [vmem:[#allocation2 + $0x7] sm:$0xff]  ;;  %vm4280_vm11 = vmor %vm4278_vm10, %vm4279_vm9  ;;  %vm4293_vm14 = vweird.f32 %v8260_v48  ;;  %vm4298_vm0 = vcmp.eq.f32.partialorder %v4297_v23, 8.507059e+37 }
 0x560   :  { %v4183_v52 = vpop.f32.mrf.mxu3  ;;  %4372 = vst [vmem:[#allocation2 + $0x10] sm:$0xff] %v4364_v56  ;;  %v4275_v19 = vsub.f32 1.0, %v4274_v18  ;;  %6851 = vpow2.f32 %v6192_v42  ;;  %v4050_v20 = vadd.f32 %v4049_v21, %v3948_v31  ;;  %v4420_v44 = vpack.c.bf16 %v4364_v56, %v4364_v56 }
 0x561   :  { %v4387_v47 = vpack.c.bf16 %v4379_v36, %v4379_v36  ;;  %v3953_v42 = vpop.f32.mrf.mxu1 }
 0x562   :  { %v4276_v17 = vmul.f32 %v6848_v43, %v4275_v19  ;;  %v4196_v46 = vadd.f32 %v4183_v52, %v4050_v20  ;;  %v4453_v28 = vunpack.c.l.b16 %v4420_v44 }
 0x563   :  { %v6850_v63 = vpop.eup %6849  ;;  %v4553_v57 = vunpack.c.l.b16 %v4387_v47 }
 0x564   :  { %v4277_v40 = vadd.f32 %v6848_v43, %v4276_v17  ;;  %v8270_v0 = vadd.f32 %v8228_v9, %v4196_v46  ;;  %v4460_v1 = vpack.c.b16 %v4453_v28, %v4452_v8  ;;  %v4289_v11 = vmul.f32 %v6850_v63, %v8260_v48 }
 0x565   :  { %vm4294_vm13 = vweird.f32 %v6850_v63 }
 0x566   :  { %v6852_v6 = vpop.eup %6851  ;;  %v4281_v27 = vsel %vm4280_vm11, %v6848_v43, %v4277_v40  ;;  %v6193_v7 = vmul.f32 -1.442695, %v8270_v0  ;;  %4524 = vmatmul.bf16.vlgmr.msrb.gmra.mxu0 %v4460_v1  ;;  %v4290_v45 = vsub.f32 1.0, %v4289_v11  ;;  %vm4295_vm15 = vmor %vm4293_vm14, %vm4294_vm13  ;;  %v4300_v43 = vor.u32 1.1754944e-38, %v4299_v3 }
 0x567   :  { %v4052_v29 = vpop.f32.mrf.mxu2  ;;  %v4286_v53 = vsel %vm4283_vm12, %v4285_v26, %v4281_v27  ;;  %v8275_v10 = vadd.f32 1.0, %v6852_v6  ;;  %v4380_v50 = vld [vmem:[#allocation2 + $0xf] sm:$0xff] }
 0x568   :  { %v4053_v22 = vadd.f32 %v4052_v29, %v3951_v51  ;;  %v4186_v14 = vpop.f32.mrf.mxu3  ;;  %v4646_v5 = vld [vmem:[#allocation2 + $0x9] sm:$0xff]  ;;  %v4365_v16 = vmul.f32 %v4286_v53, %v8239_v39  ;;  %6853 = vpow2.f32 %v6193_v7  ;;  %v4388_v61 = vpack.c.bf16 %v4380_v50, %v4380_v50  ;;  %v4647_v58 = vld [vmem:[#allocation2 + $0x11] sm:$0xff] }
 0x569   :  { %6855 = vrcp.f32 %v8275_v10  ;;  %v4291_v4 = vmul.f32 %v6850_v63, %v4290_v45  ;;  %v4654_v2 = vpack.c.bf16 %v4646_v5, %v4646_v5  ;;  %v4655_v24 = vpack.c.bf16 %v4647_v58, %v4647_v58 }
 0x56a   :  { %4373 = vst [vmem:[#allocation2 + $0x28] sm:$0xff] %v4365_v16  ;;  %v4197_v30 = vadd.f32 %v4186_v14, %v4053_v22  ;;  %v4554_v31 = vunpack.c.l.b16 %v4388_v61  ;;  %v4421_v48 = vpack.c.bf16 %v4365_v16, %v4365_v16  ;;  %v4312_v40 = vand.u32 2147483647, %v8275_v10 }
 0x56b   :  { %v4292_v33 = vadd.f32 %v6850_v63, %v4291_v4  ;;  %v4687_v12 = vunpack.c.l.b16 %v4654_v2  ;;  %v4688_v32 = vunpack.c.l.b16 %v4655_v24  ;;  %v4314_v51 = vand.u32 2147483648, %v8275_v10 }
 0x56c   :  { %v8282_v39 = vadd.f32 %v8228_v9, %v4197_v30  ;;  %v4561_v62 = vpack.c.b16 %v4554_v31, %v4553_v57  ;;  %v4454_v1 = vunpack.c.l.b16 %v4421_v48  ;;  %vm4308_vm2 = vweird.f32 %v8275_v10 }
 0x56d   :  { %v4296_v56 = vsel %vm4295_vm15, %v6850_v63, %v4292_v33  ;;  %v4695_v13 = vpack.c.b16 %v4688_v32, %v4687_v12  ;;  %vm4313_vm4 = vcmp.eq.f32.partialorder %v4312_v40, 8.507059e+37  ;;  %v4315_v53 = vor.u32 1.1754944e-38, %v4314_v51 }
 0x56e   :  { %v6854_v54 = vpop.eup %6853  ;;  %v6194_v18 = vmul.f32 -1.442695, %v8282_v39  ;;  %4625 = vmatmul.bf16.vlgmr.msrb.gmra.mxu1 %v4561_v62  ;;  %v4301_v19 = vsel %vm4298_vm0, %v4300_v43, %v4296_v56 }
 0x56f   :  { %v4054_v21 = vpop.f32.mrf.mxu2  ;;  %v6856_v52 = vpop.eup %6855  ;;  %v8286_v20 = vadd.f32 1.0, %v6854_v54  ;;  %v4366_v38 = vmul.f32 %v4301_v19, %v8246_v25  ;;  %4759 = vmatmul.bf16.vlgmr.msrb.gmra.mxu2 %v4695_v13 }
 0x570   :  { %v4055_v44 = vadd.f32 %v4054_v21, %v3953_v42  ;;  %v4304_v8 = vmul.f32 %v6856_v52, %v8275_v10  ;;  %6857 = vpow2.f32 %v6194_v18  ;;  %v4188_v17 = vpop.f32.mrf.mxu3  ;;  %vm4309_vm1 = vweird.f32 %v6856_v52 }
 0x571   :  { %6859 = vrcp.f32 %v8286_v20  ;;  %4374 = vst [vmem:[#allocation2 + $0x30] sm:$0xff] %v4366_v38  ;;  %v4422_v36 = vpack.c.bf16 %v4366_v38, %v4366_v38  ;;  %v4381_v47 = vld [vmem:[#allocation2 + $0x27] sm:$0xff]  ;;  %vm4310_vm3 = vmor %vm4308_vm2, %vm4309_vm1  ;;  %v4327_v3 = vand.u32 2147483647, %v8286_v20  ;;  %v4329_v57 = vand.u32 2147483648, %v8286_v20 }
 0x572   :  { %v4305_v46 = vsub.f32 1.0, %v4304_v8  ;;  %v4198_v28 = vadd.f32 %v4188_v17, %v4055_v44  ;;  %vm4323_vm6 = vweird.f32 %v8286_v20 }
 0x573   :  { %v4455_v26 = vunpack.c.l.b16 %v4422_v36  ;;  %v4330_v54 = vor.u32 1.1754944e-38, %v4329_v57  ;;  %vm4328_vm9 = vcmp.eq.f32.partialorder %v4327_v3, 8.507059e+37 }
 0x574   :  { %v4306_v63 = vmul.f32 %v6856_v52, %v4305_v46  ;;  %v8294_v25 = vadd.f32 %v8228_v9, %v4198_v28  ;;  %v4389_v9 = vpack.c.bf16 %v4381_v47, %v4381_v47 }
 0x575   :  { %v4461_v7 = vpack.c.b16 %v4455_v26, %v4454_v1 }
 0x576   :  { %v6858_v6 = vpop.eup %6857  ;;  %v4307_v27 = vadd.f32 %v6856_v52, %v4306_v63  ;;  %v6195_v11 = vmul.f32 -1.442695, %v8294_v25  ;;  %v4555_v2 = vunpack.c.l.b16 %v4389_v9 }
 0x577   :  { %v6860_v29 = vpop.eup %6859  ;;  %v4241_v23 = vadd.f32 1.0, %v6858_v6  ;;  %4529 = vmatmul.bf16.gmra.mxu0 %v4461_v7 }
 0x578   :  { %v4311_v22 = vsel %vm4310_vm3, %v6856_v52, %v4307_v27  ;;  %v4319_v14 = vmul.f32 %v6860_v29, %v8286_v20  ;;  %6861 = vpow2.f32 %v6195_v11  ;;  %v4382_v5 = vld [vmem:[#allocation2 + $0x2f] sm:$0xff]  ;;  %vm4324_vm5 = vweird.f32 %v6860_v29 }
 0x579   :  { %v4316_v50 = vsel %vm4313_vm4, %v4315_v53, %v4311_v22  ;;  %6863 = vrcp.f32 %v4241_v23  ;;  %v4648_v16 = vld [vmem:[#allocation2 + $0x29] sm:$0xff]  ;;  %v4390_v61 = vpack.c.bf16 %v4382_v5, %v4382_v5  ;;  %v4649_v58 = vld [vmem:[#allocation2 + $0x31] sm:$0xff]  ;;  %vm4325_vm8 = vmor %vm4323_vm6, %vm4324_vm5  ;;  %v4344_v13 = vand.u32 2147483648, %v4241_v23 }
 0x57a   :  { %v4367_v10 = vmul.f32 %v4316_v50, %v8258_v35  ;;  %v4320_v45 = vsub.f32 1.0, %v4319_v14  ;;  %v4656_v4 = vpack.c.bf16 %v4648_v16, %v4648_v16  ;;  %v4657_v30 = vpack.c.bf16 %v4649_v58, %v4649_v58 }
 0x57b   :  { %v4556_v24 = vunpack.c.l.b16 %v4390_v61  ;;  %v4342_v38 = vand.u32 2147483647, %v4241_v23  ;;  %vm4338_vm11 = vweird.f32 %v4241_v23  ;;  %v4345_v51 = vor.u32 1.1754944e-38, %v4344_v13 }
 0x57c   :  { %4375 = vst [vmem:[#allocation2 + $0x48] sm:$0xff] %v4367_v10  ;;  %v4321_v31 = vmul.f32 %v6860_v29, %v4320_v45  ;;  %v4689_v33 = vunpack.c.l.b16 %v4656_v4  ;;  %v4690_v62 = vunpack.c.l.b16 %v4657_v30  ;;  %v4423_v44 = vpack.c.bf16 %v4367_v10, %v4367_v10 }
 0x57d   :  { %v4562_v35 = vpack.c.b16 %v4556_v24, %v4555_v2  ;;  %vm4343_vm13 = vcmp.eq.f32.partialorder %v4342_v38, 8.507059e+37 }
 0x57e   :  { %v6862_v12 = vpop.eup %6861  ;;  %v4322_v43 = vadd.f32 %v6860_v29, %v4321_v31  ;;  %v4696_v18 = vpack.c.b16 %v4690_v62, %v4689_v33  ;;  %v4456_v46 = vunpack.c.l.b16 %v4423_v44 }
 0x57f   :  { %v6864_v32 = vpop.eup %6863  ;;  %v4242_v56 = vadd.f32 1.0, %v6862_v12  ;;  %4630 = vmatmul.bf16.gmra.mxu1 %v4562_v35 }
 0x580   :  { %v4326_v42 = vsel %vm4325_vm8, %v6860_v29, %v4322_v43  ;;  %v4334_v21 = vmul.f32 %v6864_v32, %v4241_v23  ;;  %4764 = vmatmul.bf16.gmra.mxu2 %v4696_v18  ;;  %vm4339_vm10 = vweird.f32 %v6864_v32 }
 0x581   :  { %v4331_v48 = vsel %vm4328_vm9, %v4330_v54, %v4326_v42  ;;  %6865 = vrcp.f32 %v4242_v56  ;;  %vm4340_vm12 = vmor %vm4338_vm11, %vm4339_vm10  ;;  %v4357_v11 = vand.u32 2147483647, %v4242_v56  ;;  %v4359_v7 = vand.u32 2147483648, %v4242_v56 }
 0x582   :  { %v4368_v52 = vmul.f32 %v4331_v48, %v8270_v0  ;;  %v4335_v19 = vsub.f32 1.0, %v4334_v21  ;;  %vm4353_vm15 = vweird.f32 %v4242_v56 }
 0x583   :  { %v4383_v36 = vld [vmem:[#allocation2 + $0x47] sm:$0xff]  ;;  %vm4358_vm1 = vcmp.eq.f32.partialorder %v4357_v11, 8.507059e+37 }
 0x584   :  { %4376 = vst [vmem:[#allocation2 + $0x50] sm:$0xff] %v4368_v52  ;;  %v4336_v20 = vmul.f32 %v6864_v32, %v4335_v19  ;;  %v4424_v8 = vpack.c.bf16 %v4368_v52, %v4368_v52  ;;  %v4391_v47 = vpack.c.bf16 %v4383_v36, %v4383_v36 }
 0x586   :  { %v4337_v17 = vadd.f32 %v6864_v32, %v4336_v20  ;;  %v4457_v28 = vunpack.c.l.b16 %v4424_v8  ;;  %v4557_v5 = vunpack.c.l.b16 %v4391_v47 }
 0x587   :  { %v6866_v40 = vpop.eup %6865 }
 0x588   :  { %v4341_v1 = vsel %vm4340_vm12, %v6864_v32, %v4337_v17  ;;  %v4349_v63 = vmul.f32 %v6866_v40, %v4242_v56  ;;  %v4462_v0 = vpack.c.b16 %v4457_v28, %v4456_v46  ;;  %vm4354_vm14 = vweird.f32 %v6866_v40 }
 0x589   :  { %v4346_v26 = vsel %vm4343_vm13, %v4345_v51, %v4341_v1  ;;  %vm4355_vm0 = vmor %vm4353_vm15, %vm4354_vm14 }
 0x58a   :  { %v4369_v6 = vmul.f32 %v4346_v26, %v8282_v39  ;;  %v4350_v27 = vsub.f32 1.0, %v4349_v63  ;;  %4534 = vmatmul.bf16.gmra.mxu0 %v4462_v0  ;;  %v4360_v39 = vor.u32 1.1754944e-38, %v4359_v7 }
 0x58b   :  { %v4384_v29 = vld [vmem:[#allocation2 + $0x4f] sm:$0xff] }
 0x58c   :  { %v4650_v53 = vld [vmem:[#allocation2 + $0x49] sm:$0xff]  ;;  %v4651_v23 = vld [vmem:[#allocation2 + $0x51] sm:$0xff]  ;;  %4377 = vst [vmem:[#allocation2 + $0x68] sm:$0xff] %v4369_v6  ;;  %v4351_v22 = vmul.f32 %v6866_v40, %v4350_v27  ;;  %v4392_v14 = vpack.c.bf16 %v4384_v29, %v4384_v29  ;;  %v4425_v31 = vpack.c.bf16 %v4369_v6, %v4369_v6 }
 0x58d   :  { %v4658_v9 = vpack.c.bf16 %v4650_v53, %v4650_v53  ;;  %v4659_v50 = vpack.c.bf16 %v4651_v23, %v4651_v23 }
 0x58e   :  { %v4352_v16 = vadd.f32 %v6866_v40, %v4351_v22  ;;  %v4558_v10 = vunpack.c.l.b16 %v4392_v14  ;;  %v4458_v24 = vunpack.c.l.b16 %v4425_v31 }
 0x58f   :  { %v4691_v45 = vunpack.c.l.b16 %v4658_v9  ;;  %v4692_v61 = vunpack.c.l.b16 %v4659_v50 }
 0x590   :  { %v4356_v58 = vsel %vm4355_vm0, %v6866_v40, %v4352_v16  ;;  %v4563_v3 = vpack.c.b16 %v4558_v10, %v4557_v5  ;;  %v8307_v40 = vld [vmem:[#allocation14 + $0x6] ss:$0 sm:$0xff] }
 0x591   :  { %v4697_v57 = vpack.c.b16 %v4692_v61, %v4691_v45  ;;  %v4361_v4 = vsel %vm4358_vm1, %v4360_v39, %v4356_v58 }
 0x592   :  { %v4370_v30 = vmul.f32 %v4361_v4, %v8294_v25  ;;  %4635 = vmatmul.bf16.gmra.mxu1 %v4563_v3 }
 0x593   :  { %4769 = vmatmul.bf16.gmra.mxu2 %v4697_v57  ;;  %v4385_v62 = vld [vmem:[#allocation2 + $0x67] sm:$0xff] }
 0x594   :  { %4378 = vst [vmem:[#allocation2 + $0x70] sm:$0xff] %v4370_v30  ;;  %v4426_v2 = vpack.c.bf16 %v4370_v30, %v4370_v30  ;;  %v4393_v43 = vpack.c.bf16 %v4385_v62, %v4385_v62 }
 0x596   :  { %v4459_v33 = vunpack.c.l.b16 %v4426_v2  ;;  %v4559_v21 = vunpack.c.l.b16 %v4393_v43 }
 0x598   :  { %v4463_v12 = vpack.c.b16 %v4459_v33, %v4458_v24 }
 0x59a   :  { %4539 = vmatmul.bf16.gmra.mxu0 %v4463_v12 }
 0x59b   :  { %v4386_v35 = vld [vmem:[#allocation2 + $0x6f] sm:$0xff] }
 0x59c   :  { %v4652_v32 = vld [vmem:[#allocation2 + $0x69] sm:$0xff]  ;;  %v4653_v54 = vld [vmem:[#allocation2 + $0x71] sm:$0xff]  ;;  %v4394_v56 = vpack.c.bf16 %v4386_v35, %v4386_v35 }
 0x59d   :  { %v4660_v18 = vpack.c.bf16 %v4652_v32, %v4652_v32  ;;  %v4661_v42 = vpack.c.bf16 %v4653_v54, %v4653_v54 }
 0x59e   :  { %v4560_v48 = vunpack.c.l.b16 %v4394_v56 }
 0x59f   :  { %v4693_v25 = vunpack.c.l.b16 %v4660_v18  ;;  %v4694_v52 = vunpack.c.l.b16 %v4661_v42 }
 0x5a0   :  { %v4564_v19 = vpack.c.b16 %v4560_v48, %v4559_v21 }
 0x5a1   :  { %v4698_v44 = vpack.c.b16 %v4694_v52, %v4693_v25 }
 0x5a2   :  { %4640 = vmatmul.bf16.gmra.mxu1 %v4564_v19 }
 0x5a3   :  { %4774 = vmatmul.bf16.gmra.mxu2 %v4698_v44 }
 0x5e3   :  { %v4525_v13 = vpop.f32.mrf.mxu0 }
 0x5eb   :  { %v4626_v20 = vpop.f32.mrf.mxu1  ;;  %v4527_v38 = vpop.f32.mrf.mxu0 }
 0x5ec   :  { %v4627_v46 = vadd.f32 %v4626_v20, %v4525_v13 }
 0x5f2   :  { %v4760_v17 = vpop.f32.mrf.mxu2 }
 0x5f3   :  { %v4628_v8 = vpop.f32.mrf.mxu1  ;;  %v4780_v36 = vadd.f32 %v4760_v17, %v4627_v46 }
 0x5f4   :  { %v4530_v28 = vpop.f32.mrf.mxu0  ;;  %v4629_v51 = vadd.f32 %v4628_v8, %v4527_v38 }
 0x5f5   :  { %v4792_v26 = vadd.f32 %v8307_v40, %v4780_v36 }
 0x5f7   :  { %v8312_v6 = vadd.f32 %v4792_v26, %v8123_v41 }
 0x5f9   :  { %v6292_v22 = vmul.f32 -1.442695, %v8312_v6 }
 0x5fa   :  { %v4762_v1 = vpop.f32.mrf.mxu2 }
 0x5fb   :  { %v4781_v63 = vadd.f32 %v4762_v1, %v4629_v51  ;;  %6867 = vpow2.f32 %v6292_v22 }
 0x5fc   :  { %v4631_v0 = vpop.f32.mrf.mxu1  ;;  %v4532_v7 = vpop.f32.mrf.mxu0 }
 0x5fd   :  { %v4793_v47 = vadd.f32 %v8307_v40, %v4781_v63  ;;  %v4632_v11 = vadd.f32 %v4631_v0, %v4530_v28 }
 0x5ff   :  { %v8315_v27 = vadd.f32 %v4793_v47, %v8149_v55 }
 0x601   :  { %v6293_v14 = vmul.f32 -1.442695, %v8315_v27  ;;  %v6868_v39 = vpop.eup %6867 }
 0x602   :  { %v8328_v57 = vadd.f32 1.0, %v6868_v39  ;;  %v6350_v39 = vld [vmem:[#allocation10 + $0x60] sm:$0xf] }
 0x603   :  { %v4765_v29 = vpop.f32.mrf.mxu2  ;;  %6869 = vpow2.f32 %v6293_v14 }
 0x604   :  { %v4782_v53 = vadd.f32 %v4765_v29, %v4632_v11  ;;  %v4633_v23 = vpop.f32.mrf.mxu1  ;;  %v6358_v29 = vld [vmem:[#allocation10 + $0x70] sm:$0xf]  ;;  %vm4845_vm3 = vweird.f32 %v8328_v57 }
 0x605   :  { %v4634_v55 = vadd.f32 %v4633_v23, %v4532_v7  ;;  %v4849_v23 = vand.u32 2147483647, %v8328_v57 }
 0x606   :  { %v4794_v9 = vadd.f32 %v8307_v40, %v4782_v53  ;;  %v6622_v53 = vld [vmem:[#allocation10 + $0x74] sm:$0xf0] }
 0x607   :  { %v4535_v10 = vpop.f32.mrf.mxu0 }
 0x608   :  { %v8321_v50 = vadd.f32 %v4794_v9, %v8165_v34 }
 0x609   :  { %v6870_v58 = vpop.eup %6869 }
 0x60a   :  { %v6294_v41 = vmul.f32 -1.442695, %v8321_v50  ;;  %v8331_v4 = vadd.f32 1.0, %v6870_v58  ;;  %v6620_v58 = vld [vmem:[#allocation10 + $0x64] sm:$0xf0] }
 0x60b   :  { %v4767_v5 = vpop.f32.mrf.mxu2 }
 0x60c   :  { %v4783_v16 = vadd.f32 %v4767_v5, %v4634_v55  ;;  %6871 = vpow2.f32 %v6294_v41  ;;  %v4851_v41 = vand.u32 2147483648, %v8328_v57  ;;  %v4864_v55 = vand.u32 2147483647, %v8331_v4 }
 0x60d   :  { %vm4860_vm4 = vweird.f32 %v8331_v4 }
 0x60e   :  { %v4795_v45 = vadd.f32 %v8307_v40, %v4783_v16  ;;  %v4866_v16 = vand.u32 2147483648, %v8331_v4  ;;  %vm8426_vm13 = vcmp.eq.f32.partialorder %v4864_v55, 8.507059e+37 }
 0x60f   :  { %v4636_v61 = vpop.f32.mrf.mxu1  ;;  %v4537_v62 = vpop.f32.mrf.mxu0 }
 0x610   :  { %v8326_v3 = vadd.f32 %v4795_v45, %v8180_v59  ;;  %v4637_v30 = vadd.f32 %v4636_v61, %v4535_v10  ;;  %v6359_v61 = vor.u32 %v6622_v53, %v6358_v29 }
 0x612   :  { %v6295_v34 = vmul.f32 -1.442695, %v8326_v3  ;;  %v6872_v31 = vpop.eup %6871  ;;  %5129 = vmatpush.bf16.msrb.mxu3 %v6359_v61 }
 0x613   :  { %v8333_v24 = vadd.f32 1.0, %v6872_v31 }
 0x614   :  { %6873 = vpow2.f32 %v6295_v34 }
 0x615   :  { %6875 = vrcp.f32 %v8328_v57  ;;  %vm4875_vm10 = vweird.f32 %v8333_v24 }
 0x616   :  { %v4770_v2 = vpop.f32.mrf.mxu2  ;;  %6877 = vrcp.f32 %v8331_v4 }
 0x617   :  { %v4784_v33 = vadd.f32 %v4770_v2, %v4637_v30  ;;  %v4638_v12 = vpop.f32.mrf.mxu1  ;;  %6879 = vrcp.f32 %v8333_v24  ;;  %v4540_v44 = vpop.f32.mrf.mxu0 }
 0x618   :  { %v4639_v21 = vadd.f32 %v4638_v12, %v4537_v62  ;;  %v6351_v62 = vor.u32 %v6620_v58, %v6350_v39  ;;  %v6614_v39 = vld [vmem:[#allocation10 + $0x34] sm:$0xf0] }
 0x619   :  { %v4796_v59 = vadd.f32 %v8307_v40, %v4784_v33 }
 0x61a   :  { %v6874_v43 = vpop.eup %6873  ;;  %5130 = vmatpush.bf16.msrb.mxu3 %v6351_v62  ;;  %v6612_v62 = vld [vmem:[#allocation10 + $0x24] sm:$0xf0] }
 0x61b   :  { %v8340_v35 = vadd.f32 %v4796_v59, %v8201_v37  ;;  %v8342_v32 = vadd.f32 1.0, %v6874_v43  ;;  %v8344_v54 = vpop.eup %6875 }
 0x61c   :  { %v8347_v42 = vpop.eup %6877  ;;  %v4841_v52 = vmul.f32 %v8344_v54, %v8328_v57  ;;  %vm4846_vm2 = vweird.f32 %v8344_v54 }
 0x61d   :  { %v6296_v56 = vmul.f32 -1.442695, %v8340_v35  ;;  %6881 = vrcp.f32 %v8342_v32  ;;  %v8350_v25 = vpop.eup %6879  ;;  %v4856_v19 = vmul.f32 %v8347_v42, %v8331_v4  ;;  %vm4861_vm5 = vweird.f32 %v8347_v42  ;;  %vm8449_vm0 = vmor %vm4845_vm3, %vm4846_vm2 }
 0x61e   :  { %v4772_v18 = vpop.f32.mrf.mxu2  ;;  %v4871_v20 = vmul.f32 %v8350_v25, %v8333_v24  ;;  %v4842_v8 = vsub.f32 1.0, %v4841_v52  ;;  %v4894_v59 = vand.u32 2147483647, %v8342_v32  ;;  %v4896_v43 = vand.u32 2147483648, %v8342_v32  ;;  %v6342_v52 = vld [vmem:[#allocation10 + $0x50] sm:$0xf]  ;;  %vm8417_vm12 = vmor %vm4860_vm4, %vm4861_vm5 }
 0x61f   :  { %v4641_v48 = vpop.f32.mrf.mxu1  ;;  %6883 = vpow2.f32 %v6296_v56  ;;  %v4785_v37 = vadd.f32 %v4772_v18, %v4639_v21  ;;  %v4857_v28 = vsub.f32 1.0, %v4856_v19  ;;  %v4542_v45 = vpop.f32.mrf.mxu0  ;;  %vm4876_vm8 = vweird.f32 %v8350_v25 }
 0x620   :  { %v4642_v46 = vadd.f32 %v4641_v48, %v4540_v44  ;;  %v4872_v26 = vsub.f32 1.0, %v4871_v20  ;;  %v4843_v7 = vmul.f32 %v8344_v54, %v4842_v8  ;;  %vm4890_vm9 = vweird.f32 %v8342_v32  ;;  %vm8432_vm14 = vmor %vm4875_vm10, %vm4876_vm8 }
 0x621   :  { %v4797_v13 = vadd.f32 %v8307_v40, %v4785_v37  ;;  %v4858_v22 = vmul.f32 %v8347_v42, %v4857_v28  ;;  %v6618_v37 = vld [vmem:[#allocation10 + $0x54] sm:$0xf0]  ;;  %v4881_v19 = vand.u32 2147483648, %v8333_v24  ;;  %v4879_v8 = vand.u32 2147483647, %v8333_v24 }
 0x622   :  { %v4873_v10 = vmul.f32 %v8350_v25, %v4872_v26  ;;  %v8386_v34 = vadd.f32 %v8344_v54, %v4843_v7  ;;  %v6343_v28 = vor.u32 %v6618_v37, %v6342_v52  ;;  %vm4895_vm15 = vcmp.eq.f32.partialorder %v4894_v59, 8.507059e+37  ;;  %v6616_v26 = vld [vmem:[#allocation10 + $0x44] sm:$0xf0] }
 0x623   :  { %v8359_v38 = vpop.eup %6881  ;;  %v8362_v17 = vadd.f32 %v4797_v13, %v8208_v60  ;;  %v4859_v31 = vadd.f32 %v8347_v42, %v4858_v22  ;;  %v4882_v7 = vor.u32 1.1754944e-38, %v4881_v19  ;;  %vm4880_vm1 = vcmp.eq.f32.partialorder %v4879_v8, 8.507059e+37  ;;  %v6610_v8 = vld [vmem:[#allocation10 + $0x14] sm:$0xf0] }
 0x624   :  { %v4886_v36 = vmul.f32 %v8359_v38, %v8342_v32  ;;  %vm4891_vm6 = vweird.f32 %v8359_v38  ;;  %v4874_v21 = vadd.f32 %v8350_v25, %v4873_v10  ;;  %5131 = vmatpush.bf16.msrb.mxu3 %v6343_v28  ;;  %vm4850_vm2 = vcmp.eq.f32.partialorder %v4849_v23, 8.507059e+37  ;;  %v6310_v32 = vld [vmem:[#allocation10 + $0x10] sm:$0xf] }
 0x625   :  { %v6884_v1 = vpop.eup %6883  ;;  %v6297_v63 = vmul.f32 -1.442695, %v8362_v17  ;;  %vm8406_vm11 = vmor %vm4890_vm9, %vm4891_vm6 }
 0x626   :  { %v4775_v51 = vpop.f32.mrf.mxu2  ;;  %v4887_v47 = vsub.f32 1.0, %v4886_v36  ;;  %v8367_v11 = vadd.f32 1.0, %v6884_v1  ;;  %v4897_v36 = vor.u32 1.1754944e-38, %v4896_v43  ;;  %v4867_v1 = vor.u32 1.1754944e-38, %v4866_v16 }
 0x627   :  { %v4786_v0 = vadd.f32 %v4775_v51, %v4642_v46  ;;  %6885 = vpow2.f32 %v6297_v63  ;;  %v4643_v9 = vpop.f32.mrf.mxu1  ;;  %v4878_v63 = vsel %vm8432_vm14, %v8350_v25, %v4874_v21  ;;  %v4848_v25 = vsel %vm8449_vm0, %v8344_v54, %v8386_v34  ;;  %v6326_v54 = vld [vmem:[#allocation10 + $0x30] sm:$0xf] }
 0x628   :  { %v4888_v14 = vmul.f32 %v8359_v38, %v4887_v47  ;;  %6887 = vrcp.f32 %v8367_v11  ;;  %v4644_v30 = vadd.f32 %v4643_v9, %v4542_v45  ;;  %v4883_v55 = vsel %vm4880_vm1, %v4882_v7, %v4878_v63  ;;  %v6302_v63 = vld [vmem:[#allocation10] sm:$0xf] }
 0x629   :  { %v4798_v60 = vadd.f32 %v8307_v40, %v4786_v0  ;;  %v6334_v0 = vld [vmem:[#allocation10 + $0x40] sm:$0xf]  ;;  %v4962_v34 = vmul.f32 %v4883_v55, %v8321_v50  ;;  %v4911_v57 = vand.u32 2147483648, %v8367_v11  ;;  %v6327_v23 = vor.u32 %v6614_v39, %v6326_v54 }
 0x62a   :  { %v4889_v2 = vadd.f32 %v8359_v38, %v4888_v14  ;;  %v6335_v22 = vor.u32 %v6616_v26, %v6334_v0  ;;  %v4852_v14 = vor.u32 1.1754944e-38, %v4851_v41  ;;  %vm4905_vm4 = vweird.f32 %v8367_v11  ;;  %v6608_v0 = vld [vmem:[#allocation10 + $0x4] sm:$0xf0] }
 0x62b   :  { %v8379_v5 = vadd.f32 %v4798_v60, %v8216_v15  ;;  %v4912_v21 = vor.u32 1.1754944e-38, %v4911_v57 }
 0x62c   :  { %v4893_v46 = vsel %vm8406_vm11, %v8359_v38, %v4889_v2  ;;  %v4863_v38 = vsel %vm8417_vm12, %v8347_v42, %v4859_v31  ;;  %v4853_v45 = vsel %vm4850_vm2, %v4852_v14, %v4848_v25  ;;  %5132 = vmatpush.bf16.msrb.mxu3 %v6335_v22  ;;  %v7132_v31 = vmov 16.0   ;;  %v6619_v14 = vld [vmem:[#allocation10 + $0x64] sm:$0xf] }
 0x62d   :  { %v6298_v15 = vmul.f32 -1.442695, %v8379_v5  ;;  %v6886_v12 = vpop.eup %6885  ;;  %v4898_v60 = vsel %vm4895_vm15, %v4897_v36, %v4893_v46  ;;  %v4868_v9 = vsel %vm8426_vm13, %v4867_v1, %v4863_v38 }
 0x62e   :  { %v4777_v33 = vpop.f32.mrf.mxu2  ;;  %v8395_v18 = vpop.eup %6887  ;;  %v8400_v48 = vadd.f32 1.0, %v6886_v12  ;;  %v4963_v10 = vmul.f32 %v4898_v60, %v8326_v3  ;;  %v4961_v58 = vmul.f32 %v4868_v9, %v8315_v27  ;;  %v4909_v3 = vand.u32 2147483647, %v8367_v11  ;;  %v6352_v9 = vld [vmem:[#allocation10 + $0x68] sm:$0xf0] }
 0x62f   :  { %6889 = vpow2.f32 %v6298_v15  ;;  %v4787_v56 = vadd.f32 %v4777_v33, %v4644_v30  ;;  %v4901_v13 = vmul.f32 %v8395_v18, %v8367_v11  ;;  %vm4906_vm3 = vweird.f32 %v8395_v18  ;;  %v6318_v33 = vld [vmem:[#allocation10 + $0x20] sm:$0xf] }
 0x630   :  { %6891 = vrcp.f32 %v8400_v48  ;;  %v4960_v30 = vmul.f32 %v4853_v45, %v8312_v6  ;;  %v4975_v2 = vadd.f32 %v4963_v10, %v4962_v34  ;;  %vm8480_vm5 = vmor %vm4905_vm4, %vm4906_vm3  ;;  %v4926_v50 = vand.u32 2147483648, %v8400_v48  ;;  %5133 = vmatpush.bf16.msrb.mxu3 %v6327_v23 }
 0x631   :  { %v4799_v20 = vadd.f32 %v8307_v40, %v4787_v56  ;;  %v4902_v24 = vsub.f32 1.0, %v4901_v13  ;;  %v4924_v6 = vand.u32 2147483647, %v8400_v48  ;;  %v6319_v37 = vor.u32 %v6612_v62, %v6318_v33 }
 0x632   :  { %v4968_v56 = vadd.f32 %v4961_v58, %v4960_v30  ;;  %vm4910_vm8 = vcmp.eq.f32.partialorder %v4909_v3, 8.507059e+37  ;;  %vm4920_vm9 = vweird.f32 %v8400_v48  ;;  %v6355_v57 = vor.u32 %v6619_v14, %v6352_v9 }
 0x633   :  { %v8437_v51 = vadd.f32 %v4799_v20, %v8221_v49  ;;  %v4903_v42 = vmul.f32 %v8395_v18, %v4902_v24  ;;  %v4927_v20 = vor.u32 1.1754944e-38, %v4926_v50  ;;  %vm4925_vm11 = vcmp.eq.f32.partialorder %v4924_v6, 8.507059e+37  ;;  %v6360_v49 = vld [vmem:[#allocation10 + $0x78] sm:$0xf0] }
 0x634   :  { %v4969_v4 = vrot.slane %v4968_v56, 4  ;;  %5134 = vmatpush.bf16.msrb.mxu3 %v6319_v37  ;;  %v6336_v37 = vld [vmem:[#allocation10 + $0x48] sm:$0xf0] }
 0x635   :  { %v6890_v47 = vpop.eup %6889  ;;  %v6299_v29 = vmul.f32 -1.442695, %v8437_v51  ;;  %v4904_v61 = vadd.f32 %v8395_v18, %v4903_v42 }
 0x636   :  { %v8459_v53 = vadd.f32 1.0, %v6890_v47  ;;  %v6892_v16 = vpop.eup %6891  ;;  %v6621_v47 = vld [vmem:[#allocation10 + $0x74] sm:$0xf]  ;;  %v4970_v42 = vadd.f32 %v4969_v4, %v4968_v56 }
 0x637   :  { %6893 = vpow2.f32 %v6299_v29  ;;  %v4916_v41 = vmul.f32 %v6892_v16, %v8400_v48  ;;  %v4908_v11 = vsel %vm8480_vm5, %v8395_v18, %v4904_v61  ;;  %vm4921_vm6 = vweird.f32 %v6892_v16 }
 0x638   :  { %6895 = vrcp.f32 %v8459_v53  ;;  %v4976_v18 = vrot.slane %v4975_v2, 4  ;;  %v4913_v13 = vsel %vm4910_vm8, %v4912_v21, %v4908_v11  ;;  %vm4922_vm10 = vmor %vm4920_vm9, %vm4921_vm6  ;;  %v6311_v48 = vor.u32 %v6610_v8, %v6310_v32  ;;  %v6615_v21 = vld [vmem:[#allocation10 + $0x44] sm:$0xf] }
 0x639   :  { %v4917_v15 = vsub.f32 1.0, %v4916_v41  ;;  %6897 = vrcp.f32 %v7132_v31  ;;  %v4964_v24 = vmul.f32 %v4913_v13, %v8340_v35  ;;  %v6303_v29 = vor.u32 %v6608_v0, %v6302_v63  ;;  %v6617_v31 = vld [vmem:[#allocation10 + $0x54] sm:$0xf]  ;;  %v6320_v63 = vld [vmem:[#allocation10 + $0x28] sm:$0xf0] }
 0x63a   :  { %v4977_v26 = vadd.f32 %v4976_v18, %v4975_v2  ;;  %5135 = vmatpush.bf16.msrb.mxu3 %v6311_v48  ;;  %v4941_v10 = vand.u32 2147483648, %v8459_v53  ;;  %vm4935_vm13 = vweird.f32 %v8459_v53  ;;  %v4939_v45 = vand.u32 2147483647, %v8459_v53  ;;  %v6344_v2 = vld [vmem:[#allocation10 + $0x58] sm:$0xf0] }
 0x63b   :  { %v4918_v59 = vmul.f32 %v6892_v16, %v4917_v15  ;;  %v4971_v41 = vrot.slane %v4970_v42, 2  ;;  %v6347_v6 = vor.u32 %v6617_v31, %v6344_v2  ;;  %v6339_v32 = vor.u32 %v6615_v21, %v6336_v37  ;;  %v6628_v31 = vld [vmem:[#allocation11 + $0x28] sm:$0xff] }
 0x63c   :  { %v4942_v30 = vor.u32 1.1754944e-38, %v4941_v10  ;;  %vm4940_vm0 = vcmp.eq.f32.partialorder %v4939_v45, 8.507059e+37  ;;  %v6304_v45 = vld [vmem:[#allocation10 + $0x8] sm:$0xf0]  ;;  %vm5041_vm5 = vcmask 1041409   ;;  %vm5043_vm6 = vcmask 1042434  }
 0x63d   :  { %v6894_v12 = vpop.eup %6893  ;;  %v4919_v19 = vadd.f32 %v6892_v16, %v4918_v59  ;;  %v4972_v11 = vadd.f32 %v4971_v41, %v4970_v42  ;;  %vm5045_vm8 = vcmask 1043459   ;;  %v5027_v2 = vld [vmem:[#allocation14 + $0x7] sm:$0x3] }
 0x63e   :  { %v8489_v43 = vpop.eup %6895  ;;  %v8491_v52 = vadd.f32 1.0, %v6894_v12  ;;  %5136 = vmatpush.bf16.msrb.mxu3 %v6303_v29 }
 0x63f   :  { %v4931_v44 = vmul.f32 %v8489_v43, %v8459_v53  ;;  %v4923_v46 = vsel %vm4922_vm10, %v6892_v16, %v4919_v19  ;;  %v8497_v40 = vpop.eup %6897  ;;  %vm4936_vm12 = vweird.f32 %v8489_v43  ;;  %v4978_v16 = vrot.slane %v4977_v26, 2 }
 0x640   :  { %6899 = vrcp.f32 %v8491_v52  ;;  %v4928_v36 = vsel %vm4925_vm11, %v4927_v20, %v4923_v46  ;;  %v4997_v55 = vmul.f32 16.0, %v8497_v40  ;;  %vm8511_vm14 = vmor %vm4935_vm13, %vm4936_vm12  ;;  %v4954_v58 = vand.u32 2147483647, %v8491_v52  ;;  %v6613_v46 = vld [vmem:[#allocation10 + $0x34] sm:$0xf] }
 0x641   :  { %v4932_v28 = vsub.f32 1.0, %v4931_v44  ;;  %v4965_v38 = vmul.f32 %v4928_v36, %v8362_v17  ;;  %v6363_v17 = vor.u32 %v6621_v47, %v6360_v49  ;;  %v4956_v34 = vand.u32 2147483648, %v8491_v52  ;;  %v6630_v49 = vld [vmem:[#allocation11 + $0x38] sm:$0xff] }
 0x642   :  { %v4998_v15 = vsub.f32 1.0, %v4997_v55  ;;  %v4979_v27 = vadd.f32 %v4978_v16, %v4977_v26  ;;  %vm4950_vm1 = vweird.f32 %v8491_v52  ;;  %vm4955_vm3 = vcmp.eq.f32.partialorder %v4954_v58, 8.507059e+37  ;;  %5329 = vmatpush.bf16.msra.mxu0 %v6630_v49 }
 0x643   :  { %v4933_v1 = vmul.f32 %v8489_v43, %v4932_v28  ;;  %v4982_v7 = vadd.f32 %v4965_v38, %v4964_v24  ;;  %5142 = vmatpush.bf16.msra.mxu3 %v6363_v17  ;;  %v4957_v12 = vor.u32 1.1754944e-38, %v4956_v34  ;;  %v4973_v13 = vrot.slane %v4972_v11, 1  ;;  %v6328_v28 = vld [vmem:[#allocation10 + $0x38] sm:$0xf0]  ;;  %v6637_v17 = vld [vmem:[#allocation11 + $0x70] sm:$0xff] }
 0x644   :  { %v4980_v19 = vrot.slane %v4979_v27, 1  ;;  %vm5001_vm4 = vweird.f32 %v8497_v40 }
 0x645   :  { %v4983_v25 = vrot.slane %v4982_v7, 4  ;;  %v4934_v22 = vadd.f32 %v8489_v43, %v4933_v1  ;;  %v4974_v24 = vadd.f32 %v4973_v13, %v4972_v11  ;;  %v6611_v1 = vld [vmem:[#allocation10 + $0x24] sm:$0xf]  ;;  %v6636_v11 = vld [vmem:[#allocation11 + $0x68] sm:$0xff] }
 0x646   :  { %v6900_v60 = vpop.eup %6899  ;;  %v4981_v4 = vadd.f32 %v4980_v19, %v4979_v27  ;;  %v6323_v29 = vor.u32 %v6611_v1, %v6320_v63  ;;  %v6627_v27 = vld [vmem:[#allocation11 + $0x20] sm:$0xff] }
 0x647   :  { %v4946_v35 = vmul.f32 %v6900_v60, %v8491_v52  ;;  %v4984_v54 = vadd.f32 %v4983_v25, %v4982_v7  ;;  %v4938_v3 = vsel %vm8511_vm14, %v8489_v43, %v4934_v22  ;;  %vm4951_vm15 = vweird.f32 %v6900_v60  ;;  %5143 = vmatpush.bf16.msra.mxu3 %v6355_v57  ;;  %v6638_v7 = vld [vmem:[#allocation11 + $0x78] sm:$0xff]  ;;  %v6609_v25 = vld [vmem:[#allocation10 + $0x14] sm:$0xf]  ;;  %v6623_v19 = vld [vmem:[#allocation11] sm:$0xff] }
 0x648   :  { %v4943_v62 = vsel %vm4940_vm0, %v4942_v30, %v4938_v3  ;;  %vm4952_vm2 = vmor %vm4950_vm1, %vm4951_vm15  ;;  %v4999_v43 = vmul.f32 %v8497_v40, %v4998_v15  ;;  %v6312_v22 = vld [vmem:[#allocation10 + $0x18] sm:$0xf0]  ;;  %5342 = vmatpush.bf16.msra.mxu1 %v6638_v7  ;;  %v6631_v63 = vld [vmem:[#allocation11 + $0x40] sm:$0xff] }
 0x649   :  { %v4947_v61 = vsub.f32 1.0, %v4946_v35  ;;  %v4985_v23 = vrot.slane %v4984_v54, 2  ;;  %v4966_v44 = vmul.f32 %v4943_v62, %v8379_v5  ;;  %v6331_v5 = vor.u32 %v6613_v46, %v6328_v28  ;;  %v6629_v35 = vld [vmem:[#allocation11 + $0x30] sm:$0xff] }
 0x64a   :  { %v5000_v8 = vadd.f32 %v8497_v40, %v4999_v43  ;;  %v6315_v10 = vor.u32 %v6609_v25, %v6312_v22  ;;  %5330 = vmatpush.bf16.msra.mxu0 %v6629_v35  ;;  %v6625_v43 = vld [vmem:[#allocation11 + $0x10] sm:$0xff] }
 0x64b   :  { %v4948_v53 = vmul.f32 %v6900_v60, %v4947_v61  ;;  %v4986_v33 = vadd.f32 %v4985_v23, %v4984_v54  ;;  %5144 = vmatpush.bf16.msra.mxu3 %v6347_v6  ;;  %v6607_v54 = vld [vmem:[#allocation10 + $0x4] sm:$0xf]  ;;  %v6646_v46 = vld [vmem:[%s8565_s10 + $0x38] sm:$0xff] }
 0x64c   :  { %5343 = vmatpush.bf16.msra.mxu1 %v6637_v17  ;;  %v6307_v57 = vor.u32 %v6607_v54, %v6304_v45  ;;  %v6635_v6 = vld [vmem:[#allocation11 + $0x60] sm:$0xff]  ;;  %5444 = vmatpush.bf16.msra.mxu2 %v6646_v46 }
 0x64d   :  { %v4949_v50 = vadd.f32 %v6900_v60, %v4948_v53  ;;  %v4987_v52 = vrot.slane %v4986_v33, 1 }
 0x64e   :  { %5331 = vmatpush.bf16.msra.mxu0 %v6628_v31  ;;  %v6640_v31 = vld [vmem:[%s8565_s10 + $0x8] sm:$0xff] }
 0x64f   :  { %v4953_v59 = vsel %vm4952_vm2, %v6900_v60, %v4949_v50  ;;  %v4988_v48 = vadd.f32 %v4987_v52, %v4986_v33  ;;  %5145 = vmatpush.bf16.msra.mxu3 %v6339_v32  ;;  %v5029_v50 = vperm.slane %v5027_v2, 0  ;;  %v6626_v33 = vld [vmem:[#allocation11 + $0x18] sm:$0xff]  ;;  %v6633_v32 = vld [vmem:[#allocation11 + $0x50] sm:$0xff] }
 0x650   :  { %v4958_v56 = vsel %vm4955_vm3, %v4957_v12, %v4953_v59  ;;  %5344 = vmatpush.bf16.msra.mxu1 %v6636_v11  ;;  %v6634_v52 = vld [vmem:[#allocation11 + $0x58] sm:$0xff] }
 0x651   :  { %v4967_v18 = vmul.f32 %v4958_v56, %v8437_v51  ;;  %v5002_v51 = vsel %vm5001_vm4, %v8497_v40, %v5000_v8  ;;  %v6624_v56 = vld [vmem:[#allocation11 + $0x8] sm:$0xff] }
 0x652   :  { %v5004_v0 = vmul.f32 %v5002_v51, %v4981_v4  ;;  %v5005_v47 = vmul.f32 %v5002_v51, %v4988_v48  ;;  %v5003_v60 = vmul.f32 %v5002_v51, %v4974_v24  ;;  %5332 = vmatpush.bf16.msra.mxu0 %v6627_v27  ;;  %v6645_v48 = vld [vmem:[%s8565_s10 + $0x30] sm:$0xff]  ;;  %v6639_v27 = vld [vmem:[%s8565_s10] sm:$0xff] }
 0x653   :  { %v4989_v20 = vadd.f32 %v4967_v18, %v4966_v44  ;;  %5146 = vmatpush.bf16.msra.mxu3 %v6331_v5  ;;  %v5030_v18 = vperm.slane %v5027_v2, 1  ;;  %5445 = vmatpush.bf16.msra.mxu2 %v6645_v48 }
 0x654   :  { %v5008_v14 = vpack.c.bf16 %v5004_v0, %v5004_v0  ;;  %v5009_v40 = vpack.c.bf16 %v5005_v47, %v5005_v47  ;;  %v5007_v55 = vpack.c.bf16 %v5003_v60, %v5003_v60  ;;  %5345 = vmatpush.bf16.msra.mxu1 %v6635_v6 }
 0x655   :  { %v4990_v36 = vrot.slane %v4989_v20, 4 }
 0x656   :  { %v5038_v61 = vunpack.c.l.b16 %v5008_v14  ;;  %v5039_v39 = vunpack.c.l.b16 %v5009_v40  ;;  %v5037_v58 = vunpack.c.l.b16 %v5007_v55  ;;  %5333 = vmatpush.bf16.msra.mxu0 %v6626_v33 }
 0x657   :  { %v4991_v38 = vadd.f32 %v4990_v36, %v4989_v20  ;;  %5147 = vmatpush.bf16.msra.mxu3 %v6323_v29  ;;  %v6632_v36 = vld [vmem:[#allocation11 + $0x48] sm:$0xff] }
 0x658   :  { %v5042_v3 = vsel %vm5041_vm5, %v5038_v61, %v5037_v58  ;;  %5346 = vmatpush.bf16.msra.mxu1 %v6634_v52  ;;  %v6644_v61 = vld [vmem:[%s8565_s10 + $0x28] sm:$0xff] }
 0x659   :  { %v4992_v26 = vrot.slane %v4991_v38, 2  ;;  %v5044_v53 = vsel %vm5043_vm6, %v5039_v39, %v5042_v3  ;;  %5446 = vmatpush.bf16.msra.mxu2 %v6644_v61  ;;  %v6673_v52 = vld [vmem:[#allocation14 + $0xa] ss:$0 sm:$0xff] }
 0x65a   :  { %5334 = vmatpush.bf16.msra.mxu0 %v6625_v43 }
 0x65b   :  { %v4993_v42 = vadd.f32 %v4992_v26, %v4991_v38  ;;  %5148 = vmatpush.bf16.msra.mxu3 %v6315_v10 }
 0x65c   :  { %5347 = vmatpush.bf16.msra.mxu1 %v6633_v32 }
 0x65d   :  { %v4994_v9 = vrot.slane %v4993_v42, 1 }
 0x65e   :  { %5335 = vmatpush.bf16.msra.mxu0 %v6624_v56 }
 0x65f   :  { %v4995_v16 = vadd.f32 %v4994_v9, %v4993_v42  ;;  %5149 = vmatpush.bf16.msra.mxu3 %v6307_v57 }
 0x660   :  { %5348 = vmatpush.bf16.msra.mxu1 %v6632_v36  ;;  %v6647_v36 = vld [vmem:[#allocation13] sm:$0xff] }
 0x661   :  { %v5006_v41 = vmul.f32 %v5002_v51, %v4995_v16 }
 0x662   :  { %5336 = vmatpush.bf16.msra.mxu0 %v6623_v19 }
 0x663   :  { %v5010_v34 = vpack.c.bf16 %v5006_v41, %v5006_v41  ;;  %v6643_v41 = vld [vmem:[%s8565_s10 + $0x20] sm:$0xff] }
 0x664   :  { %5349 = vmatpush.bf16.msra.mxu1 %v6631_v63  ;;  %5447 = vmatpush.bf16.msra.mxu2 %v6643_v41 }
 0x665   :  { %v5040_v23 = vunpack.c.l.b16 %v5010_v34  ;;  %v6672_v34 = vld [vmem:[#allocation14 + $0x9] ss:$0 sm:$0xff] }
 0x667   :  { %v5046_v15 = vsel %vm5045_vm8, %v5040_v23, %v5044_v53  ;;  %v6642_v23 = vld [vmem:[%s8565_s10 + $0x18] sm:$0xff] }
 0x668   :  { %v5047_v30 = vpack.c.b16 %v5046_v15, %v5046_v15  ;;  %5448 = vmatpush.bf16.msra.mxu2 %v6642_v23  ;;  %v6641_v15 = vld [vmem:[%s8565_s10 + $0x10] sm:$0xff] }
 0x66a   :  { %5137 = vmatmul.bf16.vlgmr.msrb.gmra.mxu3 %v5047_v30 }
 0x66c   :  { %5449 = vmatpush.bf16.msra.mxu2 %v6641_v15 }
 0x670   :  { %5450 = vmatpush.bf16.msra.mxu2 %v6640_v31 }
 0x674   :  { %5451 = vmatpush.bf16.msra.mxu2 %v6639_v27 }
 0x67a   :  { %5150 = vmatmul.bf16.vlgmr.msra.gmra.mxu3 %v5047_v30 }
 0x6ed   :  { %v5138_v62 = vpop.f32.mrf.mxu3 }
 0x6ee   :  { %v5139_v12 = vadd.f32 %v5138_v62, %v5029_v50 }
 0x6f0   :  { %v6364_v59 = vmul.f32 -1.442695, %v5139_v12 }
 0x6f2   :  { %6901 = vpow2.f32 %v6364_v59 }
 0x6f5   :  { %v5140_v21 = vpop.f32.mrf.mxu3 }
 0x6f8   :  { %v6902_v37 = vpop.eup %6901 }
 0x6f9   :  { %v5161_v44 = vadd.f32 1.0, %v6902_v37 }
 0x6fb   :  { %6903 = vrcp.f32 %v5161_v44  ;;  %v5174_v38 = vand.u32 2147483648, %v5161_v44  ;;  %v5172_v1 = vand.u32 2147483647, %v5161_v44  ;;  %vm5168_vm10 = vweird.f32 %v5161_v44 }
 0x6fd   :  { %v5151_v13 = vpop.f32.mrf.mxu3  ;;  %v5175_v47 = vor.u32 1.1754944e-38, %v5174_v38  ;;  %vm5173_vm12 = vcmp.eq.f32.partialorder %v5172_v1, 8.507059e+37 }
 0x6fe   :  { %v5152_v20 = vadd.f32 %v5151_v13, %v5030_v18  ;;  %v6650_v13 = vld [vmem:[#allocation13 + $0x18] sm:$0xff] }
 0x6ff   :  { %5521 = vmatpush.bf16.msrb.mxu3 %v6650_v13 }
 0x700   :  { %v6365_v8 = vmul.f32 -1.442695, %v5152_v20 }
 0x701   :  { %v6904_v28 = vpop.eup %6903 }
 0x702   :  { %v5164_v4 = vmul.f32 %v6904_v28, %v5161_v44  ;;  %6905 = vpow2.f32 %v6365_v8  ;;  %vm5169_vm9 = vweird.f32 %v6904_v28  ;;  %v6649_v8 = vld [vmem:[#allocation13 + $0x10] sm:$0xff] }
 0x703   :  { %vm5170_vm11 = vmor %vm5168_vm10, %vm5169_vm9  ;;  %5522 = vmatpush.bf16.msrb.mxu3 %v6649_v8 }
 0x704   :  { %v5165_v24 = vsub.f32 1.0, %v5164_v4 }
 0x705   :  { %v5153_v5 = vpop.f32.mrf.mxu3 }
 0x706   :  { %v5166_v51 = vmul.f32 %v6904_v28, %v5165_v24 }
 0x708   :  { %v6906_v0 = vpop.eup %6905  ;;  %v5167_v26 = vadd.f32 %v6904_v28, %v5166_v51 }
 0x709   :  { %v5162_v49 = vadd.f32 1.0, %v6906_v0 }
 0x70a   :  { %v5171_v7 = vsel %vm5170_vm11, %v6904_v28, %v5167_v26  ;;  %v6648_v28 = vld [vmem:[#allocation13 + $0x8] sm:$0xff] }
 0x70b   :  { %v5176_v60 = vsel %vm5173_vm12, %v5175_v47, %v5171_v7  ;;  %6907 = vrcp.f32 %v5162_v49  ;;  %v5189_v17 = vand.u32 2147483648, %v5162_v49  ;;  %v5187_v9 = vand.u32 2147483647, %v5162_v49  ;;  %5523 = vmatpush.bf16.msrb.mxu3 %v6648_v28 }
 0x70c   :  { %v5193_v42 = vmul.f32 %v5176_v60, %v5139_v12  ;;  %vm5183_vm14 = vweird.f32 %v5162_v49 }
 0x70d   :  { %v5190_v55 = vor.u32 1.1754944e-38, %v5189_v17  ;;  %vm5188_vm0 = vcmp.eq.f32.partialorder %v5187_v9, 8.507059e+37 }
 0x70e   :  { %v5195_v29 = vpack.c.bf16 %v5193_v42, %v5193_v42 }
 0x70f   :  { %5524 = vmatpush.bf16.msrb.mxu3 %v6647_v36 }
 0x710   :  { %5337 = vmatmul.bf16.vlgmr.msra.gmra.mxu0 %v5195_v29  ;;  %v6674_v29 = vld [vmem:[#allocation14 + $0xb] ss:$0 sm:$0xff] }
 0x711   :  { %v6908_v25 = vpop.eup %6907 }
 0x712   :  { %v5179_v22 = vmul.f32 %v6908_v25, %v5162_v49  ;;  %vm5184_vm13 = vweird.f32 %v6908_v25 }
 0x713   :  { %vm5185_vm15 = vmor %vm5183_vm14, %vm5184_vm13 }
 0x714   :  { %v5180_v35 = vsub.f32 1.0, %v5179_v22 }
 0x716   :  { %v5181_v14 = vmul.f32 %v6908_v25, %v5180_v35 }
 0x718   :  { %v5182_v40 = vadd.f32 %v6908_v25, %v5181_v14 }
 0x71a   :  { %v5186_v16 = vsel %vm5185_vm15, %v6908_v25, %v5182_v40 }
 0x71b   :  { %v5191_v10 = vsel %vm5188_vm0, %v5190_v55, %v5186_v16 }
 0x71c   :  { %v5194_v54 = vmul.f32 %v5191_v10, %v5152_v20 }
 0x71e   :  { %v5196_v45 = vpack.c.bf16 %v5194_v54, %v5194_v54 }
 0x720   :  { %5350 = vmatmul.bf16.vlgmr.msra.gmra.mxu1 %v5196_v45 }
 0x78d   :  { %v5338_v39 = vpop.f32.mrf.mxu0 }
 0x78e   :  { %v5339_v57 = vadd.f32 %v6672_v34, %v5338_v39 }
 0x795   :  { %v5340_v58 = vpop.f32.mrf.mxu0 }
 0x79d   :  { %v5351_v3 = vpop.f32.mrf.mxu1 }
 0x79e   :  { %v5352_v53 = vadd.f32 %v5351_v3, %v5339_v57 }
 0x7a0   :  { %v6430_v30 = vmul.f32 -1.442695, %v5352_v53 }
 0x7a2   :  { %6909 = vpow2.f32 %v6430_v30 }
 0x7a5   :  { %v5353_v2 = vpop.f32.mrf.mxu1 }
 0x7a8   :  { %v6910_v50 = vpop.eup %6909 }
 0x7a9   :  { %v5358_v33 = vadd.f32 1.0, %v6910_v50 }
 0x7ab   :  { %6911 = vrcp.f32 %v5358_v33  ;;  %v5370_v59 = vand.u32 2147483648, %v5358_v33  ;;  %v5368_v43 = vand.u32 2147483647, %v5358_v33  ;;  %vm5364_vm2 = vweird.f32 %v5358_v33 }
 0x7ad   :  { %v5371_v21 = vor.u32 1.1754944e-38, %v5370_v59  ;;  %vm5369_vm4 = vcmp.eq.f32.partialorder %v5368_v43, 8.507059e+37 }
 0x7b1   :  { %v6912_v62 = vpop.eup %6911 }
 0x7b2   :  { %v5360_v12 = vmul.f32 %v6912_v62, %v5358_v33  ;;  %vm5365_vm1 = vweird.f32 %v6912_v62 }
 0x7b3   :  { %vm5366_vm3 = vmor %vm5364_vm2, %vm5365_vm1 }
 0x7b4   :  { %v5361_v11 = vsub.f32 1.0, %v5360_v12 }
 0x7b6   :  { %v5362_v6 = vmul.f32 %v6912_v62, %v5361_v11 }
 0x7b8   :  { %v5363_v56 = vadd.f32 %v6912_v62, %v5362_v6 }
 0x7ba   :  { %v5367_v37 = vsel %vm5366_vm3, %v6912_v62, %v5363_v56 }
 0x7bb   :  { %v5372_v19 = vsel %vm5369_vm4, %v5371_v21, %v5367_v37 }
 0x7bc   :  { %v5374_v44 = vmul.f32 %v5372_v19, %v5352_v53 }
 0x7be   :  { %v5375_v18 = vpack.c.bf16 %v5374_v44, %v5374_v44 }
 0x7c0   :  { %5452 = vmatmul.bf16.vlgmr.msra.gmra.mxu2 %v5375_v18 }
 0x843   :  { %v5453_v20 = vpop.f32.mrf.mxu2 }
 0x844   :  { %v5454_v32 = vadd.f32 %v6673_v52, %v5453_v20 }
 0x846   :  { %v6463_v46 = vmul.f32 -1.442695, %v5454_v32 }
 0x848   :  { %6913 = vpow2.f32 %v6463_v46 }
 0x84b   :  { %v5455_v4 = vpop.f32.mrf.mxu2 }
 0x84e   :  { %v6914_v48 = vpop.eup %6913 }
 0x84f   :  { %v5460_v24 = vadd.f32 1.0, %v6914_v48 }
 0x851   :  { %6915 = vrcp.f32 %v5460_v24  ;;  %v5472_v1 = vand.u32 2147483648, %v5460_v24  ;;  %v5470_v0 = vand.u32 2147483647, %v5460_v24  ;;  %vm5466_vm6 = vweird.f32 %v5460_v24 }
 0x853   :  { %v5473_v47 = vor.u32 1.1754944e-38, %v5472_v1  ;;  %vm5471_vm9 = vcmp.eq.f32.partialorder %v5470_v0, 8.507059e+37 }
 0x857   :  { %v6916_v38 = vpop.eup %6915 }
 0x858   :  { %v5462_v5 = vmul.f32 %v6916_v38, %v5460_v24  ;;  %vm5467_vm5 = vweird.f32 %v6916_v38 }
 0x859   :  { %vm5468_vm8 = vmor %vm5466_vm6, %vm5467_vm5 }
 0x85a   :  { %v5463_v51 = vsub.f32 1.0, %v5462_v5 }
 0x85c   :  { %v5464_v63 = vmul.f32 %v6916_v38, %v5463_v51 }
 0x85e   :  { %v5465_v26 = vadd.f32 %v6916_v38, %v5464_v63 }
 0x860   :  { %v5469_v49 = vsel %vm5468_vm8, %v6916_v38, %v5465_v26 }
 0x861   :  { %v5474_v7 = vsel %vm5471_vm9, %v5473_v47, %v5469_v49 }
 0x862   :  { %v5476_v60 = vmul.f32 %v5474_v7, %v5454_v32 }
 0x864   :  { %v5477_v42 = vpack.c.bf16 %v5476_v60, %v5476_v60 }
 0x866   :  { %6480 = vmatmul.msk.bf16.vlgmr.msrb.gmra.mxu3 %vm808_vm7, %v5477_v42 }
 0x8e9   :  { %v5526_v25 = vpop.f32.mrf.mxu3 }
 0x8ea   :  { %v5527_v22 = vadd.f32 %v6674_v29, %v5526_v25 }
 0x8ec   :  { %5530 = vst [vmem:[%s8568_s13] sm:$0xf] %v5527_v22 }
 0x8f1   :  { %v5528_v35 = vpop.f32.mrf.mxu3 }
 0x8f2   :  { %5535 = vsyncpa [#allocation4], 1 }
 0x8f3   :  { %5536 = vsyncpa [#allocation6], 1 }
 0x8f4   :  { %5537 = vsyncpa [#allocation9], 1 }
 0x8f5   :  { %5538 = vsyncpa [#allocation12], 1 }
 0x8f6   :  { %5539 = vsyncpa [#allocation15], 1 }

</bundles_post_ra>
